<compile_context>
chip_gen: v5e
topology: v5e:2x2
jax: 0.10.0
libtpu: 0.0.40
codegen_flags: <defaults>
</compile_context>

<pallas_src>
import functools
import math

import jax
import jax.numpy as jnp
from jax.experimental import pallas as pl
from jax.experimental.pallas import tpu as pltpu  # noqa: F401  (TPU backend assumed)

# ----------------------------- constants -------------------------------------
NUM_CLASS = 10          # reference derives it from `label.max()`; fixed here
G = 8                   # RBF grid points per input feature (FastKAN assumption)
RBF_LO, RBF_HI = -2.0, 2.0
RBF_H = (RBF_HI - RBF_LO) / (G - 1)          # grid spacing == RBF bandwidth
RBF_INV_H = 1.0 / RBF_H
# Clamp the RBF argument so the exp-recurrence can never overflow; at the clamp
# boundary every basis value is < 2e-28, i.e. numerically identical to the exact
# evaluation at bf16/f32 precision.
X_CLAMP_LO = RBF_LO - 8.0 * RBF_H
X_CLAMP_HI = RBF_HI + 8.0 * RBF_H
# phi_g / phi_{g-1} = exp(2u) * exp(1 - 2g)  with u = (x - c_0) / h
_KG = tuple(math.exp(1.0 - 2.0 * g) for g in range(1, G))


# ----------------------------- in-kernel helpers ------------------------------
def _kan_basis(x, axis):
    """FastKAN basis [SiLU(x) | phi_0 | ... | phi_{G-1}] concatenated along `axis`.

    Only 2 exp + 1 logistic per element (EUP); the remaining G-1 grid points are
    generated by the recurrence phi_g = phi_{g-1} * r * e^{1-2g} on the VPU.
    All transcendentals stay f32 (safe on v5e; on v6e/v7x the EUP is no longer the
    binding slot after the recurrence, and bf16 exponents would be amplified by it).
    """
    silu = x * jax.lax.logistic(x)
    u = (jnp.clip(x, X_CLAMP_LO, X_CLAMP_HI) - RBF_LO) * RBF_INV_H
    phi = jnp.exp(-(u * u))            # phi_0 = exp(-((x - c_0)/h)^2)
    r = jnp.exp(u + u)                 # exp(2u)
    feats = [silu, phi]
    for g in range(1, G):
        phi = phi * (r * _KG[g - 1])   # == exp(-((x - c_g)/h)^2) up to rounding
        feats.append(phi)
    return jnp.concatenate(feats, axis=axis)


# ----------------------------- Pallas kernels --------------------------------
def chain_kernel(x_ref, w1_ref, w2_ref, w3_ref, o_ref):
    """Fused ConvKAN1->2->3 (kernel_size=1) in transposed (channel, token) layout.

    x_ref : [16, M] f32   tokens on the lane axis (Cin zero-padded 15 -> 16)
    wN_ref: [CoutN, (G+1)*CinN] bf16  packed [base | spline_0..7] weights, transposed
    o_ref : [32, M] bf16  lane-dense output
    """
    h = x_ref[...]
    for w_ref in (w1_ref, w2_ref, w3_ref):
        feat = _kan_basis(h, axis=0).astype(jnp.bfloat16)     # [(G+1)*Cin, M]
        h = jnp.dot(w_ref[...], feat,                         # one MXU matmul/layer
                    preferred_element_type=jnp.float32)       # [Cout, M] f32
    o_ref[...] = h.astype(o_ref.dtype)


def head_kernel(p_ref, w4_ref, wk1_ref, wk2_ref, o_ref, *, B):
    """Fused ConvKAN4 (only the 9 pooled positions) + MaxPool2d(3,3)
    + KAN([64, 32, NUM_CLASS]) + log_softmax.

    p_ref  : [B*9, 384] bf16   im2col patches; rows = (b, window), 288 real + 96 zero cols
    w4_ref : [(G+1)*384, 64]  bf16
    wk1_ref: [(G+1)*128, 32]  bf16
    wk2_ref: [(G+1)*128, NC]  bf16
    o_ref  : [B, NC] f32       log-probabilities
    """
    x = p_ref[...].astype(jnp.float32)
    c4 = jnp.dot(_kan_basis(x, axis=-1).astype(jnp.bfloat16), w4_ref[...],
                 preferred_element_type=jnp.float32)          # [B*9, 64]

    # MaxPool2d(3, 3): rows b*9 .. b*9+8 are exactly the 3x3 window of conv
    # outputs the pool consumes for batch b.
    pooled = jnp.concatenate(
        [jnp.max(c4[b * 9:(b + 1) * 9, :], axis=0, keepdims=True) for b in range(B)],
        axis=0)                                               # [B, 64]

    # KAN([64, 32, NUM_CLASS]); inputs lane-padded to 128 (zero weight rows match).
    pooled = jnp.concatenate([pooled, jnp.zeros((B, 64), jnp.float32)], axis=-1)
    h = jnp.dot(_kan_basis(pooled, axis=-1).astype(jnp.bfloat16), wk1_ref[...],
                preferred_element_type=jnp.float32)           # [B, 32]
    h = jnp.concatenate([h, jnp.zeros((B, 96), jnp.float32)], axis=-1)
    logits = jnp.dot(_kan_basis(h, axis=-1).astype(jnp.bfloat16), wk2_ref[...],
                     preferred_element_type=jnp.float32)      # [B, NC]

    # F.log_softmax(dim=1)
    m = jnp.max(logits, axis=-1, keepdims=True)
    s = logits - m
    lse = jnp.log(jnp.sum(jnp.exp(s), axis=-1, keepdims=True))
    o_ref[...] = (s - lse).astype(o_ref.dtype)


# ----------------------------- Pallas wrappers --------------------------------
def kan_chain(xt, w1t, w2t, w3t):
    """xt: [16, M] f32 (channel x token) -> [32, M] bf16 in one grid step."""
    cin, M = xt.shape
    cout = w3t.shape[0]
    return pl.pallas_call(
        chain_kernel,
        out_shape=jax.ShapeDtypeStruct((cout, M), jnp.bfloat16),
        grid=(1,),
        in_specs=[
            pl.BlockSpec((cin, M), lambda i: (0, 0)),
            pl.BlockSpec(w1t.shape, lambda i: (0, 0)),
            pl.BlockSpec(w2t.shape, lambda i: (0, 0)),
            pl.BlockSpec(w3t.shape, lambda i: (0, 0)),
        ],
        out_specs=pl.BlockSpec((cout, M), lambda i: (0, 0)),
    )(xt, w1t, w2t, w3t)


def kan_head(patches, w4, wk1, wk2, *, B):
    """patches: [B*9, 384] -> [B, NUM_CLASS] log-probs in one grid step."""
    rows, kp = patches.shape
    ncls = wk2.shape[1]
    kern = functools.partial(head_kernel, B=B)
    return pl.pallas_call(
        kern,
        out_shape=jax.ShapeDtypeStruct((B, ncls), jnp.float32),
        grid=(1,),
        in_specs=[
            pl.BlockSpec((rows, kp), lambda i: (0, 0)),
            pl.BlockSpec(w4.shape, lambda i: (0, 0)),
            pl.BlockSpec(wk1.shape, lambda i: (0, 0)),
            pl.BlockSpec(wk2.shape, lambda i: (0, 0)),
        ],
        out_specs=pl.BlockSpec((B, ncls), lambda i: (0, 0)),
    )(patches, w4, wk1, wk2)


# ----------------------------- glue (plain JAX) --------------------------------
def net_forward(x, params):
    """x: [B, 15, D, H, W] (PyTorch NCDHW), returns [B, NUM_CLASS] log-probs."""
    B, C, D, H, W = x.shape

    # --- ConvKAN1..3 (kernel_size=1 3D KAN convs == pointwise KAN linears) -----
    xt = jnp.transpose(x, (1, 0, 2, 3, 4)).reshape(C, -1)       # [15, M], (b,d,h,w) cols
    xt = jnp.concatenate([xt, jnp.zeros((1, xt.shape[1]), xt.dtype)], axis=0)  # Cin 15->16
    yt = kan_chain(xt, params["c1"], params["c2"], params["c3"])   # [32, M] bf16

    # x.view(b, c, d, h*w)
    y = jnp.transpose(yt.reshape(32, B, D, H * W), (1, 0, 2, 3))   # [B, 32, D, H*W]

    # --- ConvKAN4 (3x3, s2, p1) im2col restricted to the 9 conv-output positions
    #     consumed by MaxPool2d(3, 3); KAN([64, ...]) implies a 1x1 pooled map. ---
    DH, DW = D, H * W
    OH = (DH + 2 - 3) // 2 + 1
    OW = (DW + 2 - 3) // 2 + 1
    assert OH >= 3 and OW >= 3, (OH, OW)        # pool needs one full 3x3 window
    yp = jnp.pad(y, ((0, 0), (0, 0), (1, 1), (1, 1)))              # conv zero padding
    cols = []
    for kh in range(3):
        for kw in range(3):
            cols.append(yp[:, :, kh:kh + 5:2, kw:kw + 5:2])        # [B, 32, 3, 3]
    patches = jnp.stack(cols, axis=2)                              # [B, 32, 9, 3, 3]
    patches = jnp.transpose(patches, (0, 3, 4, 2, 1))              # [B, oh, ow, k, c]
    patches = patches.reshape(B * 9, 9 * 32)                       # rows = (b, window)
    # lane-align patch width 288 -> 384 (matching zero rows in the packed c4 weight)
    patches = jnp.concatenate(
        [patches, jnp.zeros((B * 9, 384 - 288), patches.dtype)], axis=-1)

    # --- fused ConvKAN4 + MaxPool(3,3) + KAN MLP + log_softmax -----------------
    return kan_head(patches, params["c4"], params["k1"], params["k2"], B=B)


# ----------------------------- parameter init ---------------------------------
def init_kan_params(key, cin, cout, *, cin_pad=None, transpose=False):
    """Random FastKAN weights packed into ONE bf16 matrix for a single matmul.

    Row layout along the contraction axis: [base; spline_0; ...; spline_{G-1}],
    matching the [SiLU | phi_0 | ... | phi_{G-1}] basis concatenation.  Each block
    is zero-padded from `cin` to `cin_pad` rows so the in-kernel concatenation is
    (8, 128)-tile aligned.
    """
    cin_pad = cin if cin_pad is None else cin_pad
    k1, k2 = jax.random.split(key)
    wb = jax.random.normal(k1, (cin, cout), jnp.float32) / math.sqrt(float(cin))
    ws = jax.random.normal(k2, (G, cin, cout), jnp.float32) / math.sqrt(float(cin * G))
    pad = jnp.zeros((cin_pad - cin, cout), jnp.float32)
    blocks = [jnp.concatenate([wb, pad], axis=0)]
    for g in range(G):
        blocks.append(jnp.concatenate([ws[g], pad], axis=0))
    w = jnp.concatenate(blocks, axis=0)                  # [(G+1)*cin_pad, cout]
    if transpose:
        w = w.T                                          # [cout, (G+1)*cin_pad]
    return w.astype(jnp.bfloat16)


if __name__ == "__main__":
    key = jax.random.PRNGKey(0)
    kx, k1, k2, k3, k4, k5, k6 = jax.random.split(key, 7)

    params = {
        # transposed (Cout-major) packing for the lane-dense fused chain kernel;
        # layer-1 Cin zero-padded 15 -> 16 for sublane alignment.
        "c1": init_kan_params(k1, 15, 8, cin_pad=16, transpose=True),   # 15 -> 8
        "c2": init_kan_params(k2, 8, 16, transpose=True),               # 8  -> 16
        "c3": init_kan_params(k3, 16, 32, transpose=True),              # 16 -> 32
        # row-major packing for the head; contraction blocks lane-padded to x128.
        "c4": init_kan_params(k4, 32 * 9, 64, cin_pad=384),   # ConvKAN 32->64, 3x3 s2 p1
        "k1": init_kan_params(k5, 64, 32, cin_pad=128),       # KAN 64 -> 32
        "k2": init_kan_params(k6, 32, NUM_CLASS, cin_pad=128),# KAN 32 -> NUM_CLASS
    }

    # Input [B, C=15, D=8, H=3, W=3]: ConvKAN4 (stride 2, pad 1) + MaxPool(3,3)
    # yield a 1x1 map, giving the 64-wide flatten KAN([64, 32, NUM_CLASS]) expects.
    x = jax.random.normal(kx, (2, 15, 8, 3, 3), jnp.float32)

    fwd = jax.jit(net_forward)
    out = jax.block_until_ready(fwd(x, params))

    assert out.shape == (2, NUM_CLASS), out.shape
    # log-softmax rows must exponentiate-sum to ~1
    assert jnp.allclose(jnp.sum(jnp.exp(out), axis=1), 1.0, atol=1e-3)
    print("KERNEL_OK")
</pallas_src>

<mosaic_0001>
module attributes {stable_mosaic.version = 11 : i64} {
  func.func @chain_kernel(%arg0: i32, %arg1: memref<16x144xf32, #tpu.memory_space<vmem>>, %arg2: memref<8x144xbf16, #tpu.memory_space<vmem>>, %arg3: memref<16x72xbf16, #tpu.memory_space<vmem>>, %arg4: memref<32x144xbf16, #tpu.memory_space<vmem>>, %arg5: memref<32x144xbf16, #tpu.memory_space<vmem>>) attributes {dimension_semantics = [#tpu.dimension_semantics<arbitrary>], iteration_bounds = array<i64: 1>, scalar_prefetch = 0 : i64, scratch_operands = 0 : i64, tpu.core_type = #tpu.core_type<tc>, window_params = [{pipeline_mode = #tpu.pipeline_mode<synchronous>, transform_indices = @transform_0, window_bounds = array<i64: 16, 144>}, {pipeline_mode = #tpu.pipeline_mode<synchronous>, transform_indices = @transform_1, window_bounds = array<i64: 8, 144>}, {pipeline_mode = #tpu.pipeline_mode<synchronous>, transform_indices = @transform_2, window_bounds = array<i64: 16, 72>}, {pipeline_mode = #tpu.pipeline_mode<synchronous>, transform_indices = @transform_3, window_bounds = array<i64: 32, 144>}, {pipeline_mode = #tpu.pipeline_mode<synchronous>, transform_indices = @transform_4, window_bounds = array<i64: 32, 144>}]} {
    %c0 = arith.constant 0 : index
    %c0_0 = arith.constant 0 : index
    %0 = vector.load %arg1[%c0, %c0_0] : memref<16x144xf32, #tpu.memory_space<vmem>>, vector<16x144xf32>
    %1 = arith.negf %0 : vector<16x144xf32>
    %2 = math.exp %1 : vector<16x144xf32>
    %cst = arith.constant 1.000000e+00 : f32
    %3 = vector.broadcast %cst : f32 to vector<16x144xf32>
    %4 = arith.addf %3, %2 : vector<16x144xf32>
    %5 = arith.divf %3, %4 : vector<16x144xf32>
    %6 = arith.mulf %0, %5 : vector<16x144xf32>
    %cst_1 = arith.constant -6.57142878 : f32
    %cst_2 = arith.constant 6.57142878 : f32
    %7 = vector.broadcast %cst_1 : f32 to vector<16x144xf32>
    %8 = arith.maximumf %7, %0 : vector<16x144xf32>
    %9 = vector.broadcast %cst_2 : f32 to vector<16x144xf32>
    %10 = arith.minimumf %9, %8 : vector<16x144xf32>
    %cst_3 = arith.constant -2.000000e+00 : f32
    %11 = vector.broadcast %cst_3 : f32 to vector<16x144xf32>
    %12 = arith.subf %10, %11 : vector<16x144xf32>
    %cst_4 = arith.constant 1.750000e+00 : f32
    %13 = vector.broadcast %cst_4 : f32 to vector<16x144xf32>
    %14 = arith.mulf %12, %13 : vector<16x144xf32>
    %15 = arith.mulf %14, %14 : vector<16x144xf32>
    %cst_5 = arith.constant 0.000000e+00 : f32
    %16 = vector.broadcast %cst_5 : f32 to vector<16x144xf32>
    %17 = arith.subf %16, %15 : vector<16x144xf32>
    %18 = math.exp %17 : vector<16x144xf32>
    %19 = arith.addf %14, %14 : vector<16x144xf32>
    %20 = math.exp %19 : vector<16x144xf32>
    %cst_6 = arith.constant 0.36787945 : f32
    %21 = vector.broadcast %cst_6 : f32 to vector<16x144xf32>
    %22 = arith.mulf %20, %21 : vector<16x144xf32>
    %23 = arith.mulf %18, %22 : vector<16x144xf32>
    %cst_7 = arith.constant 0.0497870669 : f32
    %24 = vector.broadcast %cst_7 : f32 to vector<16x144xf32>
    %25 = arith.mulf %20, %24 : vector<16x144xf32>
    %26 = arith.mulf %23, %25 : vector<16x144xf32>
    %cst_8 = arith.constant 0.006737947 : f32
    %27 = vector.broadcast %cst_8 : f32 to vector<16x144xf32>
    %28 = arith.mulf %20, %27 : vector<16x144xf32>
    %29 = arith.mulf %26, %28 : vector<16x144xf32>
    %cst_9 = arith.constant 9.118820e-04 : f32
    %30 = vector.broadcast %cst_9 : f32 to vector<16x144xf32>
    %31 = arith.mulf %20, %30 : vector<16x144xf32>
    %32 = arith.mulf %29, %31 : vector<16x144xf32>
    %cst_10 = arith.constant 1.23409802E-4 : f32
    %33 = vector.broadcast %cst_10 : f32 to vector<16x144xf32>
    %34 = arith.mulf %20, %33 : vector<16x144xf32>
    %35 = arith.mulf %32, %34 : vector<16x144xf32>
    %cst_11 = arith.constant 1.670170e-05 : f32
    %36 = vector.broadcast %cst_11 : f32 to vector<16x144xf32>
    %37 = arith.mulf %20, %36 : vector<16x144xf32>
    %38 = arith.mulf %35, %37 : vector<16x144xf32>
    %cst_12 = arith.constant 2.26032944E-6 : f32
    %39 = vector.broadcast %cst_12 : f32 to vector<16x144xf32>
    %40 = arith.mulf %20, %39 : vector<16x144xf32>
    %41 = arith.mulf %38, %40 : vector<16x144xf32>
    %42 = tpu.concatenate %6, %18, %23, %26, %29, %32, %35, %38, %41 in 0 : vector<16x144xf32>, vector<16x144xf32>, vector<16x144xf32>, vector<16x144xf32>, vector<16x144xf32>, vector<16x144xf32>, vector<16x144xf32>, vector<16x144xf32>, vector<16x144xf32> -> vector<144x144xf32>
    %43 = arith.truncf %42 : vector<144x144xf32> to vector<144x144xbf16>
    %c0_13 = arith.constant 0 : index
    %c0_14 = arith.constant 0 : index
    %44 = vector.load %arg2[%c0_13, %c0_14] : memref<8x144xbf16, #tpu.memory_space<vmem>>, vector<8x144xbf16>
    %cst_15 = arith.constant dense<0.000000e+00> : vector<8x144xf32>
    %45 = tpu.matmul %44, %43, %cst_15 {dimension_numbers = #tpu.dot_dimension_numbers<[1], [0], [0], [1], [0, 0, 1, 1], [], []>} : vector<8x144xbf16>, vector<144x144xbf16>, vector<8x144xf32> -> vector<8x144xf32>
    %46 = arith.negf %45 : vector<8x144xf32>
    %47 = math.exp %46 : vector<8x144xf32>
    %cst_16 = arith.constant 1.000000e+00 : f32
    %48 = vector.broadcast %cst_16 : f32 to vector<8x144xf32>
    %49 = arith.addf %48, %47 : vector<8x144xf32>
    %50 = arith.divf %48, %49 : vector<8x144xf32>
    %51 = arith.mulf %45, %50 : vector<8x144xf32>
    %cst_17 = arith.constant -6.57142878 : f32
    %cst_18 = arith.constant 6.57142878 : f32
    %52 = vector.broadcast %cst_17 : f32 to vector<8x144xf32>
    %53 = arith.maximumf %52, %45 : vector<8x144xf32>
    %54 = vector.broadcast %cst_18 : f32 to vector<8x144xf32>
    %55 = arith.minimumf %54, %53 : vector<8x144xf32>
    %cst_19 = arith.constant -2.000000e+00 : f32
    %56 = vector.broadcast %cst_19 : f32 to vector<8x144xf32>
    %57 = arith.subf %55, %56 : vector<8x144xf32>
    %cst_20 = arith.constant 1.750000e+00 : f32
    %58 = vector.broadcast %cst_20 : f32 to vector<8x144xf32>
    %59 = arith.mulf %57, %58 : vector<8x144xf32>
    %60 = arith.mulf %59, %59 : vector<8x144xf32>
    %cst_21 = arith.constant 0.000000e+00 : f32
    %61 = vector.broadcast %cst_21 : f32 to vector<8x144xf32>
    %62 = arith.subf %61, %60 : vector<8x144xf32>
    %63 = math.exp %62 : vector<8x144xf32>
    %64 = arith.addf %59, %59 : vector<8x144xf32>
    %65 = math.exp %64 : vector<8x144xf32>
    %cst_22 = arith.constant 0.36787945 : f32
    %66 = vector.broadcast %cst_22 : f32 to vector<8x144xf32>
    %67 = arith.mulf %65, %66 : vector<8x144xf32>
    %68 = arith.mulf %63, %67 : vector<8x144xf32>
    %cst_23 = arith.constant 0.0497870669 : f32
    %69 = vector.broadcast %cst_23 : f32 to vector<8x144xf32>
    %70 = arith.mulf %65, %69 : vector<8x144xf32>
    %71 = arith.mulf %68, %70 : vector<8x144xf32>
    %cst_24 = arith.constant 0.006737947 : f32
    %72 = vector.broadcast %cst_24 : f32 to vector<8x144xf32>
    %73 = arith.mulf %65, %72 : vector<8x144xf32>
    %74 = arith.mulf %71, %73 : vector<8x144xf32>
    %cst_25 = arith.constant 9.118820e-04 : f32
    %75 = vector.broadcast %cst_25 : f32 to vector<8x144xf32>
    %76 = arith.mulf %65, %75 : vector<8x144xf32>
    %77 = arith.mulf %74, %76 : vector<8x144xf32>
    %cst_26 = arith.constant 1.23409802E-4 : f32
    %78 = vector.broadcast %cst_26 : f32 to vector<8x144xf32>
    %79 = arith.mulf %65, %78 : vector<8x144xf32>
    %80 = arith.mulf %77, %79 : vector<8x144xf32>
    %cst_27 = arith.constant 1.670170e-05 : f32
    %81 = vector.broadcast %cst_27 : f32 to vector<8x144xf32>
    %82 = arith.mulf %65, %81 : vector<8x144xf32>
    %83 = arith.mulf %80, %82 : vector<8x144xf32>
    %cst_28 = arith.constant 2.26032944E-6 : f32
    %84 = vector.broadcast %cst_28 : f32 to vector<8x144xf32>
    %85 = arith.mulf %65, %84 : vector<8x144xf32>
    %86 = arith.mulf %83, %85 : vector<8x144xf32>
    %87 = tpu.concatenate %51, %63, %68, %71, %74, %77, %80, %83, %86 in 0 : vector<8x144xf32>, vector<8x144xf32>, vector<8x144xf32>, vector<8x144xf32>, vector<8x144xf32>, vector<8x144xf32>, vector<8x144xf32>, vector<8x144xf32>, vector<8x144xf32> -> vector<72x144xf32>
    %88 = arith.truncf %87 : vector<72x144xf32> to vector<72x144xbf16>
    %c0_29 = arith.constant 0 : index
    %c0_30 = arith.constant 0 : index
    %89 = vector.load %arg3[%c0_29, %c0_30] : memref<16x72xbf16, #tpu.memory_space<vmem>>, vector<16x72xbf16>
    %cst_31 = arith.constant dense<0.000000e+00> : vector<16x144xf32>
    %90 = tpu.matmul %89, %88, %cst_31 {dimension_numbers = #tpu.dot_dimension_numbers<[1], [0], [0], [1], [0, 0, 1, 1], [], []>} : vector<16x72xbf16>, vector<72x144xbf16>, vector<16x144xf32> -> vector<16x144xf32>
    %91 = arith.negf %90 : vector<16x144xf32>
    %92 = math.exp %91 : vector<16x144xf32>
    %cst_32 = arith.constant 1.000000e+00 : f32
    %93 = vector.broadcast %cst_32 : f32 to vector<16x144xf32>
    %94 = arith.addf %93, %92 : vector<16x144xf32>
    %95 = arith.divf %93, %94 : vector<16x144xf32>
    %96 = arith.mulf %90, %95 : vector<16x144xf32>
    %cst_33 = arith.constant -6.57142878 : f32
    %cst_34 = arith.constant 6.57142878 : f32
    %97 = vector.broadcast %cst_33 : f32 to vector<16x144xf32>
    %98 = arith.maximumf %97, %90 : vector<16x144xf32>
    %99 = vector.broadcast %cst_34 : f32 to vector<16x144xf32>
    %100 = arith.minimumf %99, %98 : vector<16x144xf32>
    %cst_35 = arith.constant -2.000000e+00 : f32
    %101 = vector.broadcast %cst_35 : f32 to vector<16x144xf32>
    %102 = arith.subf %100, %101 : vector<16x144xf32>
    %cst_36 = arith.constant 1.750000e+00 : f32
    %103 = vector.broadcast %cst_36 : f32 to vector<16x144xf32>
    %104 = arith.mulf %102, %103 : vector<16x144xf32>
    %105 = arith.mulf %104, %104 : vector<16x144xf32>
    %cst_37 = arith.constant 0.000000e+00 : f32
    %106 = vector.broadcast %cst_37 : f32 to vector<16x144xf32>
    %107 = arith.subf %106, %105 : vector<16x144xf32>
    %108 = math.exp %107 : vector<16x144xf32>
    %109 = arith.addf %104, %104 : vector<16x144xf32>
    %110 = math.exp %109 : vector<16x144xf32>
    %cst_38 = arith.constant 0.36787945 : f32
    %111 = vector.broadcast %cst_38 : f32 to vector<16x144xf32>
    %112 = arith.mulf %110, %111 : vector<16x144xf32>
    %113 = arith.mulf %108, %112 : vector<16x144xf32>
    %cst_39 = arith.constant 0.0497870669 : f32
    %114 = vector.broadcast %cst_39 : f32 to vector<16x144xf32>
    %115 = arith.mulf %110, %114 : vector<16x144xf32>
    %116 = arith.mulf %113, %115 : vector<16x144xf32>
    %cst_40 = arith.constant 0.006737947 : f32
    %117 = vector.broadcast %cst_40 : f32 to vector<16x144xf32>
    %118 = arith.mulf %110, %117 : vector<16x144xf32>
    %119 = arith.mulf %116, %118 : vector<16x144xf32>
    %cst_41 = arith.constant 9.118820e-04 : f32
    %120 = vector.broadcast %cst_41 : f32 to vector<16x144xf32>
    %121 = arith.mulf %110, %120 : vector<16x144xf32>
    %122 = arith.mulf %119, %121 : vector<16x144xf32>
    %cst_42 = arith.constant 1.23409802E-4 : f32
    %123 = vector.broadcast %cst_42 : f32 to vector<16x144xf32>
    %124 = arith.mulf %110, %123 : vector<16x144xf32>
    %125 = arith.mulf %122, %124 : vector<16x144xf32>
    %cst_43 = arith.constant 1.670170e-05 : f32
    %126 = vector.broadcast %cst_43 : f32 to vector<16x144xf32>
    %127 = arith.mulf %110, %126 : vector<16x144xf32>
    %128 = arith.mulf %125, %127 : vector<16x144xf32>
    %cst_44 = arith.constant 2.26032944E-6 : f32
    %129 = vector.broadcast %cst_44 : f32 to vector<16x144xf32>
    %130 = arith.mulf %110, %129 : vector<16x144xf32>
    %131 = arith.mulf %128, %130 : vector<16x144xf32>
    %132 = tpu.concatenate %96, %108, %113, %116, %119, %122, %125, %128, %131 in 0 : vector<16x144xf32>, vector<16x144xf32>, vector<16x144xf32>, vector<16x144xf32>, vector<16x144xf32>, vector<16x144xf32>, vector<16x144xf32>, vector<16x144xf32>, vector<16x144xf32> -> vector<144x144xf32>
    %133 = arith.truncf %132 : vector<144x144xf32> to vector<144x144xbf16>
    %c0_45 = arith.constant 0 : index
    %c0_46 = arith.constant 0 : index
    %134 = vector.load %arg4[%c0_45, %c0_46] : memref<32x144xbf16, #tpu.memory_space<vmem>>, vector<32x144xbf16>
    %cst_47 = arith.constant dense<0.000000e+00> : vector<32x144xf32>
    %135 = tpu.matmul %134, %133, %cst_47 {dimension_numbers = #tpu.dot_dimension_numbers<[1], [0], [0], [1], [0, 0, 1, 1], [], []>} : vector<32x144xbf16>, vector<144x144xbf16>, vector<32x144xf32> -> vector<32x144xf32>
    %136 = arith.truncf %135 : vector<32x144xf32> to vector<32x144xbf16>
    %c0_48 = arith.constant 0 : index
    %c0_49 = arith.constant 0 : index
    %137 = vector.load %arg5[%c0_48, %c0_49] : memref<32x144xbf16, #tpu.memory_space<vmem>>, vector<32x144xbf16>
    tpu.vector_store %arg5[%c0_48, %c0_49], %136 {strides = array<i32>} : memref<32x144xbf16, #tpu.memory_space<vmem>>, vector<32x144xbf16>,
    return
  }
  func.func @transform_0(%arg0: i32) -> (i32, i32) {
    %c0_i32 = arith.constant 0 : i32
    %c0_i32_0 = arith.constant 0 : i32
    %c0_i32_1 = arith.constant 0 : i32
    return %c0_i32, %c0_i32_0 : i32, i32
  }
  func.func @transform_1(%arg0: i32) -> (i32, i32) {
    %c0_i32 = arith.constant 0 : i32
    %c0_i32_0 = arith.constant 0 : i32
    %c0_i32_1 = arith.constant 0 : i32
    return %c0_i32, %c0_i32_0 : i32, i32
  }
  func.func @transform_2(%arg0: i32) -> (i32, i32) {
    %c0_i32 = arith.constant 0 : i32
    %c0_i32_0 = arith.constant 0 : i32
    %c0_i32_1 = arith.constant 0 : i32
    return %c0_i32, %c0_i32_0 : i32, i32
  }
  func.func @transform_3(%arg0: i32) -> (i32, i32) {
    %c0_i32 = arith.constant 0 : i32
    %c0_i32_0 = arith.constant 0 : i32
    %c0_i32_1 = arith.constant 0 : i32
    return %c0_i32, %c0_i32_0 : i32, i32
  }
  func.func @transform_4(%arg0: i32) -> (i32, i32) {
    %c0_i32 = arith.constant 0 : i32
    %c0_i32_0 = arith.constant 0 : i32
    %c0_i32_1 = arith.constant 0 : i32
    return %c0_i32, %c0_i32_0 : i32, i32
  }
}

module attributes {stable_mosaic.version = 11 : i64} {
  func.func @head_kernel(%arg0: i32, %arg1: memref<18x384xbf16, #tpu.memory_space<vmem>>, %arg2: memref<3456x64xbf16, #tpu.memory_space<vmem>>, %arg3: memref<1152x32xbf16, #tpu.memory_space<vmem>>, %arg4: memref<1152x10xbf16, #tpu.memory_space<vmem>>, %arg5: memref<2x10xf32, #tpu.memory_space<vmem>>) attributes {dimension_semantics = [#tpu.dimension_semantics<arbitrary>], iteration_bounds = array<i64: 1>, scalar_prefetch = 0 : i64, scratch_operands = 0 : i64, tpu.core_type = #tpu.core_type<tc>, window_params = [{pipeline_mode = #tpu.pipeline_mode<synchronous>, transform_indices = @transform_0, window_bounds = array<i64: 18, 384>}, {pipeline_mode = #tpu.pipeline_mode<synchronous>, transform_indices = @transform_1, window_bounds = array<i64: 3456, 64>}, {pipeline_mode = #tpu.pipeline_mode<synchronous>, transform_indices = @transform_2, window_bounds = array<i64: 1152, 32>}, {pipeline_mode = #tpu.pipeline_mode<synchronous>, transform_indices = @transform_3, window_bounds = array<i64: 1152, 10>}, {pipeline_mode = #tpu.pipeline_mode<synchronous>, transform_indices = @transform_4, window_bounds = array<i64: 2, 10>}]} {
    %c0 = arith.constant 0 : index
    %c0_0 = arith.constant 0 : index
    %0 = vector.load %arg1[%c0, %c0_0] : memref<18x384xbf16, #tpu.memory_space<vmem>>, vector<18x384xbf16>
    %1 = arith.extf %0 : vector<18x384xbf16> to vector<18x384xf32>
    %2 = arith.negf %1 : vector<18x384xf32>
    %3 = math.exp %2 : vector<18x384xf32>
    %cst = arith.constant 1.000000e+00 : f32
    %4 = vector.broadcast %cst : f32 to vector<18x384xf32>
    %5 = arith.addf %4, %3 : vector<18x384xf32>
    %6 = arith.divf %4, %5 : vector<18x384xf32>
    %7 = arith.mulf %1, %6 : vector<18x384xf32>
    %cst_1 = arith.constant -6.57142878 : f32
    %cst_2 = arith.constant 6.57142878 : f32
    %8 = vector.broadcast %cst_1 : f32 to vector<18x384xf32>
    %9 = arith.maximumf %8, %1 : vector<18x384xf32>
    %10 = vector.broadcast %cst_2 : f32 to vector<18x384xf32>
    %11 = arith.minimumf %10, %9 : vector<18x384xf32>
    %cst_3 = arith.constant -2.000000e+00 : f32
    %12 = vector.broadcast %cst_3 : f32 to vector<18x384xf32>
    %13 = arith.subf %11, %12 : vector<18x384xf32>
    %cst_4 = arith.constant 1.750000e+00 : f32
    %14 = vector.broadcast %cst_4 : f32 to vector<18x384xf32>
    %15 = arith.mulf %13, %14 : vector<18x384xf32>
    %16 = arith.mulf %15, %15 : vector<18x384xf32>
    %cst_5 = arith.constant 0.000000e+00 : f32
    %17 = vector.broadcast %cst_5 : f32 to vector<18x384xf32>
    %18 = arith.subf %17, %16 : vector<18x384xf32>
    %19 = math.exp %18 : vector<18x384xf32>
    %20 = arith.addf %15, %15 : vector<18x384xf32>
    %21 = math.exp %20 : vector<18x384xf32>
    %cst_6 = arith.constant 0.36787945 : f32
    %22 = vector.broadcast %cst_6 : f32 to vector<18x384xf32>
    %23 = arith.mulf %21, %22 : vector<18x384xf32>
    %24 = arith.mulf %19, %23 : vector<18x384xf32>
    %cst_7 = arith.constant 0.0497870669 : f32
    %25 = vector.broadcast %cst_7 : f32 to vector<18x384xf32>
    %26 = arith.mulf %21, %25 : vector<18x384xf32>
    %27 = arith.mulf %24, %26 : vector<18x384xf32>
    %cst_8 = arith.constant 0.006737947 : f32
    %28 = vector.broadcast %cst_8 : f32 to vector<18x384xf32>
    %29 = arith.mulf %21, %28 : vector<18x384xf32>
    %30 = arith.mulf %27, %29 : vector<18x384xf32>
    %cst_9 = arith.constant 9.118820e-04 : f32
    %31 = vector.broadcast %cst_9 : f32 to vector<18x384xf32>
    %32 = arith.mulf %21, %31 : vector<18x384xf32>
    %33 = arith.mulf %30, %32 : vector<18x384xf32>
    %cst_10 = arith.constant 1.23409802E-4 : f32
    %34 = vector.broadcast %cst_10 : f32 to vector<18x384xf32>
    %35 = arith.mulf %21, %34 : vector<18x384xf32>
    %36 = arith.mulf %33, %35 : vector<18x384xf32>
    %cst_11 = arith.constant 1.670170e-05 : f32
    %37 = vector.broadcast %cst_11 : f32 to vector<18x384xf32>
    %38 = arith.mulf %21, %37 : vector<18x384xf32>
    %39 = arith.mulf %36, %38 : vector<18x384xf32>
    %cst_12 = arith.constant 2.26032944E-6 : f32
    %40 = vector.broadcast %cst_12 : f32 to vector<18x384xf32>
    %41 = arith.mulf %21, %40 : vector<18x384xf32>
    %42 = arith.mulf %39, %41 : vector<18x384xf32>
    %43 = tpu.concatenate %7, %19, %24, %27, %30, %33, %36, %39, %42 in 1 : vector<18x384xf32>, vector<18x384xf32>, vector<18x384xf32>, vector<18x384xf32>, vector<18x384xf32>, vector<18x384xf32>, vector<18x384xf32>, vector<18x384xf32>, vector<18x384xf32> -> vector<18x3456xf32>
    %44 = arith.truncf %43 : vector<18x3456xf32> to vector<18x3456xbf16>
    %c0_13 = arith.constant 0 : index
    %c0_14 = arith.constant 0 : index
    %45 = vector.load %arg2[%c0_13, %c0_14] : memref<3456x64xbf16, #tpu.memory_space<vmem>>, vector<3456x64xbf16>
    %cst_15 = arith.constant dense<0.000000e+00> : vector<18x64xf32>
    %46 = tpu.matmul %44, %45, %cst_15 {dimension_numbers = #tpu.dot_dimension_numbers<[1], [0], [0], [1], [0, 0, 1, 1], [], []>} : vector<18x3456xbf16>, vector<3456x64xbf16>, vector<18x64xf32> -> vector<18x64xf32>
    %47 = vector.extract_strided_slice %46 {offsets = [0, 0], sizes = [9, 64], strides = [1, 1]} : vector<18x64xf32> to vector<9x64xf32>
    %cst_16 = arith.constant dense<0xFF800000> : vector<64xf32>
    %48 = vector.multi_reduction <maximumf>, %47, %cst_16 [0] : vector<9x64xf32> to vector<64xf32>
    %49 = vector.shape_cast %48 : vector<64xf32> to vector<1x64xf32>
    %50 = vector.extract_strided_slice %46 {offsets = [9, 0], sizes = [9, 64], strides = [1, 1]} : vector<18x64xf32> to vector<9x64xf32>
    %cst_17 = arith.constant dense<0xFF800000> : vector<64xf32>
    %51 = vector.multi_reduction <maximumf>, %50, %cst_17 [0] : vector<9x64xf32> to vector<64xf32>
    %52 = vector.shape_cast %51 : vector<64xf32> to vector<1x64xf32>
    %53 = tpu.concatenate %49, %52 in 0 : vector<1x64xf32>, vector<1x64xf32> -> vector<2x64xf32>
    %cst_18 = arith.constant 0.000000e+00 : f32
    %54 = vector.broadcast %cst_18 : f32 to vector<2x64xf32>
    %55 = tpu.concatenate %53, %54 in 1 : vector<2x64xf32>, vector<2x64xf32> -> vector<2x128xf32>
    %56 = arith.negf %55 : vector<2x128xf32>
    %57 = math.exp %56 : vector<2x128xf32>
    %cst_19 = arith.constant 1.000000e+00 : f32
    %58 = vector.broadcast %cst_19 : f32 to vector<2x128xf32>
    %59 = arith.addf %58, %57 : vector<2x128xf32>
    %60 = arith.divf %58, %59 : vector<2x128xf32>
    %61 = arith.mulf %55, %60 : vector<2x128xf32>
    %cst_20 = arith.constant -6.57142878 : f32
    %cst_21 = arith.constant 6.57142878 : f32
    %62 = vector.broadcast %cst_20 : f32 to vector<2x128xf32>
    %63 = arith.maximumf %62, %55 : vector<2x128xf32>
    %64 = vector.broadcast %cst_21 : f32 to vector<2x128xf32>
    %65 = arith.minimumf %64, %63 : vector<2x128xf32>
    %cst_22 = arith.constant -2.000000e+00 : f32
    %66 = vector.broadcast %cst_22 : f32 to vector<2x128xf32>
    %67 = arith.subf %65, %66 : vector<2x128xf32>
    %cst_23 = arith.constant 1.750000e+00 : f32
    %68 = vector.broadcast %cst_23 : f32 to vector<2x128xf32>
    %69 = arith.mulf %67, %68 : vector<2x128xf32>
    %70 = arith.mulf %69, %69 : vector<2x128xf32>
    %cst_24 = arith.constant 0.000000e+00 : f32
    %71 = vector.broadcast %cst_24 : f32 to vector<2x128xf32>
    %72 = arith.subf %71, %70 : vector<2x128xf32>
    %73 = math.exp %72 : vector<2x128xf32>
    %74 = arith.addf %69, %69 : vector<2x128xf32>
    %75 = math.exp %74 : vector<2x128xf32>
    %cst_25 = arith.constant 0.36787945 : f32
    %76 = vector.broadcast %cst_25 : f32 to vector<2x128xf32>
    %77 = arith.mulf %75, %76 : vector<2x128xf32>
    %78 = arith.mulf %73, %77 : vector<2x128xf32>
    %cst_26 = arith.constant 0.0497870669 : f32
    %79 = vector.broadcast %cst_26 : f32 to vector<2x128xf32>
    %80 = arith.mulf %75, %79 : vector<2x128xf32>
    %81 = arith.mulf %78, %80 : vector<2x128xf32>
    %cst_27 = arith.constant 0.006737947 : f32
    %82 = vector.broadcast %cst_27 : f32 to vector<2x128xf32>
    %83 = arith.mulf %75, %82 : vector<2x128xf32>
    %84 = arith.mulf %81, %83 : vector<2x128xf32>
    %cst_28 = arith.constant 9.118820e-04 : f32
    %85 = vector.broadcast %cst_28 : f32 to vector<2x128xf32>
    %86 = arith.mulf %75, %85 : vector<2x128xf32>
    %87 = arith.mulf %84, %86 : vector<2x128xf32>
    %cst_29 = arith.constant 1.23409802E-4 : f32
    %88 = vector.broadcast %cst_29 : f32 to vector<2x128xf32>
    %89 = arith.mulf %75, %88 : vector<2x128xf32>
    %90 = arith.mulf %87, %89 : vector<2x128xf32>
    %cst_30 = arith.constant 1.670170e-05 : f32
    %91 = vector.broadcast %cst_30 : f32 to vector<2x128xf32>
    %92 = arith.mulf %75, %91 : vector<2x128xf32>
    %93 = arith.mulf %90, %92 : vector<2x128xf32>
    %cst_31 = arith.constant 2.26032944E-6 : f32
    %94 = vector.broadcast %cst_31 : f32 to vector<2x128xf32>
    %95 = arith.mulf %75, %94 : vector<2x128xf32>
    %96 = arith.mulf %93, %95 : vector<2x128xf32>
    %97 = tpu.concatenate %61, %73, %78, %81, %84, %87, %90, %93, %96 in 1 : vector<2x128xf32>, vector<2x128xf32>, vector<2x128xf32>, vector<2x128xf32>, vector<2x128xf32>, vector<2x128xf32>, vector<2x128xf32>, vector<2x128xf32>, vector<2x128xf32> -> vector<2x1152xf32>
    %98 = arith.truncf %97 : vector<2x1152xf32> to vector<2x1152xbf16>
    %c0_32 = arith.constant 0 : index
    %c0_33 = arith.constant 0 : index
    %99 = vector.load %arg3[%c0_32, %c0_33] : memref<1152x32xbf16, #tpu.memory_space<vmem>>, vector<1152x32xbf16>
    %cst_34 = arith.constant dense<0.000000e+00> : vector<2x32xf32>
    %100 = tpu.matmul %98, %99, %cst_34 {dimension_numbers = #tpu.dot_dimension_numbers<[1], [0], [0], [1], [0, 0, 1, 1], [], []>} : vector<2x1152xbf16>, vector<1152x32xbf16>, vector<2x32xf32> -> vector<2x32xf32>
    %cst_35 = arith.constant 0.000000e+00 : f32
    %101 = vector.broadcast %cst_35 : f32 to vector<2x96xf32>
    %102 = tpu.concatenate %100, %101 in 1 : vector<2x32xf32>, vector<2x96xf32> -> vector<2x128xf32>
    %103 = arith.negf %102 : vector<2x128xf32>
    %104 = math.exp %103 : vector<2x128xf32>
    %cst_36 = arith.constant 1.000000e+00 : f32
    %105 = vector.broadcast %cst_36 : f32 to vector<2x128xf32>
    %106 = arith.addf %105, %104 : vector<2x128xf32>
    %107 = arith.divf %105, %106 : vector<2x128xf32>
    %108 = arith.mulf %102, %107 : vector<2x128xf32>
    %cst_37 = arith.constant -6.57142878 : f32
    %cst_38 = arith.constant 6.57142878 : f32
    %109 = vector.broadcast %cst_37 : f32 to vector<2x128xf32>
    %110 = arith.maximumf %109, %102 : vector<2x128xf32>
    %111 = vector.broadcast %cst_38 : f32 to vector<2x128xf32>
    %112 = arith.minimumf %111, %110 : vector<2x128xf32>
    %cst_39 = arith.constant -2.000000e+00 : f32
    %113 = vector.broadcast %cst_39 : f32 to vector<2x128xf32>
    %114 = arith.subf %112, %113 : vector<2x128xf32>
    %cst_40 = arith.constant 1.750000e+00 : f32
    %115 = vector.broadcast %cst_40 : f32 to vector<2x128xf32>
    %116 = arith.mulf %114, %115 : vector<2x128xf32>
    %117 = arith.mulf %116, %116 : vector<2x128xf32>
    %cst_41 = arith.constant 0.000000e+00 : f32
    %118 = vector.broadcast %cst_41 : f32 to vector<2x128xf32>
    %119 = arith.subf %118, %117 : vector<2x128xf32>
    %120 = math.exp %119 : vector<2x128xf32>
    %121 = arith.addf %116, %116 : vector<2x128xf32>
    %122 = math.exp %121 : vector<2x128xf32>
    %cst_42 = arith.constant 0.36787945 : f32
    %123 = vector.broadcast %cst_42 : f32 to vector<2x128xf32>
    %124 = arith.mulf %122, %123 : vector<2x128xf32>
    %125 = arith.mulf %120, %124 : vector<2x128xf32>
    %cst_43 = arith.constant 0.0497870669 : f32
    %126 = vector.broadcast %cst_43 : f32 to vector<2x128xf32>
    %127 = arith.mulf %122, %126 : vector<2x128xf32>
    %128 = arith.mulf %125, %127 : vector<2x128xf32>
    %cst_44 = arith.constant 0.006737947 : f32
    %129 = vector.broadcast %cst_44 : f32 to vector<2x128xf32>
    %130 = arith.mulf %122, %129 : vector<2x128xf32>
    %131 = arith.mulf %128, %130 : vector<2x128xf32>
    %cst_45 = arith.constant 9.118820e-04 : f32
    %132 = vector.broadcast %cst_45 : f32 to vector<2x128xf32>
    %133 = arith.mulf %122, %132 : vector<2x128xf32>
    %134 = arith.mulf %131, %133 : vector<2x128xf32>
    %cst_46 = arith.constant 1.23409802E-4 : f32
    %135 = vector.broadcast %cst_46 : f32 to vector<2x128xf32>
    %136 = arith.mulf %122, %135 : vector<2x128xf32>
    %137 = arith.mulf %134, %136 : vector<2x128xf32>
    %cst_47 = arith.constant 1.670170e-05 : f32
    %138 = vector.broadcast %cst_47 : f32 to vector<2x128xf32>
    %139 = arith.mulf %122, %138 : vector<2x128xf32>
    %140 = arith.mulf %137, %139 : vector<2x128xf32>
    %cst_48 = arith.constant 2.26032944E-6 : f32
    %141 = vector.broadcast %cst_48 : f32 to vector<2x128xf32>
    %142 = arith.mulf %122, %141 : vector<2x128xf32>
    %143 = arith.mulf %140, %142 : vector<2x128xf32>
    %144 = tpu.concatenate %108, %120, %125, %128, %131, %134, %137, %140, %143 in 1 : vector<2x128xf32>, vector<2x128xf32>, vector<2x128xf32>, vector<2x128xf32>, vector<2x128xf32>, vector<2x128xf32>, vector<2x128xf32>, vector<2x128xf32>, vector<2x128xf32> -> vector<2x1152xf32>
    %145 = arith.truncf %144 : vector<2x1152xf32> to vector<2x1152xbf16>
    %c0_49 = arith.constant 0 : index
    %c0_50 = arith.constant 0 : index
    %146 = vector.load %arg4[%c0_49, %c0_50] : memref<1152x10xbf16, #tpu.memory_space<vmem>>, vector<1152x10xbf16>
    %cst_51 = arith.constant dense<0.000000e+00> : vector<2x10xf32>
    %147 = tpu.matmul %145, %146, %cst_51 {dimension_numbers = #tpu.dot_dimension_numbers<[1], [0], [0], [1], [0, 0, 1, 1], [], []>} : vector<2x1152xbf16>, vector<1152x10xbf16>, vector<2x10xf32> -> vector<2x10xf32>
    %cst_52 = arith.constant dense<0xFF800000> : vector<2xf32>
    %148 = vector.multi_reduction <maximumf>, %147, %cst_52 [1] : vector<2x10xf32> to vector<2xf32>
    %149 = vector.shape_cast %148 : vector<2xf32> to vector<2x1xf32>
    %150 = vector.broadcast %149 : vector<2x1xf32> to vector<2x10xf32>
    %151 = arith.subf %147, %150 : vector<2x10xf32>
    %152 = math.exp %151 : vector<2x10xf32>
    %cst_53 = arith.constant dense<0.000000e+00> : vector<2xf32>
    %153 = vector.multi_reduction <add>, %152, %cst_53 [1] : vector<2x10xf32> to vector<2xf32>
    %154 = vector.shape_cast %153 : vector<2xf32> to vector<2x1xf32>
    %155 = math.log %154 : vector<2x1xf32>
    %156 = vector.broadcast %155 : vector<2x1xf32> to vector<2x10xf32>
    %157 = arith.subf %151, %156 : vector<2x10xf32>
    %c0_54 = arith.constant 0 : index
    %c0_55 = arith.constant 0 : index
    %158 = vector.load %arg5[%c0_54, %c0_55] : memref<2x10xf32, #tpu.memory_space<vmem>>, vector<2x10xf32>
    tpu.vector_store %arg5[%c0_54, %c0_55], %157 {strides = array<i32>} : memref<2x10xf32, #tpu.memory_space<vmem>>, vector<2x10xf32>,
    return
  }
  func.func @transform_0(%arg0: i32) -> (i32, i32) {
    %c0_i32 = arith.constant 0 : i32
    %c0_i32_0 = arith.constant 0 : i32
    %c0_i32_1 = arith.constant 0 : i32
    return %c0_i32, %c0_i32_0 : i32, i32
  }
  func.func @transform_1(%arg0: i32) -> (i32, i32) {
    %c0_i32 = arith.constant 0 : i32
    %c0_i32_0 = arith.constant 0 : i32
    %c0_i32_1 = arith.constant 0 : i32
    return %c0_i32, %c0_i32_0 : i32, i32
  }
  func.func @transform_2(%arg0: i32) -> (i32, i32) {
    %c0_i32 = arith.constant 0 : i32
    %c0_i32_0 = arith.constant 0 : i32
    %c0_i32_1 = arith.constant 0 : i32
    return %c0_i32, %c0_i32_0 : i32, i32
  }
  func.func @transform_3(%arg0: i32) -> (i32, i32) {
    %c0_i32 = arith.constant 0 : i32
    %c0_i32_0 = arith.constant 0 : i32
    %c0_i32_1 = arith.constant 0 : i32
    return %c0_i32, %c0_i32_0 : i32, i32
  }
  func.func @transform_4(%arg0: i32) -> (i32, i32) {
    %c0_i32 = arith.constant 0 : i32
    %c0_i32_0 = arith.constant 0 : i32
    %c0_i32_1 = arith.constant 0 : i32
    return %c0_i32, %c0_i32_0 : i32, i32
  }
}

</mosaic_0001>

<bundles_post_ra>
// kernel: net_forward.2
= control target key start
LH: loop header
LB: loop body
LE: loop exit
PB: predicated region body
PF: predicated region fallthrough
CT: control target
= control target key end

     0   :  { %vm227_vm0 = vcmask 130048   ;;  %s1377_s0 = inlined_call_operand.vmem [shape: f32[16,144], index: 0, kind: input, shape index: {}]   ;;  %s1378_s1 = inlined_call_operand.vmem [shape: bf16[8,144], index: 1, kind: input, shape index: {}]   ;;  %s1379_s2 = inlined_call_operand.vmem [shape: bf16[16,72], index: 2, kind: input, shape index: {}]   ;;  %s1380_s3 = inlined_call_operand.vmem [shape: bf16[32,144], index: 3, kind: input, shape index: {}]   ;;  %s1381_s4 = inlined_call_operand.vmem [shape: bf16[32,144], index: 4, kind: output, shape index: {}]  }
   0x1   :  { %v924_v0 = vld [vmem:[%s1377_s0] sm:$0xff]  ;;  %v929_v1 = vld [vmem:[%s1377_s0 + $0x10] sm:$0xff]  ;;  %v934_v2 = vld [vmem:[%s1377_s0 + $0x8] sm:$0xff] }
   0x2   :  { %v749_v3 = vclamps-f32 %v924_v0, 6.571429  ;;  %v751_v4 = vclamps-f32 %v929_v1, 6.571429  ;;  %v941_v5 = vld [vmem:[%s1377_s0 + $0x18] sm:$0xff] }
   0x3   :  { %v750_v6 = vclamps-f32 %v934_v2, 6.571429  ;;  %v752_v7 = vclamps-f32 %v941_v5, 6.571429  ;;  %v745_v43 = vmul.f32 -1.442695, %v924_v0 }
   0x4   :  { %v753_v8 = vadd.f32 2.0, %v749_v3  ;;  %v755_v9 = vadd.f32 2.0, %v751_v4  ;;  %v747_v53 = vmul.f32 -1.442695, %v929_v1  ;;  %v746_v57 = vmul.f32 -1.442695, %v934_v2 }
   0x5   :  { %v754_v10 = vadd.f32 2.0, %v750_v6  ;;  %v756_v11 = vadd.f32 2.0, %v752_v7 }
   0x6   :  { %v114_v12 = vmul.f32 1.75, %v753_v8  ;;  %v116_v13 = vmul.f32 1.75, %v755_v9 }
   0x7   :  { %v115_v14 = vmul.f32 1.75, %v754_v10  ;;  %v117_v15 = vmul.f32 1.75, %v756_v11 }
   0x8   :  { %v118_v16 = vmul.f32 %v114_v12, %v114_v12  ;;  %v120_v17 = vmul.f32 %v116_v13, %v116_v13  ;;  %v134_v18 = vadd.f32 %v114_v12, %v114_v12  ;;  %v136_v19 = vadd.f32 %v116_v13, %v116_v13 }
   0x9   :  { %v119_v20 = vmul.f32 %v115_v14, %v115_v14  ;;  %v121_v21 = vmul.f32 %v117_v15, %v117_v15  ;;  %v135_v22 = vadd.f32 %v115_v14, %v115_v14  ;;  %v137_v29 = vadd.f32 %v117_v15, %v117_v15 }
   0xa   :  { %v122_v23 = vsub.f32 0.0, %v118_v16  ;;  %v124_v24 = vsub.f32 0.0, %v120_v17  ;;  %v138_v25 = vmul.f32 1.442695, %v134_v18  ;;  %v142_v26 = vmul.f32 1.442695, %v136_v19 }
   0xb   :  { %v123_v27 = vsub.f32 0.0, %v119_v20  ;;  %v125_v28 = vsub.f32 0.0, %v121_v21  ;;  %v140_v34 = vmul.f32 1.442695, %v135_v22  ;;  %v144_v35 = vmul.f32 1.442695, %v137_v29 }
   0xc   :  { %v126_v30 = vmul.f32 1.442695, %v122_v23  ;;  %v130_v31 = vmul.f32 1.442695, %v124_v24  ;;  %816 = vpow2.f32 %v138_v25 }
   0xd   :  { %818 = vpow2.f32 %v142_v26  ;;  %v128_v32 = vmul.f32 1.442695, %v123_v27  ;;  %v132_v33 = vmul.f32 1.442695, %v125_v28  ;;  %v1000_v28 = vld [vmem:[%s1378_s1] sm:$0xff] }
   0xe   :  { %820 = vpow2.f32 %v126_v30 }
   0xf   :  { %822 = vpow2.f32 %v130_v31 }
  0x10   :  { %824 = vpow2.f32 %v128_v32 }
  0x11   :  { %826 = vpow2.f32 %v132_v33 }
  0x12   :  { %v817_v36 = vpop.eup %816  ;;  %828 = vpow2.f32 %v140_v34 }
  0x13   :  { %v819_v37 = vpop.eup %818  ;;  %v146_v38 = vmul.f32 0.36787945, %v817_v36  ;;  %v154_v39 = vmul.f32 0.049787067, %v817_v36  ;;  %830 = vpow2.f32 %v144_v35  ;;  %v162_v46 = vmul.f32 0.006737947, %v817_v36 }
  0x14   :  { %v945_v40 = vpop.eup %820  ;;  %v148_v41 = vmul.f32 0.36787945, %v819_v37  ;;  %v156_v42 = vmul.f32 0.049787067, %v819_v37  ;;  %v164_v49 = vmul.f32 0.006737947, %v819_v37  ;;  %832 = vpow2.f32 %v745_v43 }
  0x15   :  { %v948_v44 = vpop.eup %822  ;;  %v951_v45 = vmul.f32 %v945_v40, %v146_v38  ;;  %v170_v52 = vmul.f32 0.000911882, %v817_v36  ;;  %v172_v56 = vmul.f32 0.000911882, %v819_v37  ;;  %v178_v60 = vmul.f32 0.0001234098, %v817_v36 }
  0x16   :  { %v953_v47 = vpop.eup %824  ;;  %v956_v48 = vmul.f32 %v948_v44, %v148_v41  ;;  %v180_v3 = vmul.f32 0.0001234098, %v819_v37  ;;  %v186_v8 = vmul.f32 1.67017e-05, %v817_v36  ;;  %v188_v12 = vmul.f32 1.67017e-05, %v819_v37 }
  0x17   :  { %v958_v50 = vpop.eup %826  ;;  %v961_v51 = vmul.f32 %v154_v39, %v951_v45  ;;  %834 = vpow2.f32 %v747_v53  ;;  %v194_v31 = vmul.f32 2.2603294e-06, %v817_v36  ;;  %v196_v32 = vmul.f32 2.2603294e-06, %v819_v37 }
  0x18   :  { %v829_v54 = vpop.eup %828  ;;  %v965_v55 = vmul.f32 %v156_v42, %v956_v48  ;;  %836 = vpow2.f32 %v746_v57  ;;  %v748_v43 = vmul.f32 -1.442695, %v941_v5  ;;  %v223_v36 = vunpack.c.h.b16 %v1000_v28 }
  0x19   :  { %v831_v58 = vpop.eup %830  ;;  %v969_v59 = vmul.f32 %v162_v46, %v961_v51  ;;  %v147_v61 = vmul.f32 0.36787945, %v829_v54  ;;  %v155_v62 = vmul.f32 0.049787067, %v829_v54  ;;  %v163_v10 = vmul.f32 0.006737947, %v829_v54 }
  0x1a   :  { %v972_v63 = vmul.f32 %v164_v49, %v965_v55  ;;  %v149_v4 = vmul.f32 0.36787945, %v831_v58  ;;  %v157_v6 = vmul.f32 0.049787067, %v831_v58  ;;  %v165_v14 = vmul.f32 0.006737947, %v831_v58  ;;  %v833_v18 = vpop.eup %832 }
  0x1b   :  { %v975_v7 = vmul.f32 %v170_v52, %v969_v59  ;;  %v978_v9 = vmul.f32 %v953_v47, %v147_v61  ;;  %v171_v17 = vmul.f32 0.000911882, %v829_v54  ;;  %v173_v21 = vmul.f32 0.000911882, %v831_v58 }
  0x1c   :  { %v176_v11 = vmul.f32 %v172_v56, %v972_v63  ;;  %v982_v13 = vmul.f32 %v958_v50, %v149_v4  ;;  %v179_v24 = vmul.f32 0.0001234098, %v829_v54  ;;  %v181_v27 = vmul.f32 0.0001234098, %v831_v58 }
  0x1d   :  { %v182_v15 = vmul.f32 %v178_v60, %v975_v7  ;;  %v986_v16 = vmul.f32 %v155_v62, %v978_v9  ;;  %v187_v30 = vmul.f32 1.67017e-05, %v829_v54  ;;  %v189_v35 = vmul.f32 1.67017e-05, %v831_v58  ;;  %v835_v38 = vpop.eup %834 }
  0x1e   :  { %v184_v19 = vmul.f32 %v180_v3, %v176_v11  ;;  %v989_v20 = vmul.f32 %v157_v6, %v982_v13  ;;  %v837_v46 = vpop.eup %836  ;;  %v195_v56 = vmul.f32 2.2603294e-06, %v829_v54  ;;  %v212_v60 = vpack.c.bf16 %v176_v11, %v975_v7 }
  0x1f   :  { %v190_v22 = vmul.f32 %v186_v8, %v182_v15  ;;  %v992_v23 = vmul.f32 %v163_v10, %v986_v16  ;;  %v197_v61 = vmul.f32 2.2603294e-06, %v831_v58  ;;  %v34_v62 = vadd.f32 1.0, %v833_v18 }
  0x20   :  { %v192_v25 = vmul.f32 %v188_v12, %v184_v19  ;;  %v995_v26 = vmul.f32 %v165_v14, %v989_v20  ;;  %v214_v52 = vpack.c.bf16 %v184_v19, %v182_v15  ;;  %v36_v4 = vadd.f32 1.0, %v835_v38 }
  0x21   :  { %v1003_v29 = vmul.f32 %v171_v17, %v992_v23  ;;  %v198_v41 = vmul.f32 %v194_v31, %v190_v22  ;;  %838 = vpow2.f32 %v748_v43  ;;  %v1013_v6 = vadd.f32 1.0, %v837_v46 }
  0x22   :  { %v216_v33 = vpack.c.bf16 %v192_v25, %v190_v22  ;;  %v1006_v34 = vmul.f32 %v173_v21, %v995_v26  ;;  %v200_v42 = vmul.f32 %v196_v32, %v192_v25  ;;  %v225_v10 = vpack.c.b16 %v223_v36, %v223_v36 }
  0x23   :  { %v183_v39 = vmul.f32 %v179_v24, %v1003_v29  ;;  %840 = vrcp.f32 %v34_v62  ;;  %v210_v58 = vpack.c.bf16 %v972_v63, %v969_v59  ;;  %v208_v14 = vpack.c.bf16 %v965_v55, %v961_v51 }
  0x24   :  { %231 = vmatpush.bf16.msra.mxu0 %v216_v33  ;;  %v185_v49 = vmul.f32 %v181_v27, %v1006_v34  ;;  %v218_v53 = vpack.c.bf16 %v200_v42, %v198_v41  ;;  %842 = vrcp.f32 %v36_v4  ;;  %v206_v15 = vpack.c.bf16 %v956_v48, %v951_v45 }
  0x25   :  { %v191_v37 = vmul.f32 %v187_v30, %v183_v39  ;;  %844 = vrcp.f32 %v1013_v6  ;;  %v213_v18 = vpack.c.bf16 %v1006_v34, %v1003_v29  ;;  %v211_v19 = vpack.c.bf16 %v995_v26, %v992_v23 }
  0x26   :  { %v193_v57 = vmul.f32 %v189_v35, %v185_v49  ;;  %251 = vmatpush.bf16.msra.mxu1 %v218_v53  ;;  %v215_v54 = vpack.c.bf16 %v185_v49, %v183_v39  ;;  %v209_v21 = vpack.c.bf16 %v989_v20, %v986_v16  ;;  %vm43_vm1 = vweird.f32 %v34_v62 }
  0x27   :  { %v199_v3 = vmul.f32 %v195_v56, %v191_v37  ;;  %v839_v11 = vpop.eup %838  ;;  %v47_v55 = vand.u32 2147483647, %v34_v62  ;;  %v49_v45 = vand.u32 2147483648, %v34_v62  ;;  %vm73_vm2 = vweird.f32 %v36_v4 }
  0x28   :  { %v217_v8 = vpack.c.bf16 %v193_v57, %v191_v37  ;;  %232 = vmatpush.bf16.msra.mxu0 %v214_v52  ;;  %v201_v12 = vmul.f32 %v197_v61, %v193_v57  ;;  %v1029_v59 = vadd.f32 1.0, %v839_v11  ;;  %v77_v24 = vand.u32 2147483647, %v36_v4 }
  0x29   :  { %757 = vmatmul.msk.bf16.vlgmr.msra.gmra.mxu1 %vm227_vm0, %v225_v10  ;;  %v841_v17 = vpop.eup %840  ;;  %v79_v25 = vand.u32 2147483648, %v36_v4  ;;  %v62_v26 = vand.u32 2147483647, %v1013_v6  ;;  %v64_v27 = vand.u32 2147483648, %v1013_v6  ;;  %vm58_vm5 = vweird.f32 %v1013_v6 }
  0x2a   :  { %257 = vmatpush.bf16.msra.mxu2 %v217_v8  ;;  %v219_v7 = vpack.c.bf16 %v201_v12, %v199_v3  ;;  %v843_v63 = vpop.eup %842  ;;  %v39_v51 = vmul.f32 %v841_v17, %v34_v62  ;;  %846 = vrcp.f32 %v1029_v59  ;;  %vm44_vm3 = vweird.f32 %v841_v17 }
  0x2b   :  { %v845_v48 = vpop.eup %844  ;;  %v69_v22 = vmul.f32 %v843_v63, %v36_v4  ;;  %vm74_vm4 = vweird.f32 %v843_v63  ;;  %v204_v31 = vpack.c.bf16 %v948_v44, %v945_v40  ;;  %vm1040_vm7 = vmor %vm43_vm1, %vm44_vm3  ;;  %vm1044_vm8 = vcmp.eq.f32.partialorder %v47_v55, 8.507059e+37 }
  0x2c   :  { %233 = vmatpush.bf16.msra.mxu0 %v212_v60  ;;  %277 = vmatpush.bf16.msra.mxu3 %v219_v7  ;;  %v40_v23 = vsub.f32 1.0, %v39_v51  ;;  %v54_v16 = vmul.f32 %v845_v48, %v1013_v6  ;;  %vm59_vm6 = vweird.f32 %v845_v48  ;;  %v50_v34 = vor.u32 1.1754944e-38, %v49_v45  ;;  %vm1049_vm9 = vmor %vm73_vm2, %vm74_vm4 }
  0x2d   :  { %v70_v20 = vsub.f32 1.0, %v69_v22  ;;  %vm1053_vm10 = vcmp.eq.f32.partialorder %v77_v24, 8.507059e+37  ;;  %v80_v40 = vor.u32 1.1754944e-38, %v79_v25  ;;  %vm1060_vm11 = vmor %vm58_vm5, %vm59_vm6  ;;  %vm1064_vm12 = vcmp.eq.f32.partialorder %v62_v26, 8.507059e+37 }
  0x2e   :  { %258 = vmatpush.bf16.msra.mxu2 %v215_v54  ;;  %v41_v29 = vmul.f32 %v841_v17, %v40_v23  ;;  %v55_v30 = vsub.f32 1.0, %v54_v16  ;;  %v65_v52 = vor.u32 1.1754944e-38, %v64_v27  ;;  %vm88_vm13 = vweird.f32 %v1029_v59 }
  0x2f   :  { %758 = vmatmul.msk.bf16.vlgmr.msra.gmra.mxu3 %vm227_vm0, %v225_v10  ;;  %v71_v35 = vmul.f32 %v843_v63, %v70_v20  ;;  %v92_v56 = vand.u32 2147483647, %v1029_v59  ;;  %v94_v61 = vand.u32 2147483648, %v1029_v59  ;;  %v207_v8 = vpack.c.bf16 %v982_v13, %v978_v9 }
  0x30   :  { %234 = vmatpush.bf16.msra.mxu0 %v210_v58  ;;  %v42_v38 = vadd.f32 %v841_v17, %v41_v29  ;;  %v56_v44 = vmul.f32 %v845_v48, %v55_v30  ;;  %v847_v42 = vpop.eup %846  ;;  %v222_v54 = vunpack.c.l.b16 %v1000_v28  ;;  %v205_v9 = vpack.c.bf16 %v958_v50, %v953_v47 }
  0x31   :  { %v72_v43 = vadd.f32 %v843_v63, %v71_v35  ;;  %v84_v53 = vmul.f32 %v847_v42, %v1029_v59  ;;  %vm89_vm14 = vweird.f32 %v847_v42  ;;  %vm93_vm1 = vcmp.eq.f32.partialorder %v92_v56, 8.507059e+37 }
  0x32   :  { %259 = vmatpush.bf16.msra.mxu2 %v213_v18  ;;  %v46_v36 = vsel %vm1040_vm7, %v841_v17, %v42_v38  ;;  %v57_v37 = vadd.f32 %v845_v48, %v56_v44  ;;  %vm90_vm15 = vmor %vm88_vm13, %vm89_vm14  ;;  %vm394_vm2 = vcmask 1043456  }
  0x33   :  { %v51_v57 = vsel %vm1044_vm8, %v50_v34, %v46_v36  ;;  %v76_v60 = vsel %vm1049_vm9, %v843_v63, %v72_v43  ;;  %v85_v6 = vsub.f32 1.0, %v84_v53 }
  0x34   :  { %235 = vmatpush.bf16.msra.mxu0 %v208_v14  ;;  %v81_v62 = vsel %vm1053_vm10, %v80_v40, %v76_v60  ;;  %v98_v3 = vmul.f32 %v51_v57, %v924_v0  ;;  %v61_v4 = vsel %vm1060_vm11, %v845_v48, %v57_v37  ;;  %v95_v0 = vor.u32 1.1754944e-38, %v94_v61 }
  0x35   :  { %v100_v10 = vmul.f32 %v81_v62, %v929_v1  ;;  %v86_v12 = vmul.f32 %v847_v42, %v85_v6  ;;  %v66_v58 = vsel %vm1064_vm12, %v65_v52, %v61_v4  ;;  %v224_v14 = vpack.c.b16 %v222_v54, %v222_v54 }
  0x36   :  { %260 = vmatpush.bf16.msra.mxu2 %v211_v19  ;;  %v99_v1 = vmul.f32 %v66_v58, %v934_v2  ;;  %vm390_vm10 = vcmask 588800  }
  0x37   :  { %v202_v7 = vpack.c.bf16 %v100_v10, %v98_v3  ;;  %v87_v11 = vadd.f32 %v847_v42, %v86_v12 }
  0x38   :  { %236 = vmatpush.bf16.msra.mxu0 %v206_v15 }
  0x39   :  { %v91_v13 = vsel %vm90_vm15, %v847_v42, %v87_v11 }
  0x3a   :  { %261 = vmatpush.bf16.msra.mxu2 %v209_v21  ;;  %v96_v28 = vsel %vm93_vm1, %v95_v0, %v91_v13 }
  0x3b   :  { %v101_v15 = vmul.f32 %v96_v28, %v941_v5 }
  0x3c   :  { %237 = vmatpush.bf16.msra.mxu0 %v204_v31 }
  0x3d   :  { %v203_v17 = vpack.c.bf16 %v101_v15, %v99_v1 }
  0x3e   :  { %262 = vmatpush.bf16.msra.mxu2 %v207_v8 }
  0x40   :  { %238 = vmatpush.bf16.msra.mxu0 %v202_v7 }
  0x42   :  { %263 = vmatpush.bf16.msra.mxu2 %v205_v9 }
  0x43   :  { %239 = vmatmul.bf16.vlgmr.msra.gmra.mxu0 %v224_v14 }
  0x46   :  { %264 = vmatpush.bf16.msra.mxu2 %v203_v17 }
  0x49   :  { %265 = vmatmul.bf16.vlgmr.msra.gmra.mxu2 %v224_v14 }
  0xa6   :  { %v253_v18 = vpop.f32.mrf.mxu1 }
  0xae   :  { %v255_v19 = vpop.f32.mrf.mxu1 }
  0xb2   :  { %v279_v21 = vpop.f32.mrf.mxu3 }
  0xba   :  { %v281_v59 = vpop.f32.mrf.mxu3 }
  0xc0   :  { %v240_v63 = vpop.f32.mrf.mxu0 }
  0xc1   :  { %v1095_v51 = vadd.f32 %v253_v18, %v240_v63 }
  0xc3   :  { %v759_v47 = vmul.f32 -1.442695, %v1095_v51  ;;  %v761_v2 = vclamps-f32 %v1095_v51, 6.571429 }
  0xc5   :  { %848 = vpow2.f32 %v759_v47  ;;  %v763_v50 = vadd.f32 2.0, %v761_v2 }
  0xc7   :  { %v329_v55 = vmul.f32 1.75, %v763_v50 }
  0xc8   :  { %v242_v5 = vpop.f32.mrf.mxu0 }
  0xc9   :  { %v331_v45 = vmul.f32 %v329_v55, %v329_v55  ;;  %v339_v48 = vadd.f32 %v329_v55, %v329_v55 }
  0xcb   :  { %v849_v22 = vpop.eup %848  ;;  %v333_v24 = vsub.f32 0.0, %v331_v45  ;;  %v341_v23 = vmul.f32 1.442695, %v339_v48 }
  0xcc   :  { %v266_v25 = vpop.f32.mrf.mxu2  ;;  %v1101_v26 = vadd.f32 1.0, %v849_v22 }
  0xcd   :  { %v335_v16 = vmul.f32 1.442695, %v333_v24  ;;  %850 = vpow2.f32 %v341_v23  ;;  %v1099_v20 = vadd.f32 %v279_v21, %v266_v25 }
  0xce   :  { %v302_v63 = vand.u32 2147483648, %v1101_v26  ;;  %vm296_vm4 = vweird.f32 %v1101_v26  ;;  %v300_v2 = vand.u32 2147483647, %v1101_v26 }
  0xcf   :  { %852 = vpow2.f32 %v335_v16  ;;  %v760_v27 = vmul.f32 -1.442695, %v1099_v20  ;;  %v762_v29 = vclamps-f32 %v1099_v20, 6.571429 }
  0xd0   :  { %v303_v24 = vor.u32 1.1754944e-38, %v302_v63  ;;  %vm301_vm6 = vcmp.eq.f32.partialorder %v300_v2, 8.507059e+37 }
  0xd1   :  { %854 = vpow2.f32 %v760_v27  ;;  %v764_v30 = vadd.f32 2.0, %v762_v29 }
  0xd2   :  { %856 = vrcp.f32 %v1101_v26 }
  0xd3   :  { %v851_v31 = vpop.eup %850  ;;  %v330_v32 = vmul.f32 1.75, %v764_v30 }
  0xd4   :  { %v268_v33 = vpop.f32.mrf.mxu2  ;;  %v345_v34 = vmul.f32 0.36787945, %v851_v31  ;;  %v349_v35 = vmul.f32 0.049787067, %v851_v31  ;;  %v353_v52 = vmul.f32 0.006737947, %v851_v31 }
  0xd5   :  { %v1106_v38 = vpop.eup %852  ;;  %v332_v39 = vmul.f32 %v330_v32, %v330_v32  ;;  %v340_v41 = vadd.f32 %v330_v32, %v330_v32  ;;  %v357_v56 = vmul.f32 0.000911882, %v851_v31  ;;  %v361_v61 = vmul.f32 0.0001234098, %v851_v31 }
  0xd6   :  { %v1109_v40 = vmul.f32 %v1106_v38, %v345_v34  ;;  %v365_v3 = vmul.f32 1.67017e-05, %v851_v31  ;;  %v369_v10 = vmul.f32 2.2603294e-06, %v851_v31 }
  0xd7   :  { %v855_v44 = vpop.eup %854  ;;  %v334_v42 = vsub.f32 0.0, %v332_v39  ;;  %v343_v43 = vmul.f32 1.442695, %v340_v41  ;;  %v803_v41 = vld [vmem:[%s1379_s2] sm:$0xff] }
  0xd8   :  { %v857_v46 = vpop.eup %856  ;;  %v351_v49 = vmul.f32 %v349_v35, %v1109_v40  ;;  %v1112_v37 = vadd.f32 1.0, %v855_v44 }
  0xd9   :  { %v337_v36 = vmul.f32 1.442695, %v334_v42  ;;  %858 = vpow2.f32 %v343_v43  ;;  %v292_v57 = vmul.f32 %v857_v46, %v1101_v26  ;;  %vm297_vm3 = vweird.f32 %v857_v46 }
  0xda   :  { %v355_v53 = vmul.f32 %v353_v52, %v351_v49  ;;  %vm298_vm5 = vmor %vm296_vm4, %vm297_vm3  ;;  %v375_v30 = vpack.c.bf16 %v351_v49, %v1109_v40  ;;  %v317_v33 = vand.u32 2147483648, %v1112_v37  ;;  %vm311_vm8 = vweird.f32 %v1112_v37 }
  0xdb   :  { %860 = vpow2.f32 %v337_v36  ;;  %v293_v6 = vsub.f32 1.0, %v292_v57  ;;  %v315_v39 = vand.u32 2147483647, %v1112_v37 }
  0xdc   :  { %v359_v60 = vmul.f32 %v357_v56, %v355_v53  ;;  %862 = vrcp.f32 %v1112_v37  ;;  %v318_v40 = vor.u32 1.1754944e-38, %v317_v33 }
  0xdd   :  { %v294_v11 = vmul.f32 %v857_v46, %v293_v6  ;;  %vm316_vm11 = vcmp.eq.f32.partialorder %v315_v39, 8.507059e+37 }
  0xde   :  { %v363_v62 = vmul.f32 %v361_v61, %v359_v60  ;;  %v377_v23 = vpack.c.bf16 %v359_v60, %v355_v53 }
  0xdf   :  { %v859_v4 = vpop.eup %858  ;;  %v295_v18 = vadd.f32 %v857_v46, %v294_v11 }
  0xe0   :  { %v367_v8 = vmul.f32 %v365_v3, %v363_v62  ;;  %v346_v12 = vmul.f32 0.36787945, %v859_v4  ;;  %v350_v0 = vmul.f32 0.049787067, %v859_v4  ;;  %v354_v14 = vmul.f32 0.006737947, %v859_v4 }
  0xe1   :  { %v1116_v54 = vpop.eup %860  ;;  %v358_v17 = vmul.f32 0.000911882, %v859_v4  ;;  %v362_v59 = vmul.f32 0.0001234098, %v859_v4  ;;  %v366_v55 = vmul.f32 1.67017e-05, %v859_v4  ;;  %v299_v5 = vsel %vm298_vm5, %v857_v46, %v295_v18 }
  0xe2   :  { %v371_v7 = vmul.f32 %v369_v10, %v367_v8  ;;  %v1119_v58 = vmul.f32 %v1116_v54, %v346_v12  ;;  %v863_v9 = vpop.eup %862  ;;  %v379_v47 = vpack.c.bf16 %v367_v8, %v363_v62  ;;  %v370_v22 = vmul.f32 2.2603294e-06, %v859_v4 }
  0xe3   :  { %v307_v19 = vmul.f32 %v863_v9, %v1112_v37  ;;  %v304_v16 = vsel %vm301_vm6, %v303_v24, %v299_v5  ;;  %vm312_vm7 = vweird.f32 %v863_v9 }
  0xe4   :  { %v381_v13 = vpack.c.bf16 %v371_v7, %v371_v7  ;;  %v352_v1 = vmul.f32 %v350_v0, %v1119_v58  ;;  %v321_v26 = vmul.f32 %v304_v16, %v1095_v51  ;;  %vm313_vm9 = vmor %vm311_vm8, %vm312_vm7 }
  0xe5   :  { %v308_v45 = vsub.f32 1.0, %v307_v19 }
  0xe6   :  { %v396_v28 = vsel %vm394_vm2, %v381_v13, 0  ;;  %v356_v15 = vmul.f32 %v354_v14, %v352_v1  ;;  %v373_v35 = vpack.c.bf16 %v1106_v38, %v321_v26  ;;  %v376_v38 = vpack.c.bf16 %v352_v1, %v1119_v58 }
  0xe7   :  { %404 = vmatpush.bf16.msrb.mxu1 %v396_v28  ;;  %v309_v27 = vmul.f32 %v863_v9, %v308_v45 }
  0xe8   :  { %v360_v21 = vmul.f32 %v358_v17, %v356_v15 }
  0xe9   :  { %v310_v32 = vadd.f32 %v863_v9, %v309_v27 }
  0xea   :  { %v364_v50 = vmul.f32 %v362_v59, %v360_v21  ;;  %v378_v44 = vpack.c.bf16 %v360_v21, %v356_v15 }
  0xeb   :  { %405 = vmatpush.bf16.msrb.mxu1 %v379_v47  ;;  %v314_v51 = vsel %vm313_vm9, %v863_v9, %v310_v32 }
  0xec   :  { %v368_v48 = vmul.f32 %v366_v55, %v364_v50  ;;  %v319_v42 = vsel %vm316_vm11, %v318_v40, %v314_v51 }
  0xed   :  { %v322_v43 = vmul.f32 %v319_v42, %v1099_v20 }
  0xee   :  { %v372_v25 = vmul.f32 %v370_v22, %v368_v48  ;;  %v380_v34 = vpack.c.bf16 %v368_v48, %v364_v50 }
  0xef   :  { %406 = vmatpush.bf16.msrb.mxu1 %v377_v23  ;;  %v374_v46 = vpack.c.bf16 %v1116_v54, %v322_v43 }
  0xf0   :  { %v382_v29 = vpack.c.bf16 %v372_v25, %v372_v25 }
  0xf2   :  { %v399_v31 = vsel %vm394_vm2, %v382_v29, 0 }
  0xf3   :  { %418 = vmatpush.bf16.msrb.mxu3 %v399_v31  ;;  %407 = vmatpush.bf16.msrb.mxu1 %v375_v30 }
  0xf7   :  { %419 = vmatpush.bf16.msrb.mxu3 %v380_v34  ;;  %408 = vmatpush.bf16.msrb.mxu1 %v373_v35 }
  0xfa   :  { %769 = vmatmul.msk.bf16.vlgmr.msrb.gmra.mxu1 %vm390_vm10, %v803_v41 }
  0xfb   :  { %420 = vmatpush.bf16.msrb.mxu3 %v378_v44 }
  0xff   :  { %421 = vmatpush.bf16.msrb.mxu3 %v376_v38 }
 0x103   :  { %422 = vmatpush.bf16.msrb.mxu3 %v374_v46 }
 0x106   :  { %770 = vmatmul.msk.bf16.vlgmr.msrb.gmra.mxu3 %vm390_vm10, %v803_v41 }
 0x177   :  { %v1140_v49 = vpop.f32.mrf.mxu1 }
 0x178   :  { %v775_v52 = vclamps-f32 %v1140_v49, 6.571429  ;;  %v771_v12 = vmul.f32 -1.442695, %v1140_v49 }
 0x17a   :  { %v779_v36 = vadd.f32 2.0, %v775_v52 }
 0x17c   :  { %v521_v37 = vmul.f32 1.75, %v779_v36 }
 0x17e   :  { %v525_v53 = vmul.f32 %v521_v37, %v521_v37  ;;  %v541_v56 = vadd.f32 %v521_v37, %v521_v37 }
 0x17f   :  { %v1143_v57 = vpop.f32.mrf.mxu1 }
 0x180   :  { %v529_v60 = vsub.f32 0.0, %v525_v53  ;;  %v545_v61 = vmul.f32 1.442695, %v541_v56  ;;  %v777_v62 = vclamps-f32 %v1143_v57, 6.571429 }
 0x181   :  { %v773_v7 = vmul.f32 -1.442695, %v1143_v57 }
 0x182   :  { %v533_v20 = vmul.f32 1.442695, %v529_v60  ;;  %864 = vpow2.f32 %v545_v61  ;;  %v781_v3 = vadd.f32 2.0, %v777_v62 }
 0x184   :  { %866 = vpow2.f32 %v533_v20  ;;  %v523_v4 = vmul.f32 1.75, %v781_v3 }
 0x186   :  { %v527_v8 = vmul.f32 %v523_v4, %v523_v4  ;;  %v543_v10 = vadd.f32 %v523_v4, %v523_v4 }
 0x188   :  { %v1146_v6 = vpop.eup %864  ;;  %v531_v9 = vsub.f32 0.0, %v527_v8  ;;  %v549_v13 = vmul.f32 1.442695, %v543_v10 }
 0x189   :  { %v553_v54 = vmul.f32 0.36787945, %v1146_v6  ;;  %v1151_v58 = vpop.f32.mrf.mxu3  ;;  %v561_v11 = vmul.f32 0.049787067, %v1146_v6  ;;  %v569_v19 = vmul.f32 0.006737947, %v1146_v6 }
 0x18a   :  { %v1153_v0 = vpop.eup %866  ;;  %v776_v14 = vclamps-f32 %v1151_v58, 6.571429  ;;  %v537_v28 = vmul.f32 1.442695, %v531_v9  ;;  %868 = vpow2.f32 %v549_v13  ;;  %v577_v24 = vmul.f32 0.000911882, %v1146_v6 }
 0x18b   :  { %v1157_v1 = vmul.f32 %v1153_v0, %v553_v54  ;;  %870 = vpow2.f32 %v771_v12  ;;  %v585_v35 = vmul.f32 0.0001234098, %v1146_v6  ;;  %v593_v36 = vmul.f32 1.67017e-05, %v1146_v6 }
 0x18c   :  { %v780_v15 = vadd.f32 2.0, %v776_v14  ;;  %872 = vpow2.f32 %v773_v7  ;;  %v772_v53 = vmul.f32 -1.442695, %v1151_v58  ;;  %v601_v8 = vmul.f32 2.2603294e-06, %v1146_v6 }
 0x18d   :  { %v1161_v17 = vmul.f32 %v561_v11, %v1157_v1  ;;  %874 = vpow2.f32 %v537_v28  ;;  %v804_v28 = vld [vmem:[%s1380_s3 + $0x4] sm:$0xf]  ;;  %v787_v6 = vld [vmem:[%s1380_s3 + $0x8] sm:$0xf0] }
 0x18e   :  { %v522_v18 = vmul.f32 1.75, %v780_v15 }
 0x18f   :  { %v1168_v50 = vmul.f32 %v569_v19, %v1161_v17 }
 0x190   :  { %v526_v21 = vmul.f32 %v522_v18, %v522_v18  ;;  %v542_v59 = vadd.f32 %v522_v18, %v522_v18  ;;  %v869_v47 = vpop.eup %868 }
 0x191   :  { %v1164_v63 = vpop.f32.mrf.mxu3  ;;  %v871_v55 = vpop.eup %870  ;;  %v555_v5 = vmul.f32 0.36787945, %v869_v47  ;;  %v563_v29 = vmul.f32 0.049787067, %v869_v47  ;;  %v1177_v30 = vmul.f32 %v577_v24, %v1168_v50  ;;  %v571_v34 = vmul.f32 0.006737947, %v869_v47 }
 0x192   :  { %v778_v2 = vclamps-f32 %v1164_v63, 6.571429  ;;  %v530_v45 = vsub.f32 0.0, %v526_v21  ;;  %v873_v48 = vpop.eup %872  ;;  %v547_v22 = vmul.f32 1.442695, %v542_v59  ;;  %v1179_v26 = vadd.f32 1.0, %v871_v55 }
 0x193   :  { %v1171_v23 = vpop.eup %874  ;;  %v1181_v31 = vadd.f32 1.0, %v873_v48  ;;  %v774_v39 = vmul.f32 -1.442695, %v1164_v63  ;;  %v579_v44 = vmul.f32 0.000911882, %v869_v47  ;;  %v589_v42 = vmul.f32 %v585_v35, %v1177_v30 }
 0x194   :  { %v535_v25 = vmul.f32 1.442695, %v530_v45  ;;  %v782_v16 = vadd.f32 2.0, %v778_v2  ;;  %v1174_v27 = vmul.f32 %v1171_v23, %v555_v5  ;;  %v587_v52 = vmul.f32 0.0001234098, %v869_v47 }
 0x195   :  { %v595_v62 = vmul.f32 1.67017e-05, %v869_v47  ;;  %v597_v20 = vmul.f32 %v593_v36, %v589_v42  ;;  %v603_v10 = vmul.f32 2.2603294e-06, %v869_v47  ;;  %v1225_v55 = vor.u32 %v804_v28, %v787_v6 }
 0x196   :  { %876 = vpow2.f32 %v535_v25  ;;  %v524_v32 = vmul.f32 1.75, %v782_v16  ;;  %v1184_v33 = vmul.f32 %v563_v29, %v1174_v27  ;;  %vm480_vm14 = vweird.f32 %v1181_v31 }
 0x197   :  { %878 = vpow2.f32 %v547_v22  ;;  %v605_v13 = vmul.f32 %v601_v8, %v597_v20  ;;  %v456_v6 = vand.u32 2147483648, %v1179_v26  ;;  %vm450_vm1 = vweird.f32 %v1179_v26 }
 0x198   :  { %v528_v41 = vmul.f32 %v524_v32, %v524_v32  ;;  %v544_v51 = vadd.f32 %v524_v32, %v524_v32  ;;  %v1189_v40 = vmul.f32 %v571_v34, %v1184_v33  ;;  %880 = vrcp.f32 %v1181_v31 }
 0x199   :  { %882 = vrcp.f32 %v1179_v26  ;;  %v615_v28 = vpack.c.bf16 %v1184_v33, %v1161_v17  ;;  %v454_v17 = vand.u32 2147483647, %v1179_v26 }
 0x19a   :  { %v532_v38 = vsub.f32 0.0, %v528_v41  ;;  %v551_v43 = vmul.f32 1.442695, %v544_v51  ;;  %v583_v46 = vmul.f32 %v579_v44, %v1189_v40  ;;  %884 = vpow2.f32 %v774_v39 }
 0x19b   :  { %vm455_vm5 = vcmp.eq.f32.partialorder %v454_v17, 8.507059e+37 }
 0x19c   :  { %v1196_v37 = vpop.eup %876  ;;  %v539_v56 = vmul.f32 1.442695, %v532_v38  ;;  %886 = vpow2.f32 %v551_v43  ;;  %v591_v61 = vmul.f32 %v587_v52, %v583_v46  ;;  %v619_v38 = vpack.c.bf16 %v583_v46, %v1177_v30 }
 0x19d   :  { %v1199_v60 = vpop.eup %878  ;;  %v617_v30 = vpack.c.bf16 %v1189_v40, %v1168_v50  ;;  %v484_v40 = vand.u32 2147483647, %v1181_v31 }
 0x19e   :  { %888 = vpow2.f32 %v539_v56  ;;  %v554_v3 = vmul.f32 0.36787945, %v1199_v60  ;;  %v599_v4 = vmul.f32 %v595_v62, %v591_v61  ;;  %v1203_v12 = vpop.eup %880  ;;  %v562_v7 = vmul.f32 0.049787067, %v1199_v60 }
 0x19f   :  { %890 = vpow2.f32 %v772_v53  ;;  %v1209_v11 = vpop.eup %882  ;;  %v570_v19 = vmul.f32 0.006737947, %v1199_v60  ;;  %v476_v59 = vmul.f32 %v1203_v12, %v1181_v31  ;;  %v578_v48 = vmul.f32 0.000911882, %v1199_v60 }
 0x1a0   :  { %v1206_v54 = vmul.f32 %v1196_v37, %v554_v3  ;;  %v623_v9 = vpack.c.bf16 %v599_v4, %v597_v20  ;;  %v607_v14 = vmul.f32 %v603_v10, %v599_v4  ;;  %v885_v15 = vpop.eup %884  ;;  %v446_v22 = vmul.f32 %v1209_v11, %v1179_v26 }
 0x1a1   :  { %v621_v24 = vpack.c.bf16 %v591_v61, %v589_v42  ;;  %v477_v34 = vsub.f32 1.0, %v476_v59  ;;  %v1239_v35 = vadd.f32 1.0, %v885_v15  ;;  %v586_v51 = vmul.f32 0.0001234098, %v1199_v60  ;;  %v806_v59 = vld [vmem:[%s1380_s3 + $0x14] sm:$0xf] }
 0x1a2   :  { %v1218_v18 = vmul.f32 %v562_v7, %v1206_v54  ;;  %v887_v21 = vpop.eup %886  ;;  %655 = vmatpush.bf16.msra.mxu1 %v623_v9  ;;  %v625_v47 = vpack.c.bf16 %v607_v14, %v605_v13  ;;  %v447_v44 = vsub.f32 1.0, %v446_v22  ;;  %v594_v62 = vmul.f32 1.67017e-05, %v1199_v60 }
 0x1a3   :  { %v556_v5 = vmul.f32 0.36787945, %v887_v21  ;;  %v564_v29 = vmul.f32 0.049787067, %v887_v21  ;;  %v572_v41 = vmul.f32 0.006737947, %v887_v21  ;;  %v478_v53 = vmul.f32 %v1203_v12, %v477_v34 }
 0x1a4   :  { %v1223_v2 = vpop.eup %888  ;;  %v1228_v45 = vmul.f32 %v570_v19, %v1218_v18  ;;  %681 = vmatpush.bf16.msra.mxu3 %v625_v47  ;;  %v580_v52 = vmul.f32 0.000911882, %v887_v21  ;;  %892 = vrcp.f32 %v1239_v35  ;;  %v588_v61 = vmul.f32 0.0001234098, %v887_v21 }
 0x1a5   :  { %v891_v25 = vpop.eup %890  ;;  %v1234_v16 = vmul.f32 %v1223_v2, %v556_v5  ;;  %v448_v20 = vmul.f32 %v1209_v11, %v447_v44  ;;  %v596_v3 = vmul.f32 1.67017e-05, %v887_v21  ;;  %vm451_vm12 = vweird.f32 %v1209_v11 }
 0x1a6   :  { %v1237_v32 = vmul.f32 %v578_v48, %v1228_v45  ;;  %656 = vmatpush.bf16.msra.mxu1 %v621_v24  ;;  %v1247_v42 = vadd.f32 1.0, %v891_v25  ;;  %v479_v8 = vadd.f32 %v1203_v12, %v478_v53  ;;  %vm481_vm13 = vweird.f32 %v1203_v12  ;;  %vm1294_vm3 = vmor %vm450_vm1, %vm451_vm12  ;;  %v785_v53 = vld [vmem:[%s1380_s3] sm:$0xf] }
 0x1a7   :  { %799 = vmatmul.msk.bf16.vlgmr.msra.gmra.mxu3 %vm227_vm0, %v1225_v55  ;;  %v1244_v39 = vmul.f32 %v564_v29, %v1234_v16  ;;  %v486_v10 = vand.u32 2147483648, %v1181_v31  ;;  %v602_v9 = vmul.f32 2.2603294e-06, %v1199_v60  ;;  %v604_v13 = vmul.f32 2.2603294e-06, %v887_v21  ;;  %vm1275_vm15 = vmor %vm480_vm14, %vm481_vm13 }
 0x1a8   :  { %v590_v36 = vmul.f32 %v586_v51, %v1237_v32  ;;  %894 = vrcp.f32 %v1247_v42  ;;  %v449_v50 = vadd.f32 %v1209_v11, %v448_v20  ;;  %v795_v31 = vld [vmem:[%s1380_s3 + $0x18] sm:$0xf0]  ;;  %v483_v33 = vsel %vm1275_vm15, %v1203_v12, %v479_v8 }
 0x1a9   :  { %v1251_v43 = vmul.f32 %v572_v41, %v1244_v39  ;;  %v487_v48 = vor.u32 1.1754944e-38, %v486_v10  ;;  %vm485_vm4 = vcmp.eq.f32.partialorder %v484_v40, 8.507059e+37  ;;  %v613_v12 = vpack.c.bf16 %v1174_v27, %v1157_v1 }
 0x1aa   :  { %657 = vmatpush.bf16.msra.mxu1 %v619_v38  ;;  %v598_v4 = vmul.f32 %v594_v62, %v590_v36  ;;  %v1267_v14 = vpop.eup %892  ;;  %v453_v26 = vsel %vm1294_vm3, %v1209_v11, %v449_v50  ;;  %v798_v25 = vor.u32 %v806_v59, %v795_v31  ;;  %v457_v29 = vor.u32 1.1754944e-38, %v456_v6 }
 0x1ab   :  { %v584_v56 = vmul.f32 %v580_v52, %v1251_v43  ;;  %v491_v24 = vmul.f32 %v1267_v14, %v1239_v35  ;;  %v488_v34 = vsel %vm485_vm4, %v487_v48, %v483_v33  ;;  %v611_v52 = vpack.c.bf16 %v1171_v23, %v1153_v0 }
 0x1ac   :  { %v606_v60 = vmul.f32 %v602_v9, %v598_v4  ;;  %v458_v44 = vsel %vm455_vm5, %v457_v29, %v453_v26  ;;  %v507_v11 = vmul.f32 %v488_v34, %v1143_v57  ;;  %v805_v57 = vld [vmem:[%s1380_s3 + $0x4] sm:$0xf0]  ;;  %vm496_vm6 = vweird.f32 %v1267_v14 }
 0x1ad   :  { %v592_v46 = vmul.f32 %v588_v61, %v584_v56  ;;  %v492_v38 = vsub.f32 1.0, %v491_v24  ;;  %v620_v1 = vpack.c.bf16 %v584_v56, %v1237_v32  ;;  %v786_v32 = vor.u32 %v805_v57, %v785_v53 }
 0x1ae   :  { %658 = vmatpush.bf16.msra.mxu1 %v617_v30  ;;  %v1285_v47 = vpop.eup %894  ;;  %v501_v61 = vand.u32 2147483648, %v1239_v35  ;;  %v616_v62 = vpack.c.bf16 %v1244_v39, %v1218_v18  ;;  %vm495_vm8 = vweird.f32 %v1239_v35  ;;  %v471_v20 = vand.u32 2147483648, %v1247_v42 }
 0x1af   :  { %v600_v7 = vmul.f32 %v596_v3, %v592_v46  ;;  %v622_v41 = vpack.c.bf16 %v592_v46, %v590_v36  ;;  %v461_v51 = vmul.f32 %v1285_v47, %v1247_v42  ;;  %v505_v36 = vmul.f32 %v458_v44, %v1140_v49  ;;  %vm497_vm9 = vmor %vm495_vm8, %vm496_vm6 }
 0x1b0   :  { %v493_v0 = vmul.f32 %v1267_v14, %v492_v38  ;;  %vm466_vm7 = vweird.f32 %v1285_v47  ;;  %vm465_vm10 = vweird.f32 %v1247_v42  ;;  %v469_v30 = vand.u32 2147483647, %v1247_v42 }
 0x1b1   :  { %v624_v19 = vpack.c.bf16 %v600_v7, %v598_v4  ;;  %v608_v21 = vmul.f32 %v604_v13, %v600_v7  ;;  %v462_v27 = vsub.f32 1.0, %v461_v51  ;;  %v609_v23 = vpack.c.bf16 %v507_v11, %v505_v36  ;;  %vm467_vm11 = vmor %vm465_vm10, %vm466_vm7  ;;  %v807_v7 = vld [vmem:[%s1380_s3 + $0x14] sm:$0xf0] }
 0x1b2   :  { %659 = vmatpush.bf16.msra.mxu1 %v615_v28  ;;  %v494_v56 = vadd.f32 %v1267_v14, %v493_v0  ;;  %v502_v18 = vor.u32 1.1754944e-38, %v501_v61  ;;  %v614_v39 = vpack.c.bf16 %v1234_v16, %v1206_v54  ;;  %vm470_vm13 = vcmp.eq.f32.partialorder %v469_v30, 8.507059e+37  ;;  %v793_v16 = vld [vmem:[%s1380_s3 + $0x10] sm:$0xf] }
 0x1b3   :  { %693 = vmatpush.bf16.msrb.mxu0 %v624_v19  ;;  %808 = vmatpush.bf16.msrb.mxu3 %v624_v19  ;;  %v626_v22 = vpack.c.bf16 %v608_v21, %v606_v60  ;;  %v463_v49 = vmul.f32 %v1285_v47, %v462_v27  ;;  %v612_v42 = vpack.c.bf16 %v1223_v2, %v1196_v37 }
 0x1b4   :  { %v498_v46 = vsel %vm497_vm9, %v1267_v14, %v494_v56  ;;  %v794_v13 = vor.u32 %v807_v7, %v793_v16 }
 0x1b5   :  { %719 = vmatpush.bf16.msrb.mxu2 %v626_v22 }
 0x1b6   :  { %660 = vmatpush.bf16.msra.mxu1 %v613_v12 }
 0x1b7   :  { %694 = vmatpush.bf16.msrb.mxu0 %v622_v41  ;;  %809 = vmatpush.bf16.msrb.mxu3 %v622_v41 }
 0x1b8   :  { %800 = vmatmul.msk.bf16.gmra.mxu3 %vm227_vm0, %v798_v25  ;;  %801 = vmatmul.msk.bf16.vlgmr.msrb.gmra.mxu2 %vm227_vm0, %v1225_v55  ;;  %v618_v55 = vpack.c.bf16 %v1251_v43, %v1228_v45  ;;  %v464_v45 = vadd.f32 %v1285_v47, %v463_v49  ;;  %v499_v43 = vand.u32 2147483647, %v1239_v35  ;;  %v472_v35 = vor.u32 1.1754944e-38, %v471_v20 }
 0x1ba   :  { %661 = vmatpush.bf16.msra.mxu1 %v611_v52  ;;  %v468_v3 = vsel %vm467_vm11, %v1285_v47, %v464_v45  ;;  %vm500_vm12 = vcmp.eq.f32.partialorder %v499_v43, 8.507059e+37 }
 0x1bb   :  { %695 = vmatpush.bf16.msrb.mxu0 %v620_v1  ;;  %810 = vmatpush.bf16.msrb.mxu3 %v620_v1  ;;  %v503_v4 = vsel %vm500_vm12, %v502_v18, %v498_v46  ;;  %v473_v8 = vsel %vm470_vm13, %v472_v35, %v468_v3 }
 0x1bc   :  { %v508_v10 = vmul.f32 %v503_v4, %v1164_v63  ;;  %v506_v54 = vmul.f32 %v473_v8, %v1151_v58 }
 0x1be   :  { %662 = vmatpush.bf16.msra.mxu1 %v609_v23  ;;  %v610_v9 = vpack.c.bf16 %v508_v10, %v506_v54 }
 0x1bf   :  { %696 = vmatpush.bf16.msrb.mxu0 %v618_v55  ;;  %811 = vmatpush.bf16.msrb.mxu3 %v618_v55 }
 0x1c1   :  { %663 = vmatmul.bf16.vlgmr.msra.gmra.mxu1 %v786_v32 }
 0x1c3   :  { %697 = vmatpush.bf16.msrb.mxu0 %v616_v62  ;;  %812 = vmatpush.bf16.msrb.mxu3 %v616_v62 }
 0x1c7   :  { %698 = vmatpush.bf16.msrb.mxu0 %v614_v39  ;;  %813 = vmatpush.bf16.msrb.mxu3 %v614_v39 }
 0x1c8   :  { %802 = vmatmul.msk.bf16.gmra.mxu2 %vm227_vm0, %v798_v25  ;;  %vm735_vm0 = vcmask 130052  }
 0x1c9   :  { %vm1353_vm14 = vmor %vm735_vm0, %vm394_vm2 }
 0x1cb   :  { %699 = vmatpush.bf16.msrb.mxu0 %v612_v42  ;;  %814 = vmatpush.bf16.msrb.mxu3 %v612_v42 }
 0x1cf   :  { %700 = vmatpush.bf16.msrb.mxu0 %v610_v9  ;;  %815 = vmatpush.bf16.msrb.mxu3 %v610_v9 }
 0x1d1   :  { %668 = vmatmul.bf16.gmra.mxu1 %v794_v13 }
 0x1d2   :  { %701 = vmatmul.bf16.vlgmr.msrb.gmra.mxu0 %v786_v32  ;;  %706 = vmatmul.bf16.vlgmr.msrb.gmra.mxu3 %v794_v13 }
 0x22a   :  { %v683_v63 = vpop.f32.mrf.mxu3 }
 0x232   :  { %v685_v37 = vpop.f32.mrf.mxu3 }
 0x23b   :  { %v721_v14 = vpop.f32.mrf.mxu2  ;;  %v688_v58 = vpop.f32.mrf.mxu3 }
 0x23e   :  { %v664_v2 = vpop.f32.mrf.mxu1 }
 0x23f   :  { %v684_v15 = vadd.f32 %v683_v63, %v664_v2 }
 0x243   :  { %v723_v40 = vpop.f32.mrf.mxu2  ;;  %v690_v28 = vpop.f32.mrf.mxu3 }
 0x246   :  { %v666_v50 = vpop.f32.mrf.mxu1 }
 0x247   :  { %v686_v48 = vadd.f32 %v685_v37, %v666_v50 }
 0x24b   :  { %v726_v31 = vpop.f32.mrf.mxu2 }
 0x24e   :  { %v669_v21 = vpop.f32.mrf.mxu1 }
 0x24f   :  { %v702_v6 = vpop.f32.mrf.mxu0  ;;  %v689_v17 = vadd.f32 %v688_v58, %v669_v21 }
 0x250   :  { %v722_v19 = vadd.f32 %v721_v14, %v702_v6 }
 0x252   :  { %v731_v59 = vpack.c.bf16 %v722_v19, %v684_v15 }
 0x253   :  { %v728_v25 = vpop.f32.mrf.mxu2 }
 0x254   :  { %737 = vst.msk [vmem:[%s1381_s4] sm:$0xff] %vm1353_vm14, %v731_v59 }
 0x255   :  { %v707_v47 = vpop.f32.mrf.mxu3 }
 0x256   :  { %v727_v33 = vadd.f32 %v726_v31, %v707_v47  ;;  %v671_v12 = vpop.f32.mrf.mxu1 }
 0x257   :  { %v704_v5 = vpop.f32.mrf.mxu0  ;;  %v691_v34 = vadd.f32 %v690_v28, %v671_v12 }
 0x258   :  { %v733_v22 = vpack.c.bf16 %v727_v33, %v689_v17  ;;  %v724_v24 = vadd.f32 %v723_v40, %v704_v5 }
 0x25a   :  { %739 = vst.msk [vmem:[%s1381_s4 + $0x10] sm:$0xff] %vm1353_vm14, %v733_v22  ;;  %v732_v26 = vpack.c.bf16 %v724_v24, %v686_v48 }
 0x25c   :  { %738 = vst.msk [vmem:[%s1381_s4 + $0x8] sm:$0xff] %vm1353_vm14, %v732_v26 }
 0x25d   :  { %v709_v29 = vpop.f32.mrf.mxu3 }
 0x25e   :  { %v729_v41 = vadd.f32 %v728_v25, %v709_v29 }
 0x260   :  { %v734_v51 = vpack.c.bf16 %v729_v41, %v691_v34 }
 0x262   :  { %740 = vst.msk [vmem:[%s1381_s4 + $0x18] sm:$0xff] %vm1353_vm14, %v734_v51 }

// kernel: net_forward.3
= control target key start
LH: loop header
LB: loop body
LE: loop exit
PB: predicated region body
PF: predicated region fallthrough
CT: control target
= control target key end

     0   :  { %s7996_s0 = inlined_call_operand.vmem [shape: bf16[18,384], index: 0, kind: input, shape index: {}]   ;;  %s7997_s1 = inlined_call_operand.vmem [shape: bf16[3456,64], index: 1, kind: input, shape index: {}]   ;;  %s7998_s2 = inlined_call_operand.vmem [shape: bf16[1152,32], index: 2, kind: input, shape index: {}]   ;;  %s7999_s3 = inlined_call_operand.vmem [shape: bf16[1152,10], index: 3, kind: input, shape index: {}]   ;;  %s8000_s4 = inlined_call_operand.hbm [shape: f32[2,10], index: 4, kind: output, shape index: {}]  }
   0x1   :  { %v5737_v0 = vld [vmem:[%s7997_s1 + $0x38] sm:$0xff]  ;;  %v5736_v4 = vld [vmem:[%s7997_s1 + $0x30] sm:$0xff]  ;;  %v5735_v8 = vld [vmem:[%s7997_s1 + $0x28] sm:$0xff] }
   0x2   :  { %v5745_v1 = vld [vmem:[%s7997_s1 + $0x78] sm:$0xff]  ;;  %2220 = vmatpush.bf16.msra.mxu0 %v5737_v0  ;;  %v5744_v5 = vld [vmem:[%s7997_s1 + $0x70] sm:$0xff]  ;;  %v5743_v9 = vld [vmem:[%s7997_s1 + $0x68] sm:$0xff] }
   0x3   :  { %v5753_v2 = vld [vmem:[%s7997_s1 + $0xb8] sm:$0xff]  ;;  %2238 = vmatpush.bf16.msra.mxu1 %v5745_v1  ;;  %v5752_v6 = vld [vmem:[%s7997_s1 + $0xb0] sm:$0xff]  ;;  %v5751_v10 = vld [vmem:[%s7997_s1 + $0xa8] sm:$0xff] }
   0x4   :  { %v5761_v3 = vld [vmem:[%s7997_s1 + $0xf8] sm:$0xff]  ;;  %2256 = vmatpush.bf16.msra.mxu2 %v5753_v2  ;;  %v5760_v7 = vld [vmem:[%s7997_s1 + $0xf0] sm:$0xff]  ;;  %v5759_v11 = vld [vmem:[%s7997_s1 + $0xe8] sm:$0xff] }
   0x5   :  { %2274 = vmatpush.bf16.msra.mxu3 %v5761_v3  ;;  %v5734_v12 = vld [vmem:[%s7997_s1 + $0x20] sm:$0xff]  ;;  %v20_v17 = vld [vmem:[%s7996_s0 + $0xc] sm:$0xff]  ;;  %v19_v20 = vld [vmem:[%s7996_s0 + $0x8] sm:$0xf] }
   0x6   :  { %2221 = vmatpush.bf16.msra.mxu0 %v5736_v4  ;;  %v5742_v13 = vld [vmem:[%s7997_s1 + $0x60] sm:$0xff]  ;;  %v21_v21 = vld [vmem:[%s7996_s0 + $0x14] sm:$0xf]  ;;  %v5733_v22 = vld [vmem:[%s7997_s1 + $0x18] sm:$0xff]  ;;  %v6305_v24 = vunpack.c.l.bf16 %v20_v17  ;;  %v6307_v25 = vunpack.c.h.bf16 %v20_v17  ;;  %v6309_v26 = vunpack.c.l.bf16 %v19_v20 }
   0x7   :  { %2239 = vmatpush.bf16.msra.mxu1 %v5744_v5  ;;  %v5750_v14 = vld [vmem:[%s7997_s1 + $0xa0] sm:$0xff]  ;;  %v5741_v23 = vld [vmem:[%s7997_s1 + $0x58] sm:$0xff] }
   0x8   :  { %2257 = vmatpush.bf16.msra.mxu2 %v5752_v6  ;;  %v5758_v15 = vld [vmem:[%s7997_s1 + $0xe0] sm:$0xff] }
   0x9   :  { %2275 = vmatpush.bf16.msra.mxu3 %v5760_v7  ;;  %v18_v16 = vld [vmem:[%s7996_s0] sm:$0xff] }
   0xa   :  { %2222 = vmatpush.bf16.msra.mxu0 %v5735_v8  ;;  %v6289_v18 = vunpack.c.l.bf16 %v18_v16  ;;  %v6291_v19 = vunpack.c.h.bf16 %v18_v16 }
   0xb   :  { %2240 = vmatpush.bf16.msra.mxu1 %v5743_v9 }
   0xc   :  { %2258 = vmatpush.bf16.msra.mxu2 %v5751_v10 }
   0xd   :  { %2276 = vmatpush.bf16.msra.mxu3 %v5759_v11 }
   0xe   :  { %9 = vsyncpa [#allocation3], 0  ;;  %v4257_v27 = vmul.f32 -1.442695, %v6289_v18  ;;  %v4266_v28 = vclamps-f32 %v6289_v18, 6.571429  ;;  %v6314_v30 = vunpack.c.l.bf16 %v21_v21  ;;  %2223 = vmatpush.bf16.msra.mxu0 %v5734_v12 }
   0xf   :  { %v4258_v29 = vmul.f32 -1.442695, %v6291_v19  ;;  %2241 = vmatpush.bf16.msra.mxu1 %v5742_v13  ;;  %v4260_v31 = vmul.f32 -1.442695, %v6305_v24  ;;  %v4269_v32 = vclamps-f32 %v6305_v24, 6.571429 }
  0x10   :  { %v4261_v33 = vmul.f32 -1.442695, %v6307_v25  ;;  %2259 = vmatpush.bf16.msra.mxu2 %v5750_v14  ;;  %v5749_v34 = vld [vmem:[%s7997_s1 + $0x98] sm:$0xff]  ;;  %6091 = vpow2.f32 %v4257_v27  ;;  %v4259_v36 = vmul.f32 -1.442695, %v6309_v26  ;;  %v4275_v38 = vadd.f32 2.0, %v4266_v28 }
  0x11   :  { %2277 = vmatpush.bf16.msra.mxu3 %v5758_v15  ;;  %v5757_v35 = vld [vmem:[%s7997_s1 + $0xd8] sm:$0xff]  ;;  %6093 = vpow2.f32 %v4260_v31  ;;  %v4278_v39 = vadd.f32 2.0, %v4269_v32  ;;  %v4262_v40 = vmul.f32 -1.442695, %v6314_v30  ;;  %v5732_v41 = vld [vmem:[%s7997_s1 + $0x10] sm:$0xff]  ;;  %v5731_v50 = vld [vmem:[%s7997_s1 + $0x8] sm:$0xff] }
  0x12   :  { %v22_v37 = vld [vmem:[%s7996_s0 + $0x18] sm:$0x11]  ;;  %6095 = vpow2.f32 %v4258_v29  ;;  %2224 = vmatpush.bf16.msra.mxu0 %v5733_v22  ;;  %v5740_v42 = vld [vmem:[%s7997_s1 + $0x50] sm:$0xff]  ;;  %v6344_v46 = vmul.f32 1.75, %v4275_v38  ;;  %v5739_v51 = vld [vmem:[%s7997_s1 + $0x48] sm:$0xff]  ;;  %s4248_s9 = sshll.u32 %s8000_s4, 4  ;;  %s4249_s9 = int_to_ptr.hbm [resolvable:$true] %s4248_s9 }
  0x13   :  { %2242 = vmatpush.bf16.msra.mxu1 %v5741_v23  ;;  %6097 = vpow2.f32 %v4261_v33  ;;  %v6336_v43 = vunpack.c.l.bf16 %v22_v37  ;;  %v5748_v44 = vld [vmem:[%s7997_s1 + $0x90] sm:$0xff]  ;;  %v6346_v47 = vmul.f32 1.75, %v4278_v39  ;;  %v5747_v55 = vld [vmem:[%s7997_s1 + $0x88] sm:$0xff]  ;;  %v5730_v62 = vld [vmem:[%s7997_s1] sm:$0xff]  ;;  %v6378_v63 = vunpack.c.h.bf16 %v22_v37 }
  0x14   :  { %2260 = vmatpush.bf16.msra.mxu2 %v5749_v34  ;;  %v5756_v45 = vld [vmem:[%s7997_s1 + $0xd0] sm:$0xff]  ;;  %6099 = vpow2.f32 %v4259_v36  ;;  %v5755_v56 = vld [vmem:[%s7997_s1 + $0xc8] sm:$0xff]  ;;  %v6367_v58 = vmul.f32 %v6344_v46, %v6344_v46  ;;  %v5738_v0 = vld [vmem:[%s7997_s1 + $0x40] sm:$0xff] }
  0x15   :  { %2278 = vmatpush.bf16.msra.mxu3 %v5757_v35  ;;  %6101 = vpow2.f32 %v4262_v40  ;;  %v4263_v53 = vmul.f32 -1.442695, %v6336_v43  ;;  %v6372_v60 = vmul.f32 %v6346_v47, %v6346_v47  ;;  %v5746_v1 = vld [vmem:[%s7997_s1 + $0x80] sm:$0xff]  ;;  %v5785_v12 = vld [vmem:[%s7997_s1 + $0x1b8] sm:$0xff]  ;;  %v5784_v37 = vld [vmem:[%s7997_s1 + $0x1b0] sm:$0xff] }
  0x16   :  { %v6092_v48 = vpop.eup %6091  ;;  %2225 = vmatpush.bf16.msra.mxu0 %v5732_v41  ;;  %v5754_v6 = vld [vmem:[%s7997_s1 + $0xc0] sm:$0xff]  ;;  %v258_v10 = vsub.f32 0.0, %v6367_v58  ;;  %v5769_v13 = vld [vmem:[%s7997_s1 + $0x138] sm:$0xff]  ;;  %v5768_v38 = vld [vmem:[%s7997_s1 + $0x130] sm:$0xff] }
  0x17   :  { %v6094_v49 = vpop.eup %6093  ;;  %2243 = vmatpush.bf16.msra.mxu1 %v5740_v42  ;;  %v6354_v52 = vadd.f32 1.0, %v6092_v48  ;;  %v261_v14 = vsub.f32 0.0, %v6372_v60  ;;  %v5777_v17 = vld [vmem:[%s7997_s1 + $0x178] sm:$0xff]  ;;  %v5776_v42 = vld [vmem:[%s7997_s1 + $0x170] sm:$0xff]  ;;  %v5782_v22 = vld [vmem:[%s7997_s1 + $0x1a0] sm:$0xff] }
  0x18   :  { %v6096_v54 = vpop.eup %6095  ;;  %2261 = vmatpush.bf16.msra.mxu2 %v5748_v44  ;;  %v6363_v57 = vadd.f32 1.0, %v6094_v49  ;;  %v5793_v20 = vld [vmem:[%s7997_s1 + $0x1f8] sm:$0xff]  ;;  %v5792_v44 = vld [vmem:[%s7997_s1 + $0x1f0] sm:$0xff]  ;;  %v5766_v33 = vld [vmem:[%s7997_s1 + $0x120] sm:$0xff]  ;;  %v267_v49 = vmul.f32 1.442695, %v258_v10 }
  0x19   :  { %2279 = vmatpush.bf16.msra.mxu3 %v5756_v45  ;;  %v6098_v59 = vpop.eup %6097  ;;  %6103 = vrcp.f32 %v6354_v52  ;;  %v78_v2 = vand.u32 2147483647, %v6354_v52  ;;  %v6387_v3 = vadd.f32 1.0, %v6096_v54  ;;  %v80_v7 = vand.u32 2147483648, %v6354_v52 }
  0x1a   :  { %v6100_v61 = vpop.eup %6099  ;;  %6105 = vrcp.f32 %v6363_v57  ;;  %2226 = vmatpush.bf16.msra.mxu0 %v5731_v50  ;;  %v6389_v4 = vadd.f32 1.0, %v6098_v59  ;;  %v123_v8 = vand.u32 2147483647, %v6363_v57  ;;  %v125_v9 = vand.u32 2147483648, %v6363_v57 }
  0x1b   :  { %2244 = vmatpush.bf16.msra.mxu1 %v5739_v51  ;;  %6107 = vpow2.f32 %v4263_v53  ;;  %v6102_v5 = vpop.eup %6101  ;;  %vm74_vm0 = vweird.f32 %v6354_v52  ;;  %v6400_v11 = vadd.f32 1.0, %v6100_v61  ;;  %vm119_vm1 = vweird.f32 %v6363_v57 }
  0x1c   :  { %2262 = vmatpush.bf16.msra.mxu2 %v5747_v55  ;;  %6109 = vrcp.f32 %v6387_v3  ;;  %v93_v15 = vand.u32 2147483647, %v6387_v3  ;;  %v95_v16 = vand.u32 2147483648, %v6387_v3  ;;  %vm6421_vm2 = vcmp.eq.f32.partialorder %v78_v2, 8.507059e+37 }
  0x1d   :  { %2280 = vmatpush.bf16.msra.mxu3 %v5755_v56  ;;  %6111 = vrcp.f32 %v6389_v4  ;;  %v138_v23 = vand.u32 2147483647, %v6389_v4  ;;  %v140_v27 = vand.u32 2147483648, %v6389_v4  ;;  %v6427_v28 = vadd.f32 1.0, %v6102_v5 }
  0x1e   :  { %2227 = vmatpush.bf16.msra.mxu0 %v5730_v62  ;;  %v81_v32 = vor.u32 1.1754944e-38, %v80_v7  ;;  %vm6433_vm3 = vcmp.eq.f32.partialorder %v123_v8, 8.507059e+37  ;;  %v6437_v34 = vor.u32 1.1754944e-38, %v125_v9  ;;  %vm89_vm4 = vweird.f32 %v6387_v3  ;;  %v5775_v7 = vld [vmem:[%s7997_s1 + $0x168] sm:$0xff] }
  0x1f   :  { %v6419_v21 = vpop.eup %6103  ;;  %2245 = vmatpush.bf16.msra.mxu1 %v5738_v0  ;;  %vm134_vm5 = vweird.f32 %v6389_v4  ;;  %6113 = vrcp.f32 %v6400_v11  ;;  %vm6453_vm7 = vcmp.eq.f32.partialorder %v93_v15, 8.507059e+37  ;;  %v6457_v41 = vor.u32 1.1754944e-38, %v95_v16  ;;  %v5783_v0 = vld [vmem:[%s7997_s1 + $0x1a8] sm:$0xff] }
  0x20   :  { %v6429_v29 = vpop.eup %6105  ;;  %2263 = vmatpush.bf16.msra.mxu2 %v5746_v1  ;;  %v70_v31 = vmul.f32 %v6419_v21, %v6354_v52  ;;  %vm75_vm6 = vweird.f32 %v6419_v21  ;;  %6115 = vrcp.f32 %v6427_v28  ;;  %vm6469_vm9 = vcmp.eq.f32.partialorder %v138_v23, 8.507059e+37 }
  0x21   :  { %2281 = vmatpush.bf16.msra.mxu3 %v5754_v6  ;;  %v6439_v35 = vpop.eup %6107  ;;  %v115_v36 = vmul.f32 %v6429_v29, %v6363_v57  ;;  %vm120_vm8 = vweird.f32 %v6429_v29  ;;  %v6473_v50 = vor.u32 1.1754944e-38, %v140_v27  ;;  %vm104_vm10 = vweird.f32 %v6400_v11  ;;  %vm6486_vm11 = vmor %vm74_vm0, %vm75_vm6  ;;  %v5767_v6 = vld [vmem:[%s7997_s1 + $0x128] sm:$0xff] }
  0x22   :  { %2292 = vmatpush.bf16.msrb.mxu0 %v5769_v13  ;;  %v71_v39 = vsub.f32 1.0, %v70_v31  ;;  %v6466_v45 = vpop.eup %6109  ;;  %v108_v55 = vand.u32 2147483647, %v6400_v11  ;;  %v110_v62 = vand.u32 2147483648, %v6400_v11  ;;  %vm149_vm12 = vweird.f32 %v6427_v28  ;;  %vm6503_vm13 = vmor %vm119_vm1, %vm120_vm8  ;;  %v5791_v13 = vld [vmem:[%s7997_s1 + $0x1e8] sm:$0xff] }
  0x23   :  { %2310 = vmatpush.bf16.msrb.mxu1 %v5777_v17  ;;  %v116_v48 = vsub.f32 1.0, %v115_v36  ;;  %v6475_v51 = vpop.eup %6111  ;;  %v85_v54 = vmul.f32 %v6466_v45, %v6387_v3  ;;  %vm90_vm14 = vweird.f32 %v6466_v45  ;;  %v153_v5 = vand.u32 2147483647, %v6427_v28 }
  0x24   :  { %2328 = vmatpush.bf16.msrb.mxu2 %v5785_v12  ;;  %v72_v53 = vmul.f32 %v6419_v21, %v71_v39  ;;  %v130_v61 = vmul.f32 %v6475_v51, %v6389_v4  ;;  %vm135_vm15 = vweird.f32 %v6475_v51  ;;  %v155_v12 = vand.u32 2147483648, %v6427_v28  ;;  %vm6539_vm1 = vmor %vm89_vm4, %vm90_vm14 }
  0x25   :  { %2346 = vmatpush.bf16.msrb.mxu3 %v5793_v20  ;;  %v117_v59 = vmul.f32 %v6429_v29, %v116_v48  ;;  %v86_v2 = vsub.f32 1.0, %v85_v54  ;;  %v6515_v57 = vpop.eup %6113  ;;  %vm6576_vm4 = vcmp.eq.f32.partialorder %v108_v55, 8.507059e+37  ;;  %v273_v1 = vmul.f32 1.442695, %v261_v14 }
  0x26   :  { %2293 = vmatpush.bf16.msrb.mxu0 %v5768_v38  ;;  %v73_v52 = vadd.f32 %v6419_v21, %v72_v53  ;;  %v131_v9 = vsub.f32 1.0, %v130_v61  ;;  %v6116_v15 = vpop.eup %6115  ;;  %v100_v20 = vmul.f32 %v6515_v57, %v6400_v11  ;;  %vm105_vm0 = vweird.f32 %v6515_v57 }
  0x27   :  { %2311 = vmatpush.bf16.msrb.mxu1 %v5776_v42  ;;  %v118_v8 = vadd.f32 %v6429_v29, %v117_v59  ;;  %v87_v17 = vmul.f32 %v6466_v45, %v86_v2  ;;  %v145_v36 = vmul.f32 %v6116_v15, %v6427_v28  ;;  %v5790_v42 = vld [vmem:[%s7997_s1 + $0x1e0] sm:$0xff]  ;;  %v156_v11 = vor.u32 1.1754944e-38, %v155_v12 }
  0x28   :  { %2329 = vmatpush.bf16.msrb.mxu2 %v5784_v37  ;;  %v77_v16 = vsel %vm6486_vm11, %v6419_v21, %v73_v52  ;;  %v132_v31 = vmul.f32 %v6475_v51, %v131_v9  ;;  %v101_v38 = vsub.f32 1.0, %v100_v20  ;;  %v4270_v28 = vclamps-f32 %v6307_v25, 6.571429  ;;  %v5764_v37 = vld [vmem:[%s7997_s1 + $0x110] sm:$0xff] }
  0x29   :  { %2347 = vmatpush.bf16.msrb.mxu3 %v5792_v44  ;;  %v82_v23 = vsel %vm6421_vm2, %v81_v32, %v77_v16  ;;  %v122_v27 = vsel %vm6503_vm13, %v6429_v29, %v118_v8  ;;  %v88_v3 = vadd.f32 %v6466_v45, %v87_v17  ;;  %vm6557_vm2 = vmor %vm134_vm5, %vm135_vm15  ;;  %v146_v4 = vsub.f32 1.0, %v145_v36 }
  0x2a   :  { %v127_v29 = vsel %vm6433_vm3, %v6437_v34, %v122_v27  ;;  %v204_v32 = vmul.f32 %v82_v23, %v6289_v18  ;;  %2294 = vmatpush.bf16.msrb.mxu0 %v5767_v6  ;;  %v5774_v18 = vld [vmem:[%s7997_s1 + $0x160] sm:$0xff]  ;;  %v133_v39 = vadd.f32 %v6475_v51, %v132_v31  ;;  %vm150_vm3 = vweird.f32 %v6116_v15  ;;  %vm6590_vm5 = vmor %vm104_vm10, %vm105_vm0  ;;  %v5765_v23 = vld [vmem:[%s7997_s1 + $0x118] sm:$0xff] }
  0x2b   :  { %2312 = vmatpush.bf16.msrb.mxu1 %v5775_v7  ;;  %v207_v34 = vmul.f32 %v127_v29, %v6305_v24  ;;  %v92_v44 = vsel %vm6539_vm1, %v6466_v45, %v88_v3  ;;  %v102_v48 = vmul.f32 %v6515_v57, %v101_v38  ;;  %v111_v24 = vor.u32 1.1754944e-38, %v110_v62  ;;  %vm6602_vm6 = vmor %vm149_vm12, %vm150_vm3  ;;  %v5773_v27 = vld [vmem:[%s7997_s1 + $0x158] sm:$0xff]  ;;  %v5771_v45 = vld [vmem:[%s7997_s1 + $0x148] sm:$0xff] }
  0x2c   :  { %2330 = vmatpush.bf16.msrb.mxu2 %v5783_v0  ;;  %v97_v56 = vsel %vm6453_vm7, %v6457_v41, %v92_v44  ;;  %v137_v59 = vsel %vm6557_vm2, %v6475_v51, %v133_v39  ;;  %v147_v55 = vmul.f32 %v6116_v15, %v146_v4  ;;  %vm154_vm7 = vcmp.eq.f32.partialorder %v153_v5, 8.507059e+37  ;;  %v5789_v31 = vld [vmem:[%s7997_s1 + $0x1d8] sm:$0xff]  ;;  %v5788_v39 = vld [vmem:[%s7997_s1 + $0x1d0] sm:$0xff] }
  0x2d   :  { %2348 = vmatpush.bf16.msrb.mxu3 %v5791_v13  ;;  %v438_v54 = vpack.c.bf16 %v207_v34, %v204_v32  ;;  %v142_v61 = vsel %vm6469_vm9, %v6473_v50, %v137_v59  ;;  %v205_v40 = vmul.f32 %v97_v56, %v6291_v19  ;;  %v103_v41 = vadd.f32 %v6515_v57, %v102_v48  ;;  %v5780_v32 = vld [vmem:[%s7997_s1 + $0x190] sm:$0xff]  ;;  %v5763_v59 = vld [vmem:[%s7997_s1 + $0x108] sm:$0xff] }
  0x2e   :  { %2295 = vmatpush.bf16.msrb.mxu0 %v5766_v33  ;;  %v208_v62 = vmul.f32 %v142_v61, %v6307_v25  ;;  %v148_v0 = vadd.f32 %v6116_v15, %v147_v55  ;;  %v4267_v50 = vclamps-f32 %v6291_v19, 6.571429  ;;  %6117 = vpow2.f32 %v267_v49  ;;  %v23_v19 = vld [vmem:[%s7996_s0 + $0x20] sm:$0x1] }
  0x2f   :  { %2313 = vmatpush.bf16.msrb.mxu1 %v5774_v18  ;;  %2228 = vmatmul.bf16.vlgmr.msra.gmra.mxu0 %v438_v54  ;;  %v107_v52 = vsel %vm6590_vm5, %v6515_v57, %v103_v41  ;;  %6119 = vpow2.f32 %v273_v1  ;;  %v6626_v14 = vadd.f32 1.0, %v6439_v35  ;;  %v4272_v5 = vclamps-f32 %v6336_v43, 6.571429  ;;  %v5781_v35 = vld [vmem:[%s7997_s1 + $0x198] sm:$0xff]  ;;  %v5823_v1 = vld [vmem:[%s7997_s1 + $0x2e8] sm:$0xff] }
  0x30   :  { %2331 = vmatpush.bf16.msrb.mxu2 %v5782_v22  ;;  %v439_v2 = vpack.c.bf16 %v208_v62, %v205_v40  ;;  %v112_v6 = vsel %vm6576_vm4, %v111_v24, %v107_v52  ;;  %v152_v58 = vsel %vm6602_vm6, %v6116_v15, %v148_v0  ;;  %v4276_v7 = vadd.f32 2.0, %v4267_v50  ;;  %v5779_v24 = vld [vmem:[%s7997_s1 + $0x188] sm:$0xff]  ;;  %v5778_v52 = vld [vmem:[%s7997_s1 + $0x180] sm:$0xff] }
  0x31   :  { %2349 = vmatpush.bf16.msrb.mxu3 %v5790_v42  ;;  %v157_v25 = vsel %vm154_vm7, %v156_v11, %v152_v58  ;;  %v206_v10 = vmul.f32 %v112_v6, %v6309_v26  ;;  %v4264_v57 = vmul.f32 -1.442695, %v6378_v63  ;;  %v6630_v8 = vunpack.c.l.bf16 %v23_v19  ;;  %v5787_v62 = vld [vmem:[%s7997_s1 + $0x1c8] sm:$0xff]  ;;  %v5762_v6 = vld [vmem:[%s7997_s1 + $0x100] sm:$0xff] }
  0x32   :  { %2246 = vmatmul.bf16.vlgmr.msra.gmra.mxu1 %v439_v2  ;;  %v209_v60 = vmul.f32 %v157_v25, %v6314_v30  ;;  %v4279_v9 = vadd.f32 2.0, %v4270_v28  ;;  %6121 = vrcp.f32 %v6626_v14  ;;  %v4281_v13 = vadd.f32 2.0, %v4272_v5  ;;  %2296 = vmatpush.bf16.msrb.mxu0 %v5765_v23  ;;  %v5770_v58 = vld [vmem:[%s7997_s1 + $0x140] sm:$0xff] }
  0x33   :  { %6123 = vpow2.f32 %v4264_v57  ;;  %v4265_v16 = vmul.f32 -1.442695, %v6630_v8  ;;  %v241_v20 = vmul.f32 1.75, %v4276_v7  ;;  %v4268_v22 = vclamps-f32 %v6309_v26, 6.571429  ;;  %2314 = vmatpush.bf16.msrb.mxu1 %v5773_v27  ;;  %v5772_v26 = vld [vmem:[%s7997_s1 + $0x150] sm:$0xff] }
  0x34   :  { %v440_v12 = vpack.c.bf16 %v209_v60, %v206_v10  ;;  %v6633_v15 = vpop.eup %6117  ;;  %v6647_v21 = vmul.f32 1.75, %v4281_v13  ;;  %v244_v36 = vmul.f32 1.75, %v4279_v9  ;;  %2332 = vmatpush.bf16.msrb.mxu2 %v5781_v35  ;;  %v4271_v18 = vclamps-f32 %v6314_v30, 6.571429 }
  0x35   :  { %v6639_v17 = vpop.eup %6119  ;;  %6125 = vpow2.f32 %v4265_v16  ;;  %v286_v33 = vadd.f32 %v241_v20, %v241_v20  ;;  %2350 = vmatpush.bf16.msrb.mxu3 %v5789_v31  ;;  %v250_v4 = vmul.f32 %v241_v20, %v241_v20  ;;  %v4277_v48 = vadd.f32 2.0, %v4268_v22  ;;  %v5809_v22 = vld [vmem:[%s7997_s1 + $0x278] sm:$0xff] }
  0x36   :  { %2264 = vmatmul.bf16.vlgmr.msra.gmra.mxu2 %v440_v12  ;;  %v441_v29 = vpack.c.bf16 %v6639_v17, %v6633_v15  ;;  %v255_v3 = vmul.f32 %v6647_v21, %v6647_v21  ;;  %v289_v44 = vadd.f32 %v244_v36, %v244_v36  ;;  %v170_v30 = vand.u32 2147483648, %v6626_v14  ;;  %2297 = vmatpush.bf16.msrb.mxu0 %v5764_v37 }
  0x37   :  { %2315 = vmatpush.bf16.msrb.mxu1 %v5772_v26  ;;  %v253_v55 = vmul.f32 %v244_v36, %v244_v36  ;;  %vm164_vm8 = vweird.f32 %v6626_v14  ;;  %v168_v41 = vand.u32 2147483647, %v6626_v14  ;;  %v296_v51 = vmul.f32 1.442695, %v286_v33  ;;  %v5816_v33 = vld [vmem:[%s7997_s1 + $0x2b0] sm:$0xff] }
  0x38   :  { %2282 = vmatmul.bf16.vlgmr.msra.gmra.mxu3 %v441_v29  ;;  %v6666_v38 = vpop.eup %6121  ;;  %v264_v34 = vsub.f32 0.0, %v255_v3  ;;  %2333 = vmatpush.bf16.msrb.mxu2 %v5780_v32  ;;  %v4280_v11 = vadd.f32 2.0, %v4271_v18  ;;  %v259_v0 = vsub.f32 0.0, %v250_v4  ;;  %v302_v49 = vmul.f32 1.442695, %v289_v44  ;;  %v5825_v32 = vld [vmem:[%s7997_s1 + $0x2f8] sm:$0xff] }
  0x39   :  { %v6124_v42 = vpop.eup %6123  ;;  %v160_v53 = vmul.f32 %v6666_v38, %v6626_v14  ;;  %vm165_vm9 = vweird.f32 %v6666_v38  ;;  %2351 = vmatpush.bf16.msrb.mxu3 %v5788_v39  ;;  %v171_v2 = vor.u32 1.1754944e-38, %v170_v30  ;;  %v262_v19 = vsub.f32 0.0, %v253_v55  ;;  %v5786_v14 = vld [vmem:[%s7997_s1 + $0x1c0] sm:$0xff]  ;;  %v5800_v18 = vld [vmem:[%s7997_s1 + $0x230] sm:$0xff] }
  0x3a   :  { %v6678_v54 = vadd.f32 1.0, %v6124_v42  ;;  %v279_v56 = vmul.f32 1.442695, %v264_v34  ;;  %vm6701_vm10 = vmor %vm164_vm8, %vm165_vm9  ;;  %2298 = vmatpush.bf16.msrb.mxu0 %v5763_v59  ;;  %vm169_vm11 = vcmp.eq.f32.partialorder %v168_v41, 8.507059e+37  ;;  %v4273_v10 = vclamps-f32 %v6378_v63, 6.571429 }
  0x3b   :  { %v6126_v61 = vpop.eup %6125  ;;  %v161_v40 = vsub.f32 1.0, %v160_v53  ;;  %2316 = vmatpush.bf16.msrb.mxu1 %v5771_v45  ;;  %v6714_v60 = vmul.f32 1.75, %v4277_v48  ;;  %v269_v5 = vmul.f32 1.442695, %v259_v0  ;;  %v6719_v7 = vmul.f32 1.75, %v4280_v11  ;;  %v5808_v44 = vld [vmem:[%s7997_s1 + $0x270] sm:$0xff] }
  0x3c   :  { %6127 = vrcp.f32 %v6678_v54  ;;  %v6694_v28 = vadd.f32 1.0, %v6126_v61  ;;  %2334 = vmatpush.bf16.msrb.mxu2 %v5779_v24  ;;  %v285_v12 = vadd.f32 %v6344_v46, %v6344_v46  ;;  %v288_v13 = vadd.f32 %v6346_v47, %v6346_v47  ;;  %v5817_v46 = vld [vmem:[%s7997_s1 + $0x2b8] sm:$0xff]  ;;  %v5824_v48 = vld [vmem:[%s7997_s1 + $0x2f0] sm:$0xff] }
  0x3d   :  { %v162_v50 = vmul.f32 %v6666_v38, %v161_v40  ;;  %6129 = vpow2.f32 %v279_v56  ;;  %2352 = vmatpush.bf16.msrb.mxu3 %v5787_v62  ;;  %v275_v35 = vmul.f32 1.442695, %v262_v19  ;;  %v185_v31 = vand.u32 2147483648, %v6678_v54  ;;  %v5801_v47 = vld [vmem:[%s7997_s1 + $0x238] sm:$0xff]  ;;  %v5799_v62 = vld [vmem:[%s7997_s1 + $0x228] sm:$0xff]  ;;  %v5796_v45 = vld [vmem:[%s7997_s1 + $0x210] sm:$0xff] }
  0x3e   :  { %6131 = vrcp.f32 %v6694_v28  ;;  %2299 = vmatpush.bf16.msrb.mxu0 %v5762_v6  ;;  %v4282_v36 = vadd.f32 2.0, %v4273_v10  ;;  %vm179_vm12 = vweird.f32 %v6678_v54  ;;  %v251_v29 = vmul.f32 %v6714_v60, %v6714_v60 }
  0x3f   :  { %v163_v25 = vadd.f32 %v6666_v38, %v162_v50  ;;  %6133 = vpow2.f32 %v296_v51  ;;  %2317 = vmatpush.bf16.msrb.mxu1 %v5770_v58  ;;  %v294_v39 = vmul.f32 1.442695, %v285_v12  ;;  %v6769_v42 = vmul.f32 %v6719_v7, %v6719_v7  ;;  %v5820_v51 = vld [vmem:[%s7997_s1 + $0x2d0] sm:$0xff] }
  0x40   :  { %6135 = vpow2.f32 %v302_v49  ;;  %2335 = vmatpush.bf16.msrb.mxu2 %v5778_v52  ;;  %v186_v30 = vor.u32 1.1754944e-38, %v185_v31  ;;  %v200_v56 = vand.u32 2147483648, %v6694_v28  ;;  %v247_v59 = vmul.f32 1.75, %v4282_v36  ;;  %v5807_v52 = vld [vmem:[%s7997_s1 + $0x268] sm:$0xff] }
  0x41   :  { %v167_v57 = vsel %vm6701_vm10, %v6666_v38, %v163_v25  ;;  %2353 = vmatpush.bf16.msrb.mxu3 %v5786_v14  ;;  %6137 = vpow2.f32 %v269_v5  ;;  %v183_v38 = vand.u32 2147483647, %v6678_v54  ;;  %vm194_vm15 = vweird.f32 %v6694_v28 }
  0x42   :  { %v6724_v9 = vpop.eup %6127  ;;  %v172_v16 = vsel %vm169_vm11, %v171_v2, %v167_v57  ;;  %2364 = vmatpush.bf16.msra.mxu0 %v5801_v47  ;;  %6139 = vpow2.f32 %v275_v35  ;;  %v198_v61 = vand.u32 2147483647, %v6694_v28  ;;  %v300_v40 = vmul.f32 1.442695, %v288_v13  ;;  %v5814_v35 = vld [vmem:[%s7997_s1 + $0x2a0] sm:$0xff] }
  0x43   :  { %v6730_v20 = vpop.eup %6129  ;;  %v210_v23 = vmul.f32 %v172_v16, %v6336_v43  ;;  %v175_v27 = vmul.f32 %v6724_v9, %v6678_v54  ;;  %vm180_vm13 = vweird.f32 %v6724_v9  ;;  %2382 = vmatpush.bf16.msra.mxu1 %v5809_v22  ;;  %vm6793_vm1 = vcmp.eq.f32.partialorder %v183_v38, 8.507059e+37  ;;  %v5815_v54 = vld [vmem:[%s7997_s1 + $0x2a8] sm:$0xff] }
  0x44   :  { %v468_v43 = vpack.c.bf16 %v6730_v20, %v6730_v20  ;;  %v6753_v3 = vpop.eup %6131  ;;  %2400 = vmatpush.bf16.msra.mxu2 %v5817_v46  ;;  %vm6785_vm14 = vmor %vm179_vm12, %vm180_vm13  ;;  %v260_v11 = vsub.f32 0.0, %v251_v29  ;;  %v4274_v50 = vclamps-f32 %v6630_v8, 6.571429  ;;  %v256_v2 = vmul.f32 %v247_v59, %v247_v59  ;;  %v5822_v29 = vld [vmem:[%s7997_s1 + $0x2e0] sm:$0xff] }
  0x45   :  { %v465_v37 = vpack.c.bf16 %v210_v23, %v210_v23  ;;  %v176_v26 = vsub.f32 1.0, %v175_v27  ;;  %v6763_v34 = vpop.eup %6133  ;;  %v190_v4 = vmul.f32 %v6753_v3, %v6694_v28  ;;  %2418 = vmatpush.bf16.msra.mxu3 %v5825_v32  ;;  %vm195_vm0 = vweird.f32 %v6753_v3  ;;  %v5798_v27 = vld [vmem:[%s7997_s1 + $0x220] sm:$0xff] }
  0x46   :  { %v6777_v53 = vpop.eup %6135  ;;  %2365 = vmatpush.bf16.msra.mxu0 %v5800_v18  ;;  %v292_v6 = vadd.f32 %v247_v59, %v247_v59  ;;  %vm6820_vm2 = vmor %vm194_vm15, %vm195_vm0  ;;  %v201_v25 = vor.u32 1.1754944e-38, %v200_v56  ;;  %v313_v10 = vmul.f32 0.36787945, %v6763_v34  ;;  %vm6829_vm3 = vcmp.eq.f32.partialorder %v198_v61, 8.507059e+37  ;;  %v5812_v56 = vld [vmem:[%s7997_s1 + $0x290] sm:$0xff] }
  0x47   :  { %2233 = vmatmul.bf16.gmra.mxu0 %v465_v37  ;;  %v177_v24 = vmul.f32 %v6724_v9, %v176_v26  ;;  %v191_v55 = vsub.f32 1.0, %v190_v4  ;;  %v6803_v0 = vpop.eup %6137  ;;  %2383 = vmatpush.bf16.msra.mxu1 %v5808_v44  ;;  %v316_v14 = vmul.f32 0.36787945, %v6777_v53  ;;  %v263_v28 = vsub.f32 0.0, %v6769_v42  ;;  %v5797_v4 = vld [vmem:[%s7997_s1 + $0x218] sm:$0xff] }
  0x48   :  { %2287 = vmatmul.bf16.gmra.mxu3 %v468_v43  ;;  %2401 = vmatpush.bf16.msra.mxu2 %v5816_v33  ;;  %v6140_v5 = vpop.eup %6139  ;;  %6141 = vpow2.f32 %v294_v39  ;;  %v271_v16 = vmul.f32 1.442695, %v260_v11  ;;  %v265_v31 = vsub.f32 0.0, %v256_v2  ;;  %v308_v36 = vmul.f32 1.442695, %v292_v6  ;;  %v5805_v42 = vld [vmem:[%s7997_s1 + $0x258] sm:$0xff] }
  0x49   :  { %v178_v41 = vadd.f32 %v6724_v9, %v177_v24  ;;  %v192_v49 = vmul.f32 %v6753_v3, %v191_v55  ;;  %2419 = vmatpush.bf16.msra.mxu3 %v5824_v48  ;;  %6143 = vpow2.f32 %v300_v40  ;;  %v6850_v22 = vmul.f32 %v6803_v0, %v313_v10  ;;  %v5821_v24 = vld [vmem:[%s7997_s1 + $0x2d8] sm:$0xff]  ;;  %v5804_v55 = vld [vmem:[%s7997_s1 + $0x250] sm:$0xff] }
  0x4a   :  { %2366 = vmatpush.bf16.msra.mxu0 %v5799_v62  ;;  %v6852_v43 = vmul.f32 %v6140_v5, %v316_v14  ;;  %v277_v37 = vmul.f32 1.442695, %v263_v28  ;;  %v281_v38 = vmul.f32 1.442695, %v265_v31  ;;  %6145 = vpow2.f32 %v308_v36  ;;  %v5810_v14 = vld [vmem:[%s7997_s1 + $0x280] sm:$0xff]  ;;  %v5857_v31 = vld [vmem:[%s7997_s1 + $0x3f8] sm:$0xff] }
  0x4b   :  { %v182_v58 = vsel %vm6785_vm14, %v6724_v9, %v178_v41  ;;  %v193_v12 = vadd.f32 %v6753_v3, %v192_v49  ;;  %2384 = vmatpush.bf16.msra.mxu1 %v5807_v52  ;;  %v442_v18 = vpack.c.bf16 %v6140_v5, %v6803_v0  ;;  %6147 = vpow2.f32 %v271_v16  ;;  %v5795_v49 = vld [vmem:[%s7997_s1 + $0x208] sm:$0xff]  ;;  %v5818_v9 = vld [vmem:[%s7997_s1 + $0x2c0] sm:$0xff] }
  0x4c   :  { %v187_v57 = vsel %vm6793_vm1, %v186_v30, %v182_v58  ;;  %2402 = vmatpush.bf16.msra.mxu2 %v5815_v54  ;;  %v445_v39 = vpack.c.bf16 %v6852_v43, %v6850_v22  ;;  %6149 = vpow2.f32 %v277_v37  ;;  %v287_v30 = vadd.f32 %v6714_v60, %v6714_v60 }
  0x4d   :  { %v211_v13 = vmul.f32 %v187_v57, %v6378_v63  ;;  %v197_v23 = vsel %vm6820_vm2, %v6753_v3, %v193_v12  ;;  %2420 = vmatpush.bf16.msra.mxu3 %v5823_v1  ;;  %v5806_v63 = vld [vmem:[%s7997_s1 + $0x260] sm:$0xff]  ;;  %v4283_v3 = vadd.f32 2.0, %v4274_v50  ;;  %v290_v59 = vadd.f32 %v6719_v7, %v6719_v7  ;;  %v5803_v50 = vld [vmem:[%s7997_s1 + $0x248] sm:$0xff] }
  0x4e   :  { %v202_v47 = vsel %vm6829_vm3, %v201_v25, %v197_v23  ;;  %2367 = vmatpush.bf16.msra.mxu0 %v5798_v27  ;;  %v6858_v33 = vpop.eup %6141  ;;  %6151 = vpow2.f32 %v281_v38  ;;  %v291_v60 = vadd.f32 %v6647_v21, %v6647_v21  ;;  %v298_v54 = vmul.f32 1.442695, %v287_v30  ;;  %v5811_v21 = vld [vmem:[%s7997_s1 + $0x288] sm:$0xff]  ;;  %v5833_v23 = vld [vmem:[%s7997_s1 + $0x338] sm:$0xff] }
  0x4f   :  { %v466_v46 = vpack.c.bf16 %v211_v13, %v211_v13  ;;  %v212_v32 = vmul.f32 %v202_v47, %v6630_v8  ;;  %2385 = vmatpush.bf16.msra.mxu1 %v5806_v63  ;;  %v5813_v8 = vld [vmem:[%s7997_s1 + $0x298] sm:$0xff]  ;;  %v6872_v44 = vpop.eup %6143  ;;  %v6874_v48 = vmul.f32 1.75, %v4283_v3  ;;  %v312_v7 = vmul.f32 0.36787945, %v6858_v33  ;;  %v5819_v25 = vld [vmem:[%s7997_s1 + $0x2c8] sm:$0xff]  ;;  %v5832_v47 = vld [vmem:[%s7997_s1 + $0x330] sm:$0xff] }
  0x50   :  { %2403 = vmatpush.bf16.msra.mxu2 %v5814_v35  ;;  %v6894_v61 = vpop.eup %6145  ;;  %v315_v40 = vmul.f32 0.36787945, %v6872_v44  ;;  %v304_v0 = vmul.f32 1.442695, %v290_v59  ;;  %v306_v52 = vmul.f32 1.442695, %v291_v60  ;;  %6153 = vpow2.f32 %v298_v54 }
  0x51   :  { %2251 = vmatmul.bf16.gmra.mxu1 %v466_v46  ;;  %v467_v26 = vpack.c.bf16 %v212_v32, %v212_v32  ;;  %2421 = vmatpush.bf16.msra.mxu3 %v5822_v29  ;;  %v257_v41 = vmul.f32 %v6874_v48, %v6874_v48  ;;  %v6903_v11 = vpop.eup %6147  ;;  %v319_v1 = vmul.f32 0.36787945, %v6894_v61  ;;  %v6918_v6 = vmul.f32 %v6633_v15, %v312_v7  ;;  %v5794_v15 = vld [vmem:[%s7997_s1 + $0x200] sm:$0xff]  ;;  %v5849_v35 = vld [vmem:[%s7997_s1 + $0x3b8] sm:$0xff]  ;;  %v5848_v46 = vld [vmem:[%s7997_s1 + $0x3b0] sm:$0xff] }
  0x52   :  { %2368 = vmatpush.bf16.msra.mxu0 %v5797_v4  ;;  %v6908_v62 = vpop.eup %6149  ;;  %v6921_v58 = vmul.f32 %v6639_v17, %v315_v40  ;;  %6155 = vpow2.f32 %v304_v0  ;;  %v5802_v17 = vld [vmem:[%s7997_s1 + $0x240] sm:$0xff]  ;;  %v5841_v27 = vld [vmem:[%s7997_s1 + $0x378] sm:$0xff]  ;;  %v293_v29 = vadd.f32 %v6874_v48, %v6874_v48  ;;  %v5840_v32 = vld [vmem:[%s7997_s1 + $0x370] sm:$0xff]  ;;  %vm2706_vm4 = vcmask 523264  }
  0x53   :  { %2269 = vmatmul.bf16.gmra.mxu2 %v467_v26  ;;  %2386 = vmatpush.bf16.msra.mxu1 %v5805_v42  ;;  %v266_v19 = vsub.f32 0.0, %v257_v41  ;;  %v443_v10 = vpack.c.bf16 %v6908_v62, %v6903_v11  ;;  %6157 = vpow2.f32 %v306_v52  ;;  %v5856_v3 = vld [vmem:[%s7997_s1 + $0x3f0] sm:$0xff]  ;;  %v5839_v42 = vld [vmem:[%s7997_s1 + $0x368] sm:$0xff]  ;;  %v5846_v60 = vld [vmem:[%s7997_s1 + $0x3a0] sm:$0xff]  ;;  %vm2708_vm5 = vcmask 516096  }
  0x54   :  { %2404 = vmatpush.bf16.msra.mxu2 %v5813_v8  ;;  %v6152_v2 = vpop.eup %6151  ;;  %v444_v57 = vpack.c.bf16 %v6921_v58, %v6918_v6  ;;  %v310_v4 = vmul.f32 1.442695, %v293_v29  ;;  %v5855_v48 = vld [vmem:[%s7997_s1 + $0x3e8] sm:$0xff]  ;;  %v5830_v7 = vld [vmem:[%s7997_s1 + $0x320] sm:$0xff]  ;;  %v5829_v0 = vld [vmem:[%s7997_s1 + $0x318] sm:$0xff]  ;;  %vm2717_vm6 = vcmask 523265  }
  0x55   :  { %2422 = vmatpush.bf16.msra.mxu3 %v5821_v24  ;;  %v6937_v5 = vmul.f32 %v6152_v2, %v319_v1  ;;  %v283_v12 = vmul.f32 1.442695, %v266_v19  ;;  %v469_v13 = vpack.c.bf16 %v6152_v2, %v6152_v2  ;;  %v5838_v40 = vld [vmem:[%s7997_s1 + $0x360] sm:$0xff]  ;;  %v5853_v52 = vld [vmem:[%s7997_s1 + $0x3d8] sm:$0xff]  ;;  %v330_v1 = vmul.f32 0.049787067, %v6858_v33 }
  0x56   :  { %2369 = vmatpush.bf16.msra.mxu0 %v5796_v45  ;;  %v6944_v28 = vpop.eup %6153  ;;  %v333_v2 = vmul.f32 0.049787067, %v6872_v44  ;;  %v5844_v19 = vld [vmem:[%s7997_s1 + $0x390] sm:$0xff]  ;;  %vm2719_vm7 = vcmask 517120   ;;  %vm2728_vm8 = vcmask 1040384   ;;  %vm3478_vm13 = vcmask 261120  }
  0x57   :  { %2300 = vmatmul.bf16.vlgmr.msrb.gmra.mxu0 %v442_v18  ;;  %2387 = vmatpush.bf16.msra.mxu1 %v5804_v55  ;;  %v472_v16 = vpack.c.bf16 %v6937_v5, %v6937_v5  ;;  %6159 = vpow2.f32 %v283_v12  ;;  %v314_v37 = vmul.f32 0.36787945, %v6944_v28  ;;  %v5847_v18 = vld [vmem:[%s7997_s1 + $0x3a8] sm:$0xff]  ;;  %v339_v12 = vmul.f32 %v330_v1, %v6918_v6  ;;  %v5862_v1 = vld [vmem:[%s7997_s1 + $0x420] sm:$0xff] }
  0x58   :  { %2354 = vmatmul.bf16.vlgmr.msrb.gmra.mxu3 %v445_v39  ;;  %2405 = vmatpush.bf16.msra.mxu2 %v5812_v56  ;;  %v6957_v63 = vpop.eup %6155  ;;  %v5831_v39 = vld [vmem:[%s7997_s1 + $0x328] sm:$0xff]  ;;  %v332_v56 = vmul.f32 0.049787067, %v6944_v28  ;;  %6161 = vpow2.f32 %v310_v4  ;;  %vm4227_vm2 = vcmask 74752  }
  0x59   :  { %2423 = vmatpush.bf16.msra.mxu3 %v5820_v51  ;;  %v6962_v36 = vpop.eup %6157  ;;  %v317_v26 = vmul.f32 0.36787945, %v6957_v63  ;;  %v323_v24 = vmul.f32 %v6903_v11, %v314_v37  ;;  %v335_v59 = vmul.f32 0.049787067, %v6957_v63  ;;  %v5854_v51 = vld [vmem:[%s7997_s1 + $0x3e0] sm:$0xff] }
  0x5a   :  { %2370 = vmatpush.bf16.msra.mxu0 %v5795_v49  ;;  %v318_v38 = vmul.f32 0.36787945, %v6962_v36  ;;  %v5837_v49 = vld [vmem:[%s7997_s1 + $0x358] sm:$0xff]  ;;  %v336_v4 = vmul.f32 0.049787067, %v6962_v36 }
  0x5b   :  { %2388 = vmatpush.bf16.msra.mxu1 %v5803_v50  ;;  %v326_v30 = vmul.f32 %v6908_v62, %v317_v26  ;;  %v5845_v62 = vld [vmem:[%s7997_s1 + $0x398] sm:$0xff] }
  0x5c   :  { %2406 = vmatpush.bf16.msra.mxu2 %v5811_v21  ;;  %v6998_v45 = vmul.f32 %v6730_v20, %v318_v38  ;;  %v7009_v20 = vmul.f32 %v332_v56, %v323_v24  ;;  %v5881_v38 = vld [vmem:[%s7997_s1 + $0x4b8] sm:$0xff]  ;;  %v348_v56 = vmul.f32 0.006737947, %v6858_v33 }
  0x5d   :  { %2424 = vmatpush.bf16.msra.mxu3 %v5819_v25  ;;  %v6160_v8 = vpop.eup %6159  ;;  %v7011_v41 = vmul.f32 %v335_v59, %v326_v30  ;;  %v446_v54 = vpack.c.bf16 %v326_v30, %v323_v24  ;;  %v5828_v25 = vld [vmem:[%s7997_s1 + $0x310] sm:$0xff]  ;;  %v351_v59 = vmul.f32 0.006737947, %v6872_v44 }
  0x5e   :  { %2371 = vmatpush.bf16.msra.mxu0 %v5794_v15  ;;  %v470_v55 = vpack.c.bf16 %v6160_v8, %v6160_v8  ;;  %v471_v11 = vpack.c.bf16 %v6998_v45, %v6998_v45  ;;  %v7029_v50 = vpop.eup %6161  ;;  %v331_v15 = vmul.f32 0.049787067, %v6763_v34  ;;  %v5872_v24 = vld [vmem:[%s7997_s1 + $0x470] sm:$0xff] }
  0x5f   :  { %2389 = vmatpush.bf16.msra.mxu1 %v5802_v17  ;;  %v449_v21 = vpack.c.bf16 %v7011_v41, %v7009_v20  ;;  %v334_v17 = vmul.f32 0.049787067, %v6777_v53  ;;  %v338_v6 = vmul.f32 0.049787067, %v7029_v50  ;;  %v5888_v30 = vld [vmem:[%s7997_s1 + $0x4f0] sm:$0xff] }
  0x60   :  { %2407 = vmatpush.bf16.msra.mxu2 %v5810_v14  ;;  %v320_v14 = vmul.f32 0.36787945, %v7029_v50 }
  0x61   :  { %2318 = vmatmul.bf16.vlgmr.msrb.gmra.mxu1 %v443_v10  ;;  %2425 = vmatpush.bf16.msra.mxu3 %v5818_v9  ;;  %v5836_v10 = vld [vmem:[%s7997_s1 + $0x350] sm:$0xff]  ;;  %v342_v9 = vmul.f32 %v333_v2, %v6921_v58  ;;  %v7064_v58 = vmul.f32 %v331_v15, %v6850_v22  ;;  %v5826_v22 = vld [vmem:[%s7997_s1 + $0x300] sm:$0xff] }
  0x62   :  { %2436 = vmatpush.bf16.msrb.mxu0 %v5833_v23  ;;  %v329_v23 = vmul.f32 %v6160_v8, %v320_v14  ;;  %v5889_v8 = vld [vmem:[%s7997_s1 + $0x4f8] sm:$0xff]  ;;  %v5870_v2 = vld [vmem:[%s7997_s1 + $0x460] sm:$0xff] }
  0x63   :  { %2336 = vmatmul.bf16.vlgmr.msrb.gmra.mxu2 %v444_v57  ;;  %2454 = vmatpush.bf16.msrb.mxu1 %v5841_v27  ;;  %v5852_v57 = vld [vmem:[%s7997_s1 + $0x3d0] sm:$0xff]  ;;  %v7067_v27 = vmul.f32 %v334_v17, %v6852_v43  ;;  %v5834_v43 = vld [vmem:[%s7997_s1 + $0x340] sm:$0xff]  ;;  %v5877_v17 = vld [vmem:[%s7997_s1 + $0x498] sm:$0xff] }
  0x64   :  { %2472 = vmatpush.bf16.msrb.mxu2 %v5849_v35  ;;  %v5835_v35 = vld [vmem:[%s7997_s1 + $0x348] sm:$0xff]  ;;  %v7081_v29 = vmul.f32 %v338_v6, %v329_v23  ;;  %v473_v37 = vpack.c.bf16 %v329_v23, %v329_v23  ;;  %v5860_v23 = vld [vmem:[%s7997_s1 + $0x410] sm:$0xff] }
  0x65   :  { %2490 = vmatpush.bf16.msrb.mxu3 %v5857_v31  ;;  %v5851_v31 = vld [vmem:[%s7997_s1 + $0x3c8] sm:$0xff]  ;;  %v5868_v6 = vld [vmem:[%s7997_s1 + $0x450] sm:$0xff] }
  0x66   :  { %2437 = vmatpush.bf16.msrb.mxu0 %v5832_v47  ;;  %v5842_v47 = vld [vmem:[%s7997_s1 + $0x380] sm:$0xff]  ;;  %v476_v26 = vpack.c.bf16 %v7081_v29, %v7081_v29 }
  0x67   :  { %2305 = vmatmul.bf16.gmra.mxu0 %v469_v13  ;;  %2455 = vmatpush.bf16.msrb.mxu1 %v5840_v32  ;;  %v5843_v13 = vld [vmem:[%s7997_s1 + $0x388] sm:$0xff]  ;;  %v448_v32 = vpack.c.bf16 %v7067_v27, %v7064_v58 }
  0x68   :  { %2359 = vmatmul.bf16.gmra.mxu3 %v472_v16  ;;  %2473 = vmatpush.bf16.msrb.mxu2 %v5848_v46  ;;  %v5827_v16 = vld [vmem:[%s7997_s1 + $0x308] sm:$0xff]  ;;  %v447_v46 = vpack.c.bf16 %v342_v9, %v339_v12 }
  0x69   :  { %2491 = vmatpush.bf16.msrb.mxu3 %v5856_v3  ;;  %v5850_v3 = vld [vmem:[%s7997_s1 + $0x3c0] sm:$0xff] }
  0x6a   :  { %2438 = vmatpush.bf16.msrb.mxu0 %v5831_v39  ;;  %v5873_v39 = vld [vmem:[%s7997_s1 + $0x478] sm:$0xff] }
  0x6b   :  { %2456 = vmatpush.bf16.msrb.mxu1 %v5839_v42  ;;  %v5880_v42 = vld [vmem:[%s7997_s1 + $0x4b0] sm:$0xff] }
  0x6c   :  { %2474 = vmatpush.bf16.msrb.mxu2 %v5847_v18  ;;  %v5865_v18 = vld [vmem:[%s7997_s1 + $0x438] sm:$0xff] }
  0x6d   :  { %2492 = vmatpush.bf16.msrb.mxu3 %v5855_v48  ;;  %v5864_v48 = vld [vmem:[%s7997_s1 + $0x430] sm:$0xff] }
  0x6e   :  { %2439 = vmatpush.bf16.msrb.mxu0 %v5830_v7  ;;  %v5879_v7 = vld [vmem:[%s7997_s1 + $0x4a8] sm:$0xff] }
  0x6f   :  { %2457 = vmatpush.bf16.msrb.mxu1 %v5838_v40  ;;  %v5863_v40 = vld [vmem:[%s7997_s1 + $0x428] sm:$0xff] }
  0x70   :  { %2475 = vmatpush.bf16.msrb.mxu2 %v5846_v60  ;;  %v345_v60 = vmul.f32 %v336_v4, %v6998_v45  ;;  %v5887_v45 = vld [vmem:[%s7997_s1 + $0x4e8] sm:$0xff]  ;;  %v5874_v4 = vld [vmem:[%s7997_s1 + $0x480] sm:$0xff] }
  0x71   :  { %2323 = vmatmul.bf16.gmra.mxu1 %v470_v55  ;;  %2493 = vmatpush.bf16.msrb.mxu3 %v5854_v51  ;;  %v337_v55 = vmul.f32 0.049787067, %v6894_v61  ;;  %v5871_v51 = vld [vmem:[%s7997_s1 + $0x468] sm:$0xff] }
  0x72   :  { %2440 = vmatpush.bf16.msrb.mxu0 %v5829_v0 }
  0x73   :  { %2341 = vmatmul.bf16.gmra.mxu2 %v471_v11  ;;  %2458 = vmatpush.bf16.msrb.mxu1 %v5837_v49  ;;  %v357_v11 = vmul.f32 %v348_v56, %v339_v12  ;;  %v7134_v0 = vmul.f32 %v337_v55, %v6937_v5  ;;  %v474_v49 = vpack.c.bf16 %v345_v60, %v345_v60  ;;  %v5869_v12 = vld [vmem:[%s7997_s1 + $0x458] sm:$0xff] }
  0x74   :  { %2476 = vmatpush.bf16.msrb.mxu2 %v5845_v62  ;;  %v369_v62 = vmul.f32 0.000911882, %v6872_v44  ;;  %v5897_v55 = vld [vmem:[%s7997_s1 + $0x538] sm:$0xff] }
  0x75   :  { %2494 = vmatpush.bf16.msrb.mxu3 %v5853_v52  ;;  %v5878_v52 = vld [vmem:[%s7997_s1 + $0x4a0] sm:$0xff] }
  0x76   :  { %2441 = vmatpush.bf16.msrb.mxu0 %v5828_v25  ;;  %v5886_v25 = vld [vmem:[%s7997_s1 + $0x4e0] sm:$0xff] }
  0x77   :  { %2372 = vmatmul.bf16.vlgmr.msra.gmra.mxu0 %v446_v54  ;;  %2459 = vmatpush.bf16.msrb.mxu1 %v5836_v10  ;;  %v360_v54 = vmul.f32 %v351_v59, %v342_v9  ;;  %v475_v10 = vpack.c.bf16 %v7134_v0, %v7134_v0  ;;  %v5885_v9 = vld [vmem:[%s7997_s1 + $0x4d8] sm:$0xff] }
  0x78   :  { %2426 = vmatmul.bf16.vlgmr.msra.gmra.mxu3 %v449_v21  ;;  %2477 = vmatpush.bf16.msrb.mxu2 %v5844_v19  ;;  %v366_v21 = vmul.f32 0.000911882, %v6858_v33  ;;  %v5913_v59 = vld [vmem:[%s7997_s1 + $0x5b8] sm:$0xff] }
  0x79   :  { %2495 = vmatpush.bf16.msrb.mxu3 %v5852_v57  ;;  %v7147_v5 = vmul.f32 %v369_v62, %v360_v54  ;;  %v450_v14 = vpack.c.bf16 %v360_v54, %v357_v11  ;;  %v5861_v57 = vld [vmem:[%s7997_s1 + $0x418] sm:$0xff]  ;;  %v5920_v54 = vld [vmem:[%s7997_s1 + $0x5f0] sm:$0xff]  ;;  %v370_v62 = vmul.f32 0.000911882, %v6777_v53 }
  0x7a   :  { %2442 = vmatpush.bf16.msrb.mxu0 %v5827_v16  ;;  %v7145_v19 = vmul.f32 %v366_v21, %v357_v11  ;;  %v352_v16 = vmul.f32 0.006737947, %v6777_v53  ;;  %v5904_v11 = vld [vmem:[%s7997_s1 + $0x570] sm:$0xff]  ;;  %v367_v21 = vmul.f32 0.000911882, %v6763_v34 }
  0x7b   :  { %2460 = vmatpush.bf16.msrb.mxu1 %v5835_v35  ;;  %v5876_v35 = vld [vmem:[%s7997_s1 + $0x490] sm:$0xff] }
  0x7c   :  { %2478 = vmatpush.bf16.msrb.mxu2 %v5843_v13  ;;  %v453_v15 = vpack.c.bf16 %v7147_v5, %v7145_v19  ;;  %v349_v13 = vmul.f32 0.006737947, %v6763_v34 }
  0x7d   :  { %2496 = vmatpush.bf16.msrb.mxu3 %v5851_v31  ;;  %v354_v31 = vmul.f32 0.006737947, %v6962_v36 }
  0x7e   :  { %2443 = vmatpush.bf16.msrb.mxu0 %v5826_v22  ;;  %v5884_v22 = vld [vmem:[%s7997_s1 + $0x4d0] sm:$0xff] }
  0x7f   :  { %2461 = vmatpush.bf16.msrb.mxu1 %v5834_v43  ;;  %v358_v43 = vmul.f32 %v349_v13, %v7064_v58  ;;  %v372_v58 = vmul.f32 0.000911882, %v6962_v36 }
  0x80   :  { %2479 = vmatpush.bf16.msrb.mxu2 %v5842_v47  ;;  %v353_v47 = vmul.f32 0.006737947, %v6957_v63 }
  0x81   :  { %2390 = vmatmul.bf16.vlgmr.msra.gmra.mxu1 %v447_v46  ;;  %2497 = vmatpush.bf16.msrb.mxu3 %v5850_v3  ;;  %v350_v46 = vmul.f32 0.006737947, %v6944_v28  ;;  %v5875_v3 = vld [vmem:[%s7997_s1 + $0x488] sm:$0xff] }
  0x82   :  { %2508 = vmatpush.bf16.msra.mxu0 %v5865_v18  ;;  %v7201_v18 = vmul.f32 %v353_v47, %v7011_v41  ;;  %v5866_v41 = vld [vmem:[%s7997_s1 + $0x440] sm:$0xff] }
  0x83   :  { %2408 = vmatmul.bf16.vlgmr.msra.gmra.mxu2 %v448_v32  ;;  %2526 = vmatpush.bf16.msra.mxu1 %v5873_v39  ;;  %v361_v32 = vmul.f32 %v352_v16, %v7067_v27  ;;  %v7198_v27 = vmul.f32 %v350_v46, %v7009_v20  ;;  %v5883_v39 = vld [vmem:[%s7997_s1 + $0x4c8] sm:$0xff]  ;;  %v5858_v20 = vld [vmem:[%s7997_s1 + $0x400] sm:$0xff] }
  0x84   :  { %2544 = vmatpush.bf16.msra.mxu2 %v5881_v38  ;;  %v363_v38 = vmul.f32 %v354_v31, %v345_v60  ;;  %v5905_v60 = vld [vmem:[%s7997_s1 + $0x578] sm:$0xff]  ;;  %v5902_v31 = vld [vmem:[%s7997_s1 + $0x560] sm:$0xff] }
  0x85   :  { %2562 = vmatpush.bf16.msra.mxu3 %v5889_v8  ;;  %v451_v8 = vpack.c.bf16 %v361_v32, %v358_v43  ;;  %v5918_v46 = vld [vmem:[%s7997_s1 + $0x5e0] sm:$0xff] }
  0x86   :  { %2509 = vmatpush.bf16.msra.mxu0 %v5864_v48  ;;  %v452_v48 = vpack.c.bf16 %v7201_v18, %v7198_v27 }
  0x87   :  { %2377 = vmatmul.bf16.gmra.mxu0 %v473_v37  ;;  %2527 = vmatpush.bf16.msra.mxu1 %v5872_v24  ;;  %v5859_v37 = vld [vmem:[%s7997_s1 + $0x408] sm:$0xff]  ;;  %v5882_v24 = vld [vmem:[%s7997_s1 + $0x4c0] sm:$0xff] }
  0x88   :  { %2431 = vmatmul.bf16.gmra.mxu3 %v476_v26  ;;  %2545 = vmatpush.bf16.msra.mxu2 %v5880_v42  ;;  %v5867_v26 = vld [vmem:[%s7997_s1 + $0x448] sm:$0xff]  ;;  %v7215_v42 = vmul.f32 %v372_v58, %v363_v38  ;;  %v5917_v58 = vld [vmem:[%s7997_s1 + $0x5d8] sm:$0xff] }
  0x89   :  { %2563 = vmatpush.bf16.msra.mxu3 %v5888_v30  ;;  %v477_v30 = vpack.c.bf16 %v363_v38, %v363_v38  ;;  %v371_v38 = vmul.f32 0.000911882, %v6957_v63 }
  0x8a   :  { %2510 = vmatpush.bf16.msra.mxu0 %v5863_v40  ;;  %v480_v56 = vpack.c.bf16 %v7215_v42, %v7215_v42  ;;  %v355_v40 = vmul.f32 0.006737947, %v6894_v61 }
  0x8b   :  { %2528 = vmatpush.bf16.msra.mxu1 %v5871_v51  ;;  %v5912_v51 = vld [vmem:[%s7997_s1 + $0x5b0] sm:$0xff] }
  0x8c   :  { %2546 = vmatpush.bf16.msra.mxu2 %v5879_v7  ;;  %v5921_v7 = vld [vmem:[%s7997_s1 + $0x5f8] sm:$0xff] }
  0x8d   :  { %2564 = vmatpush.bf16.msra.mxu3 %v5887_v45  ;;  %v5896_v45 = vld [vmem:[%s7997_s1 + $0x530] sm:$0xff] }
  0x8e   :  { %2511 = vmatpush.bf16.msra.mxu0 %v5862_v1  ;;  %v5911_v1 = vld [vmem:[%s7997_s1 + $0x5a8] sm:$0xff] }
  0x8f   :  { %2529 = vmatpush.bf16.msra.mxu1 %v5870_v2  ;;  %v5895_v2 = vld [vmem:[%s7997_s1 + $0x528] sm:$0xff] }
  0x90   :  { %2547 = vmatpush.bf16.msra.mxu2 %v5878_v52  ;;  %v7253_v52 = vmul.f32 %v355_v40, %v7134_v0  ;;  %v5919_v0 = vld [vmem:[%s7997_s1 + $0x5e8] sm:$0xff] }
  0x91   :  { %2395 = vmatmul.bf16.gmra.mxu1 %v474_v49  ;;  %2565 = vmatpush.bf16.msra.mxu3 %v5886_v25  ;;  %v356_v49 = vmul.f32 0.006737947, %v7029_v50  ;;  %v5903_v25 = vld [vmem:[%s7997_s1 + $0x568] sm:$0xff] }
  0x92   :  { %2512 = vmatpush.bf16.msra.mxu0 %v5861_v57  ;;  %v478_v13 = vpack.c.bf16 %v7253_v52, %v7253_v52  ;;  %v5907_v40 = vld [vmem:[%s7997_s1 + $0x588] sm:$0xff] }
  0x93   :  { %2413 = vmatmul.bf16.gmra.mxu2 %v475_v10  ;;  %2530 = vmatpush.bf16.msra.mxu1 %v5869_v12  ;;  %v376_v10 = vmul.f32 %v367_v21, %v358_v43  ;;  %v7270_v57 = vmul.f32 %v356_v49, %v7081_v29  ;;  %v5894_v29 = vld [vmem:[%s7997_s1 + $0x520] sm:$0xff]  ;;  %v5915_v49 = vld [vmem:[%s7997_s1 + $0x5c8] sm:$0xff] }
  0x94   :  { %2548 = vmatpush.bf16.msra.mxu2 %v5877_v17  ;;  %v388_v17 = vmul.f32 0.0001234098, %v6777_v53 }
  0x95   :  { %2566 = vmatpush.bf16.msra.mxu3 %v5885_v9  ;;  %v479_v47 = vpack.c.bf16 %v7270_v57, %v7270_v57 }
  0x96   :  { %2513 = vmatpush.bf16.msra.mxu0 %v5860_v23 }
  0x97   :  { %2444 = vmatmul.bf16.vlgmr.msrb.gmra.mxu0 %v450_v14  ;;  %2531 = vmatpush.bf16.msra.mxu1 %v5868_v6  ;;  %v379_v14 = vmul.f32 %v370_v62, %v361_v32  ;;  %v5909_v32 = vld [vmem:[%s7997_s1 + $0x598] sm:$0xff] }
  0x98   :  { %2498 = vmatmul.bf16.vlgmr.msrb.gmra.mxu3 %v453_v15  ;;  %2549 = vmatpush.bf16.msra.mxu2 %v5876_v35  ;;  %v385_v15 = vmul.f32 0.0001234098, %v6763_v34  ;;  %v5910_v35 = vld [vmem:[%s7997_s1 + $0x5a0] sm:$0xff] }
  0x99   :  { %2567 = vmatpush.bf16.msra.mxu3 %v5884_v22  ;;  %v7279_v6 = vmul.f32 %v388_v17, %v379_v14  ;;  %v454_v22 = vpack.c.bf16 %v379_v14, %v376_v10  ;;  %v5929_v17 = vld [vmem:[%s7997_s1 + $0x638] sm:$0xff] }
  0x9a   :  { %2514 = vmatpush.bf16.msra.mxu0 %v5859_v37  ;;  %v7277_v23 = vmul.f32 %v385_v15, %v376_v10  ;;  %v5901_v37 = vld [vmem:[%s7997_s1 + $0x558] sm:$0xff] }
  0x9b   :  { %2532 = vmatpush.bf16.msra.mxu1 %v5867_v26  ;;  %v368_v26 = vmul.f32 0.000911882, %v6944_v28  ;;  %v5945_v15 = vld [vmem:[%s7997_s1 + $0x6b8] sm:$0xff] }
  0x9c   :  { %2550 = vmatpush.bf16.msra.mxu2 %v5875_v3  ;;  %v457_v43 = vpack.c.bf16 %v7279_v6, %v7277_v23  ;;  %v5893_v3 = vld [vmem:[%s7997_s1 + $0x518] sm:$0xff] }
  0x9d   :  { %2568 = vmatpush.bf16.msra.mxu3 %v5883_v39 }
  0x9e   :  { %2515 = vmatpush.bf16.msra.mxu0 %v5858_v20  ;;  %v5908_v20 = vld [vmem:[%s7997_s1 + $0x590] sm:$0xff] }
  0x9f   :  { %2533 = vmatpush.bf16.msra.mxu1 %v5866_v41  ;;  %v5892_v41 = vld [vmem:[%s7997_s1 + $0x510] sm:$0xff] }
  0xa0   :  { %2551 = vmatpush.bf16.msra.mxu2 %v5874_v4  ;;  %v373_v4 = vmul.f32 0.000911882, %v6894_v61 }
  0xa1   :  { %2462 = vmatmul.bf16.vlgmr.msrb.gmra.mxu1 %v451_v8  ;;  %2569 = vmatpush.bf16.msra.mxu3 %v5882_v24  ;;  %v384_v24 = vmul.f32 0.0001234098, %v6858_v33 }
  0xa2   :  { %2580 = vmatpush.bf16.msrb.mxu0 %v5897_v55  ;;  %v5916_v55 = vld [vmem:[%s7997_s1 + $0x5d0] sm:$0xff] }
  0xa3   :  { %2480 = vmatmul.bf16.vlgmr.msrb.gmra.mxu2 %v452_v48  ;;  %2598 = vmatpush.bf16.msrb.mxu1 %v5905_v60  ;;  %v5900_v48 = vld [vmem:[%s7997_s1 + $0x550] sm:$0xff] }
  0xa4   :  { %2616 = vmatpush.bf16.msrb.mxu2 %v5913_v59  ;;  %v7324_v59 = vmul.f32 %v371_v38, %v7201_v18  ;;  %v5899_v18 = vld [vmem:[%s7997_s1 + $0x548] sm:$0xff] }
  0xa5   :  { %2634 = vmatpush.bf16.msrb.mxu3 %v5921_v7 }
  0xa6   :  { %2581 = vmatpush.bf16.msrb.mxu0 %v5896_v45  ;;  %v382_v45 = vmul.f32 %v373_v4, %v7253_v52 }
  0xa7   :  { %2449 = vmatmul.bf16.gmra.mxu0 %v477_v30  ;;  %2599 = vmatpush.bf16.msrb.mxu1 %v5904_v11  ;;  %v387_v30 = vmul.f32 0.0001234098, %v6872_v44  ;;  %v391_v11 = vmul.f32 0.0001234098, %v6894_v61 }
  0xa8   :  { %2503 = vmatmul.bf16.gmra.mxu3 %v480_v56  ;;  %2617 = vmatpush.bf16.msrb.mxu2 %v5912_v51  ;;  %v7321_v56 = vmul.f32 %v368_v26, %v7198_v27  ;;  %v5891_v27 = vld [vmem:[%s7997_s1 + $0x508] sm:$0xff]  ;;  %v481_v10 = vpack.c.bf16 %v382_v45, %v382_v45 }
  0xa9   :  { %2635 = vmatpush.bf16.msrb.mxu3 %v5920_v54  ;;  %v7345_v54 = vmul.f32 %v384_v24, %v7145_v19  ;;  %v7348_v21 = vmul.f32 %v387_v30, %v7147_v5  ;;  %v7355_v52 = vmul.f32 %v391_v11, %v382_v45  ;;  %v5906_v19 = vld [vmem:[%s7997_s1 + $0x580] sm:$0xff]  ;;  %v5935_v26 = vld [vmem:[%s7997_s1 + $0x668] sm:$0xff]  ;;  %v5941_v45 = vld [vmem:[%s7997_s1 + $0x698] sm:$0xff] }
  0xaa   :  { %2582 = vmatpush.bf16.msrb.mxu0 %v5895_v2  ;;  %v455_v62 = vpack.c.bf16 %v7324_v59, %v7321_v56  ;;  %v5890_v5 = vld [vmem:[%s7997_s1 + $0x500] sm:$0xff]  ;;  %v5925_v11 = vld [vmem:[%s7997_s1 + $0x618] sm:$0xff] }
  0xab   :  { %2600 = vmatpush.bf16.msrb.mxu1 %v5903_v25  ;;  %v456_v2 = vpack.c.bf16 %v7348_v21, %v7345_v54  ;;  %v5914_v25 = vld [vmem:[%s7997_s1 + $0x5c0] sm:$0xff]  ;;  %v484_v14 = vpack.c.bf16 %v7355_v52, %v7355_v52 }
  0xac   :  { %v2229_v12 = vpop.f32.mrf.mxu0  ;;  %2618 = vmatpush.bf16.msrb.mxu2 %v5911_v1  ;;  %v5898_v1 = vld [vmem:[%s7997_s1 + $0x540] sm:$0xff] }
  0xad   :  { %2636 = vmatpush.bf16.msrb.mxu3 %v5919_v0 }
  0xae   :  { %2583 = vmatpush.bf16.msrb.mxu0 %v5894_v29  ;;  %v389_v29 = vmul.f32 0.0001234098, %v6957_v63 }
  0xaf   :  { %v2247_v9 = vpop.f32.mrf.mxu1  ;;  %2601 = vmatpush.bf16.msrb.mxu1 %v5902_v31  ;;  %v5944_v31 = vld [vmem:[%s7997_s1 + $0x6b0] sm:$0xff] }
  0xb0   :  { %v2248_v16 = vadd.f32 %v2247_v9, %v2229_v12  ;;  %2619 = vmatpush.bf16.msrb.mxu2 %v5910_v35  ;;  %v5937_v12 = vld [vmem:[%s7997_s1 + $0x678] sm:$0xff]  ;;  %v386_v35 = vmul.f32 0.0001234098, %v6944_v28 }
  0xb1   :  { %2467 = vmatmul.bf16.gmra.mxu1 %v478_v13  ;;  %2637 = vmatpush.bf16.msrb.mxu3 %v5918_v46  ;;  %v5928_v46 = vld [vmem:[%s7997_s1 + $0x630] sm:$0xff] }
  0xb2   :  { %2584 = vmatpush.bf16.msrb.mxu0 %v5893_v3  ;;  %v5943_v3 = vld [vmem:[%s7997_s1 + $0x6a8] sm:$0xff]  ;;  %v395_v38 = vmul.f32 %v386_v35, %v7321_v56 }
  0xb3   :  { %2485 = vmatmul.bf16.gmra.mxu2 %v479_v47  ;;  %2602 = vmatpush.bf16.msrb.mxu1 %v5901_v37  ;;  %v5936_v47 = vld [vmem:[%s7997_s1 + $0x670] sm:$0xff]  ;;  %v5927_v37 = vld [vmem:[%s7997_s1 + $0x628] sm:$0xff] }
  0xb4   :  { %2620 = vmatpush.bf16.msrb.mxu2 %v5909_v32  ;;  %v7329_v60 = vpop.f32.mrf.mxu0 }
  0xb5   :  { %2638 = vmatpush.bf16.msrb.mxu3 %v5917_v58  ;;  %v404_v58 = vmul.f32 1.67017e-05, %v6944_v28 }
  0xb6   :  { %2585 = vmatpush.bf16.msrb.mxu0 %v5892_v41 }
  0xb7   :  { %2516 = vmatmul.bf16.vlgmr.msra.gmra.mxu0 %v454_v22  ;;  %2603 = vmatpush.bf16.msrb.mxu1 %v5900_v48  ;;  %v7384_v9 = vpop.f32.mrf.mxu1  ;;  %v390_v22 = vmul.f32 0.0001234098, %v6962_v36  ;;  %v7422_v30 = vmul.f32 %v404_v58, %v395_v38 }
  0xb8   :  { %2570 = vmatmul.bf16.vlgmr.msra.gmra.mxu3 %v457_v43  ;;  %2621 = vmatpush.bf16.msrb.mxu2 %v5908_v20 }
  0xb9   :  { %v2265_v39 = vpop.f32.mrf.mxu2  ;;  %2639 = vmatpush.bf16.msrb.mxu3 %v5916_v55  ;;  %v5934_v55 = vld [vmem:[%s7997_s1 + $0x660] sm:$0xff] }
  0xba   :  { %v2266_v8 = vadd.f32 %v2265_v39, %v2248_v16  ;;  %2586 = vmatpush.bf16.msrb.mxu0 %v5891_v27  ;;  %v374_v16 = vmul.f32 0.000911882, %v7029_v50  ;;  %v407_v39 = vmul.f32 1.67017e-05, %v6957_v63 }
  0xbb   :  { %v2283_v7 = vpop.f32.mrf.mxu3  ;;  %2604 = vmatpush.bf16.msrb.mxu1 %v5899_v18 }
  0xbc   :  { %v7340_v51 = vadd.f32 %v2283_v7, %v2266_v8  ;;  %2622 = vmatpush.bf16.msrb.mxu2 %v5907_v40  ;;  %v7400_v43 = vmul.f32 %v374_v16, %v7270_v57  ;;  %v398_v57 = vmul.f32 %v389_v29, %v7324_v59  ;;  %v7416_v8 = vmul.f32 %v390_v22, %v7215_v42  ;;  %v5942_v42 = vld [vmem:[%s7997_s1 + $0x6a0] sm:$0xff]  ;;  %v5931_v22 = vld [vmem:[%s7997_s1 + $0x648] sm:$0xff] }
  0xbd   :  { %2640 = vmatpush.bf16.msrb.mxu3 %v5915_v49  ;;  %v5926_v59 = vld [vmem:[%s7997_s1 + $0x620] sm:$0xff] }
  0xbe   :  { %2587 = vmatpush.bf16.msrb.mxu0 %v5890_v5  ;;  %v482_v41 = vpack.c.bf16 %v7400_v43, %v7400_v43  ;;  %v7424_v56 = vmul.f32 %v407_v39, %v398_v57  ;;  %v483_v7 = vpack.c.bf16 %v7416_v8, %v7416_v8  ;;  %v458_v27 = vpack.c.bf16 %v398_v57, %v395_v38 }
  0xbf   :  { %2605 = vmatpush.bf16.msrb.mxu1 %v5898_v1  ;;  %v402_v5 = vmul.f32 1.67017e-05, %v6858_v33  ;;  %v405_v1 = vmul.f32 1.67017e-05, %v6872_v44 }
  0xc0   :  { %2623 = vmatpush.bf16.msrb.mxu2 %v5906_v19  ;;  %v461_v18 = vpack.c.bf16 %v7424_v56, %v7422_v30 }
  0xc1   :  { %2534 = vmatmul.bf16.vlgmr.msra.gmra.mxu1 %v455_v62  ;;  %2641 = vmatpush.bf16.msrb.mxu3 %v5914_v25  ;;  %v7418_v20 = vpop.f32.mrf.mxu2  ;;  %v5933_v62 = vld [vmem:[%s7997_s1 + $0x658] sm:$0xff]  ;;  %v411_v16 = vmul.f32 %v402_v5, %v7345_v54  ;;  %v414_v35 = vmul.f32 %v405_v1, %v7348_v21  ;;  %v410_v21 = vmul.f32 1.67017e-05, %v7029_v50 }
  0xc2   :  { %2652 = vmatpush.bf16.msra.mxu0 %v5929_v17 }
  0xc3   :  { %v7371_v0 = vpop.f32.mrf.mxu3  ;;  %2552 = vmatmul.bf16.vlgmr.msra.gmra.mxu2 %v456_v2  ;;  %2670 = vmatpush.bf16.msra.mxu1 %v5937_v12  ;;  %v403_v12 = vmul.f32 1.67017e-05, %v6763_v34 }
  0xc4   :  { %v2234_v13 = vpop.f32.mrf.mxu0  ;;  %2688 = vmatpush.bf16.msra.mxu2 %v5945_v15  ;;  %v5932_v15 = vld [vmem:[%s7997_s1 + $0x650] sm:$0xff] }
  0xc6   :  { %2653 = vmatpush.bf16.msra.mxu0 %v5928_v46  ;;  %v5939_v46 = vld [vmem:[%s7997_s1 + $0x688] sm:$0xff] }
  0xc7   :  { %2521 = vmatmul.bf16.gmra.mxu0 %v481_v10  ;;  %2671 = vmatpush.bf16.msra.mxu1 %v5936_v47  ;;  %v392_v10 = vmul.f32 0.0001234098, %v7029_v50  ;;  %v5923_v47 = vld [vmem:[%s7997_s1 + $0x608] sm:$0xff] }
  0xc8   :  { %2575 = vmatmul.bf16.gmra.mxu3 %v484_v14  ;;  %2689 = vmatpush.bf16.msra.mxu2 %v5944_v31  ;;  %v5940_v14 = vld [vmem:[%s7997_s1 + $0x690] sm:$0xff] }
  0xc9   :  { %v401_v54 = vmul.f32 %v392_v10, %v7400_v43  ;;  %v5938_v43 = vld [vmem:[%s7997_s1 + $0x680] sm:$0xff] }
  0xca   :  { %2654 = vmatpush.bf16.msra.mxu0 %v5927_v37 }
  0xcb   :  { %v2288_v32 = vpop.f32.mrf.mxu3  ;;  %2672 = vmatpush.bf16.msra.mxu1 %v5935_v26  ;;  %v459_v26 = vpack.c.bf16 %v414_v35, %v411_v16  ;;  %v7480_v39 = vmul.f32 %v410_v21, %v401_v54 }
  0xcc   :  { %v2236_v4 = vpop.f32.mrf.mxu0  ;;  %2690 = vmatpush.bf16.msra.mxu2 %v5943_v3 }
  0xce   :  { %v2252_v48 = vpop.f32.mrf.mxu1  ;;  %2655 = vmatpush.bf16.msra.mxu0 %v5926_v59 }
  0xcf   :  { %v2253_v24 = vadd.f32 %v2252_v48, %v2234_v13  ;;  %2673 = vmatpush.bf16.msra.mxu1 %v5934_v55  ;;  %v406_v13 = vmul.f32 1.67017e-05, %v6777_v53  ;;  %v485_v48 = vpack.c.bf16 %v401_v54, %v401_v54  ;;  %v408_v55 = vmul.f32 1.67017e-05, %v6962_v36 }
  0xd0   :  { %2691 = vmatpush.bf16.msra.mxu2 %v5942_v42 }
  0xd1   :  { %2539 = vmatmul.bf16.gmra.mxu1 %v482_v41  ;;  %v415_v3 = vmul.f32 %v406_v13, %v7279_v6  ;;  %v5930_v6 = vld [vmem:[%s7997_s1 + $0x640] sm:$0xff] }
  0xd2   :  { %2656 = vmatpush.bf16.msra.mxu0 %v5925_v11 }
  0xd3   :  { %v2290_v40 = vpop.f32.mrf.mxu3  ;;  %2557 = vmatmul.bf16.gmra.mxu2 %v483_v7  ;;  %2674 = vmatpush.bf16.msra.mxu1 %v5933_v62 }
  0xd4   :  { %v2301_v49 = vpop.f32.mrf.mxu0  ;;  %2692 = vmatpush.bf16.msra.mxu2 %v5941_v45  ;;  %v417_v45 = vmul.f32 %v408_v55, %v7416_v8 }
  0xd5   :  { %v2302_v19 = vadd.f32 %v2301_v49, %v7340_v51  ;;  %v5924_v51 = vld [vmem:[%s7997_s1 + $0x610] sm:$0xff]  ;;  %v420_v49 = vmul.f32 2.2603294e-06, %v6858_v33  ;;  %v421_v33 = vmul.f32 2.2603294e-06, %v6763_v34 }
  0xd6   :  { %v2254_v2 = vpop.f32.mrf.mxu1  ;;  %v2270_v25 = vpop.f32.mrf.mxu2  ;;  %2657 = vmatpush.bf16.msra.mxu0 %v5924_v51 }
  0xd7   :  { %2588 = vmatmul.bf16.vlgmr.msrb.gmra.mxu0 %v458_v27  ;;  %v2271_v17 = vadd.f32 %v2270_v25, %v2253_v24  ;;  %2675 = vmatpush.bf16.msra.mxu1 %v5932_v15  ;;  %v488_v24 = vpack.c.bf16 %v7480_v39, %v7480_v39  ;;  %v486_v2 = vpack.c.bf16 %v417_v45, %v417_v45 }
  0xd8   :  { %2642 = vmatmul.bf16.vlgmr.msrb.gmra.mxu3 %v461_v18  ;;  %2693 = vmatpush.bf16.msra.mxu2 %v5940_v14  ;;  %v409_v18 = vmul.f32 1.67017e-05, %v6894_v61  ;;  %v429_v10 = vmul.f32 %v420_v49, %v411_v16  ;;  %v422_v16 = vmul.f32 2.2603294e-06, %v6944_v28 }
  0xd9   :  { %v2289_v29 = vadd.f32 %v2288_v32, %v2271_v17  ;;  %v412_v32 = vmul.f32 %v403_v12, %v7277_v23  ;;  %v5922_v23 = vld [vmem:[%s7997_s1 + $0x600] sm:$0xff] }
  0xda   :  { %2658 = vmatpush.bf16.msra.mxu0 %v5923_v47  ;;  %v418_v5 = vmul.f32 %v409_v18, %v7355_v52 }
  0xdb   :  { %v2355_v31 = vpop.f32.mrf.mxu3  ;;  %2676 = vmatpush.bf16.msra.mxu1 %v5931_v22  ;;  %v460_v4 = vpack.c.bf16 %v415_v3, %v412_v32  ;;  %v430_v47 = vmul.f32 %v421_v33, %v412_v32 }
  0xdc   :  { %v7478_v37 = vpop.f32.mrf.mxu0  ;;  %2694 = vmatpush.bf16.msra.mxu2 %v5939_v46  ;;  %v487_v17 = vpack.c.bf16 %v418_v5, %v418_v5 }
  0xde   :  { %v2319_v38 = vpop.f32.mrf.mxu1  ;;  %v2272_v57 = vpop.f32.mrf.mxu2  ;;  %2659 = vmatpush.bf16.msra.mxu0 %v5922_v23 }
  0xdf   :  { %v2320_v58 = vadd.f32 %v2319_v38, %v2302_v19  ;;  %2677 = vmatpush.bf16.msra.mxu1 %v5930_v6  ;;  %v423_v19 = vmul.f32 2.2603294e-06, %v6872_v44  ;;  %v424_v44 = vmul.f32 2.2603294e-06, %v6777_v53  ;;  %v431_v38 = vmul.f32 %v422_v16, %v7422_v30 }
  0xe0   :  { %2695 = vmatpush.bf16.msra.mxu2 %v5938_v43 }
  0xe1   :  { %2606 = vmatmul.bf16.vlgmr.msrb.gmra.mxu1 %v459_v26  ;;  %v432_v14 = vmul.f32 %v423_v19, %v414_v35  ;;  %v425_v35 = vmul.f32 2.2603294e-06, %v6957_v63  ;;  %v433_v22 = vmul.f32 %v424_v44, %v415_v3  ;;  %v426_v26 = vmul.f32 2.2603294e-06, %v6962_v36 }
  0xe3   :  { %v7491_v41 = vpop.f32.mrf.mxu3  ;;  %2624 = vmatmul.bf16.vlgmr.msrb.gmra.mxu2 %v460_v4  ;;  %v462_v8 = vpack.c.bf16 %v432_v14, %v429_v10  ;;  %v434_v34 = vmul.f32 %v425_v35, %v7424_v56  ;;  %v463_v57 = vpack.c.bf16 %v433_v22, %v430_v47  ;;  %v435_v6 = vmul.f32 %v426_v26, %v417_v45 }
  0xe4   :  { %v2306_v42 = vpop.f32.mrf.mxu0  ;;  %v428_v56 = vmul.f32 2.2603294e-06, %v7029_v50 }
  0xe5   :  { %v2307_v59 = vadd.f32 %v2306_v42, %v2289_v29  ;;  %v464_v28 = vpack.c.bf16 %v434_v34, %v431_v38  ;;  %v489_v4 = vpack.c.bf16 %v435_v6, %v435_v6 }
  0xe6   :  { %v7496_v7 = vpop.f32.mrf.mxu1  ;;  %v2337_v40 = vpop.f32.mrf.mxu2  ;;  %v437_v18 = vmul.f32 %v428_v56, %v7480_v39 }
  0xe7   :  { %2593 = vmatmul.bf16.gmra.mxu0 %v485_v48  ;;  %v2338_v27 = vadd.f32 %v2337_v40, %v2320_v58  ;;  %v427_v48 = vmul.f32 2.2603294e-06, %v6894_v61 }
  0xe8   :  { %2647 = vmatmul.bf16.gmra.mxu3 %v488_v24 }
  0xe9   :  { %v2356_v11 = vadd.f32 %v2355_v31, %v2338_v27  ;;  %v436_v42 = vmul.f32 %v427_v48, %v418_v5 }
  0xeb   :  { %v2360_v62 = vpop.f32.mrf.mxu3 }
  0xec   :  { %v2308_v1 = vpop.f32.mrf.mxu0 }
  0xed   :  { %v491_v1 = vpack.c.bf16 %v437_v18, %v437_v18 }
  0xee   :  { %v2324_v25 = vpop.f32.mrf.mxu1  ;;  %v7503_v51 = vpop.f32.mrf.mxu2 }
  0xef   :  { %v2325_v15 = vadd.f32 %v2324_v25, %v2307_v59  ;;  %v2250_v59 = vadd.f32 %v7384_v9, %v7329_v60 }
  0xf1   :  { %2611 = vmatmul.bf16.gmra.mxu1 %v486_v2  ;;  %v2268_v27 = vadd.f32 %v7418_v20, %v2250_v59 }
  0xf3   :  { %v2362_v12 = vpop.f32.mrf.mxu3  ;;  %2629 = vmatmul.bf16.gmra.mxu2 %v487_v17  ;;  %v2286_v19 = vadd.f32 %v7371_v0, %v2268_v27 }
  0xf4   :  { %v2373_v13 = vpop.f32.mrf.mxu0 }
  0xf5   :  { %v2374_v29 = vadd.f32 %v2373_v13, %v2356_v11  ;;  %v490_v11 = vpack.c.bf16 %v436_v42, %v436_v42  ;;  %v2304_v50 = vadd.f32 %v7478_v37, %v2286_v19 }
  0xf6   :  { %v2326_v52 = vpop.f32.mrf.mxu1  ;;  %v2342_v31 = vpop.f32.mrf.mxu2 }
  0xf7   :  { %2660 = vmatmul.bf16.vlgmr.msra.gmra.mxu0 %v462_v8  ;;  %v2343_v46 = vadd.f32 %v2342_v31, %v2325_v15  ;;  %v2322_v2 = vadd.f32 %v7496_v7, %v2304_v50 }
  0xf9   :  { %v2361_v54 = vadd.f32 %v2360_v62, %v2343_v46  ;;  %v2340_v39 = vadd.f32 %v7503_v51, %v2322_v2 }
  0xfb   :  { %v2427_v21 = vpop.f32.mrf.mxu3  ;;  %v2358_v17 = vadd.f32 %v7491_v41, %v2340_v39 }
  0xfc   :  { %v2375_v53 = vpop.f32.mrf.mxu0 }
  0xfd   :  { %v2376_v12 = vadd.f32 %v2375_v53, %v2358_v17 }
  0xfe   :  { %v2391_v58 = vpop.f32.mrf.mxu1  ;;  %v2344_v43 = vpop.f32.mrf.mxu2 }
  0xff   :  { %v2392_v23 = vadd.f32 %v2391_v58, %v2374_v29 }
 0x101   :  { %2678 = vmatmul.bf16.vlgmr.msra.gmra.mxu1 %v463_v57 }
 0x103   :  { %v2429_v63 = vpop.f32.mrf.mxu3  ;;  %2696 = vmatmul.bf16.vlgmr.msra.gmra.mxu2 %v464_v28 }
 0x104   :  { %v2378_v32 = vpop.f32.mrf.mxu0 }
 0x105   :  { %v2379_v3 = vadd.f32 %v2378_v32, %v2361_v54 }
 0x106   :  { %v2393_v36 = vpop.f32.mrf.mxu1  ;;  %v2409_v24 = vpop.f32.mrf.mxu2 }
 0x107   :  { %2665 = vmatmul.bf16.gmra.mxu0 %v489_v4  ;;  %v2410_v30 = vadd.f32 %v2409_v24, %v2392_v23  ;;  %v2394_v33 = vadd.f32 %v2393_v36, %v2376_v12 }
 0x109   :  { %v2428_v55 = vadd.f32 %v2427_v21, %v2410_v30 }
 0x10b   :  { %v2432_v40 = vpop.f32.mrf.mxu3 }
 0x10c   :  { %v2380_v45 = vpop.f32.mrf.mxu0 }
 0x10e   :  { %v2396_v62 = vpop.f32.mrf.mxu1  ;;  %v2411_v61 = vpop.f32.mrf.mxu2 }
 0x10f   :  { %v2397_v49 = vadd.f32 %v2396_v62, %v2379_v3  ;;  %v2412_v29 = vadd.f32 %v2411_v61, %v2394_v33 }
 0x111   :  { %2683 = vmatmul.bf16.gmra.mxu1 %v490_v11  ;;  %v2430_v35 = vadd.f32 %v2429_v63, %v2412_v29  ;;  %v5969_v29 = vld [vmem:[%s7998_s2 + $0xb8] sm:$0xff] }
 0x112   :  { %3387 = vmatpush.bf16.msrb.mxu1 %v5969_v29  ;;  %v5984_v29 = vld [vmem:[%s7998_s2 + $0x130] sm:$0xff] }
 0x113   :  { %v2434_v5 = vpop.f32.mrf.mxu3  ;;  %2701 = vmatmul.bf16.gmra.mxu2 %v491_v1 }
 0x114   :  { %v2445_v60 = vpop.f32.mrf.mxu0 }
 0x115   :  { %v2446_v9 = vadd.f32 %v2445_v60, %v2428_v55 }
 0x116   :  { %v2398_v20 = vpop.f32.mrf.mxu1  ;;  %v2414_v25 = vpop.f32.mrf.mxu2 }
 0x117   :  { %v2415_v10 = vadd.f32 %v2414_v25, %v2397_v49 }
 0x119   :  { %v2433_v14 = vadd.f32 %v2432_v40, %v2415_v10 }
 0x11b   :  { %v2499_v15 = vpop.f32.mrf.mxu3 }
 0x11c   :  { %v2447_v0 = vpop.f32.mrf.mxu0 }
 0x11d   :  { %v2448_v51 = vadd.f32 %v2447_v0, %v2430_v35  ;;  %v5951_v35 = vld [vmem:[%s7998_s2 + $0x28] sm:$0xff] }
 0x11e   :  { %v2463_v8 = vpop.f32.mrf.mxu1  ;;  %v2416_v13 = vpop.f32.mrf.mxu2 }
 0x11f   :  { %v2464_v37 = vadd.f32 %v2463_v8, %v2446_v9  ;;  %v5953_v8 = vld [vmem:[%s7998_s2 + $0x38] sm:$0xff] }
 0x120   :  { %3361 = vmatpush.bf16.msra.mxu3 %v5953_v8 }
 0x123   :  { %v2501_v44 = vpop.f32.mrf.mxu3 }
 0x124   :  { %v2450_v52 = vpop.f32.mrf.mxu0 }
 0x125   :  { %v2451_v31 = vadd.f32 %v2450_v52, %v2433_v14 }
 0x126   :  { %v2465_v7 = vpop.f32.mrf.mxu1  ;;  %v2481_v16 = vpop.f32.mrf.mxu2 }
 0x127   :  { %v2482_v46 = vadd.f32 %v2481_v16, %v2464_v37  ;;  %v2466_v21 = vadd.f32 %v2465_v7, %v2448_v51  ;;  %v5961_v37 = vld [vmem:[%s7998_s2 + $0x78] sm:$0xff] }
 0x128   :  { %3374 = vmatpush.bf16.msrb.mxu0 %v5961_v37  ;;  %v5977_v7 = vld [vmem:[%s7998_s2 + $0xf8] sm:$0xff] }
 0x129   :  { %v2500_v47 = vadd.f32 %v2499_v15, %v2482_v46  ;;  %3400 = vmatpush.bf16.msrb.mxu2 %v5977_v7  ;;  %v5968_v46 = vld [vmem:[%s7998_s2 + $0xb0] sm:$0xff] }
 0x12a   :  { %3388 = vmatpush.bf16.msrb.mxu1 %v5968_v46  ;;  %v5992_v46 = vld [vmem:[%s7998_s2 + $0x170] sm:$0xff] }
 0x12b   :  { %v2504_v22 = vpop.f32.mrf.mxu3 }
 0x12c   :  { %v2452_v54 = vpop.f32.mrf.mxu0 }
 0x12e   :  { %v2468_v41 = vpop.f32.mrf.mxu1  ;;  %v2483_v26 = vpop.f32.mrf.mxu2 }
 0x12f   :  { %v2469_v38 = vadd.f32 %v2468_v41, %v2451_v31  ;;  %v2484_v34 = vadd.f32 %v2483_v26, %v2466_v21  ;;  %v5960_v31 = vld [vmem:[%s7998_s2 + $0x70] sm:$0xff]  ;;  %v5950_v41 = vld [vmem:[%s7998_s2 + $0x20] sm:$0xff]  ;;  %v5967_v26 = vld [vmem:[%s7998_s2 + $0xa8] sm:$0xff] }
 0x130   :  { %3375 = vmatpush.bf16.msrb.mxu0 %v5960_v31  ;;  %3389 = vmatpush.bf16.msrb.mxu1 %v5967_v26  ;;  %v5991_v26 = vld [vmem:[%s7998_s2 + $0x168] sm:$0xff] }
 0x131   :  { %v2502_v53 = vadd.f32 %v2501_v44, %v2484_v34  ;;  %v5952_v44 = vld [vmem:[%s7998_s2 + $0x30] sm:$0xff] }
 0x132   :  { %3362 = vmatpush.bf16.msra.mxu3 %v5952_v44  ;;  %v5962_v44 = vld [vmem:[%s7998_s2 + $0x80] sm:$0xff] }
 0x133   :  { %v2506_v57 = vpop.f32.mrf.mxu3 }
 0x134   :  { %v2517_v58 = vpop.f32.mrf.mxu0  ;;  %v5958_v57 = vld [vmem:[%s7998_s2 + $0x60] sm:$0xff] }
 0x135   :  { %v2518_v43 = vadd.f32 %v2517_v58, %v2500_v47  ;;  %v5959_v47 = vld [vmem:[%s7998_s2 + $0x68] sm:$0xff] }
 0x136   :  { %v2470_v23 = vpop.f32.mrf.mxu1  ;;  %v2486_v6 = vpop.f32.mrf.mxu2  ;;  %3363 = vmatpush.bf16.msra.mxu3 %v5951_v35  ;;  %3376 = vmatpush.bf16.msrb.mxu0 %v5959_v47  ;;  %v5975_v58 = vld [vmem:[%s7998_s2 + $0xe8] sm:$0xff] }
 0x137   :  { %v2487_v28 = vadd.f32 %v2486_v6, %v2469_v38 }
 0x139   :  { %v2505_v4 = vadd.f32 %v2504_v22, %v2487_v28  ;;  %v5976_v22 = vld [vmem:[%s7998_s2 + $0xf0] sm:$0xff]  ;;  %v5949_v28 = vld [vmem:[%s7998_s2 + $0x18] sm:$0xff] }
 0x13a   :  { %3401 = vmatpush.bf16.msrb.mxu2 %v5976_v22  ;;  %3364 = vmatpush.bf16.msra.mxu3 %v5950_v41  ;;  %v5983_v22 = vld [vmem:[%s7998_s2 + $0x128] sm:$0xff] }
 0x13b   :  { %v2571_v32 = vpop.f32.mrf.mxu3  ;;  %3377 = vmatpush.bf16.msrb.mxu0 %v5958_v57  ;;  %v5982_v57 = vld [vmem:[%s7998_s2 + $0x120] sm:$0xff] }
 0x13c   :  { %v2519_v63 = vpop.f32.mrf.mxu0 }
 0x13d   :  { %v2520_v3 = vadd.f32 %v2519_v63, %v2502_v53 }
 0x13e   :  { %v2535_v48 = vpop.f32.mrf.mxu1  ;;  %v2488_v36 = vpop.f32.mrf.mxu2  ;;  %3402 = vmatpush.bf16.msrb.mxu2 %v5975_v58  ;;  %3365 = vmatpush.bf16.msra.mxu3 %v5949_v28  ;;  %v5999_v58 = vld [vmem:[%s7998_s2 + $0x1a8] sm:$0xff] }
 0x13f   :  { %v2536_v24 = vadd.f32 %v2535_v48, %v2518_v43  ;;  %v5974_v48 = vld [vmem:[%s7998_s2 + $0xe0] sm:$0xff] }
 0x142   :  { %3403 = vmatpush.bf16.msrb.mxu2 %v5974_v48  ;;  %v5998_v48 = vld [vmem:[%s7998_s2 + $0x1a0] sm:$0xff] }
 0x143   :  { %v2573_v30 = vpop.f32.mrf.mxu3 }
 0x144   :  { %v2522_v56 = vpop.f32.mrf.mxu0 }
 0x145   :  { %v2523_v51 = vadd.f32 %v2522_v56, %v2505_v4  ;;  %v5966_v4 = vld [vmem:[%s7998_s2 + $0xa0] sm:$0xff]  ;;  %v5948_v56 = vld [vmem:[%s7998_s2 + $0x10] sm:$0xff] }
 0x146   :  { %v2537_v42 = vpop.f32.mrf.mxu1  ;;  %v2553_v59 = vpop.f32.mrf.mxu2  ;;  %3390 = vmatpush.bf16.msrb.mxu1 %v5966_v4  ;;  %3366 = vmatpush.bf16.msra.mxu3 %v5948_v56 }
 0x147   :  { %v2554_v55 = vadd.f32 %v2553_v59, %v2536_v24  ;;  %v2538_v45 = vadd.f32 %v2537_v42, %v2520_v3  ;;  %v5957_v3 = vld [vmem:[%s7998_s2 + $0x58] sm:$0xff] }
 0x148   :  { %3378 = vmatpush.bf16.msrb.mxu0 %v5957_v3  ;;  %v5965_v42 = vld [vmem:[%s7998_s2 + $0x98] sm:$0xff] }
 0x149   :  { %v2572_v40 = vadd.f32 %v2571_v32, %v2554_v55  ;;  %v5981_v3 = vld [vmem:[%s7998_s2 + $0x118] sm:$0xff] }
 0x14a   :  { %3391 = vmatpush.bf16.msrb.mxu1 %v5965_v42  ;;  %v5989_v42 = vld [vmem:[%s7998_s2 + $0x158] sm:$0xff] }
 0x14b   :  { %v7523_v27 = vpop.f32.mrf.mxu3 }
 0x14c   :  { %v2524_v18 = vpop.f32.mrf.mxu0 }
 0x14d   :  { %v5973_v18 = vld [vmem:[%s7998_s2 + $0xd8] sm:$0xff] }
 0x14e   :  { %v2540_v11 = vpop.f32.mrf.mxu1  ;;  %v2555_v62 = vpop.f32.mrf.mxu2  ;;  %3404 = vmatpush.bf16.msrb.mxu2 %v5973_v18 }
 0x14f   :  { %v2556_v61 = vadd.f32 %v2555_v62, %v2538_v45  ;;  %v2541_v38 = vadd.f32 %v2540_v11, %v2523_v51  ;;  %v6009_v51 = vld [vmem:[%s7998_s2 + $0x1f8] sm:$0xff] }
 0x151   :  { %v2574_v49 = vadd.f32 %v2573_v30, %v2556_v61  ;;  %v5947_v61 = vld [vmem:[%s7998_s2 + $0x8] sm:$0xff] }
 0x152   :  { %3367 = vmatpush.bf16.msra.mxu3 %v5947_v61  ;;  %v5979_v61 = vld [vmem:[%s7998_s2 + $0x108] sm:$0xff] }
 0x153   :  { %v2578_v19 = vpop.f32.mrf.mxu3 }
 0x154   :  { %v2589_v1 = vpop.f32.mrf.mxu0 }
 0x155   :  { %v2590_v54 = vadd.f32 %v2589_v1, %v2572_v40 }
 0x156   :  { %v2542_v50 = vpop.f32.mrf.mxu1  ;;  %v2558_v5 = vpop.f32.mrf.mxu2 }
 0x157   :  { %v2559_v23 = vadd.f32 %v2558_v5, %v2541_v38  ;;  %v5955_v50 = vld [vmem:[%s7998_s2 + $0x48] sm:$0xff]  ;;  %v5972_v5 = vld [vmem:[%s7998_s2 + $0xd0] sm:$0xff] }
 0x158   :  { %3405 = vmatpush.bf16.msrb.mxu2 %v5972_v5  ;;  %v6008_v38 = vld [vmem:[%s7998_s2 + $0x1f0] sm:$0xff] }
 0x159   :  { %v2577_v36 = vadd.f32 %v7523_v27, %v2559_v23  ;;  %v5956_v27 = vld [vmem:[%s7998_s2 + $0x50] sm:$0xff]  ;;  %v5990_v23 = vld [vmem:[%s7998_s2 + $0x160] sm:$0xff] }
 0x15a   :  { %3379 = vmatpush.bf16.msrb.mxu0 %v5956_v27  ;;  %v5997_v27 = vld [vmem:[%s7998_s2 + $0x198] sm:$0xff] }
 0x15b   :  { %v7525_v60 = vpop.f32.mrf.mxu3 }
 0x15c   :  { %v2591_v9 = vpop.f32.mrf.mxu0 }
 0x15d   :  { %v2592_v34 = vadd.f32 %v2591_v9, %v2574_v49  ;;  %v5964_v49 = vld [vmem:[%s7998_s2 + $0x90] sm:$0xff] }
 0x15e   :  { %v2607_v2 = vpop.f32.mrf.mxu1  ;;  %v2560_v20 = vpop.f32.mrf.mxu2  ;;  %3392 = vmatpush.bf16.msrb.mxu1 %v5964_v49  ;;  %3380 = vmatpush.bf16.msrb.mxu0 %v5955_v50  ;;  %v5996_v49 = vld [vmem:[%s7998_s2 + $0x190] sm:$0xff] }
 0x15f   :  { %v2608_v6 = vadd.f32 %v2607_v2, %v2590_v54  ;;  %v5946_v20 = vld [vmem:[%s7998_s2] sm:$0xff]  ;;  %v6000_v54 = vld [vmem:[%s7998_s2 + $0x1b0] sm:$0xff] }
 0x160   :  { %3368 = vmatpush.bf16.msra.mxu3 %v5946_v20  ;;  %v6004_v50 = vld [vmem:[%s7998_s2 + $0x1d0] sm:$0xff]  ;;  %v5995_v20 = vld [vmem:[%s7998_s2 + $0x188] sm:$0xff] }
 0x163   :  { %v7527_v25 = vpop.f32.mrf.mxu3 }
 0x164   :  { %v7529_v39 = vpop.f32.mrf.mxu0 }
 0x165   :  { %v2595_v55 = vadd.f32 %v7529_v39, %v2577_v36  ;;  %v5985_v39 = vld [vmem:[%s7998_s2 + $0x138] sm:$0xff] }
 0x166   :  { %v2609_v10 = vpop.f32.mrf.mxu1  ;;  %v2625_v14 = vpop.f32.mrf.mxu2  ;;  %3413 = vmatpush.bf16.msrb.mxu3 %v5985_v39 }
 0x167   :  { %v2626_v32 = vadd.f32 %v2625_v14, %v2608_v6  ;;  %v2610_v63 = vadd.f32 %v2609_v10, %v2592_v34  ;;  %v6007_v6 = vld [vmem:[%s7998_s2 + $0x1e8] sm:$0xff] }
 0x169   :  { %v2644_v59 = vadd.f32 %v7525_v60, %v2626_v32 }
 0x16a   :  { %3414 = vmatpush.bf16.msrb.mxu3 %v5984_v29 }
 0x16b   :  { %v7531_v15 = vpop.f32.mrf.mxu3 }
 0x16c   :  { %v2596_v17 = vpop.f32.mrf.mxu0 }
 0x16e   :  { %v7533_v0 = vpop.f32.mrf.mxu1  ;;  %v2627_v12 = vpop.f32.mrf.mxu2  ;;  %3415 = vmatpush.bf16.msrb.mxu3 %v5983_v22 }
 0x16f   :  { %v2628_v24 = vadd.f32 %v2627_v12, %v2610_v63  ;;  %v2613_v19 = vadd.f32 %v7533_v0, %v2595_v55  ;;  %v5954_v0 = vld [vmem:[%s7998_s2 + $0x40] sm:$0xff]  ;;  %v5971_v12 = vld [vmem:[%s7998_s2 + $0xc8] sm:$0xff] }
 0x170   :  { %3381 = vmatpush.bf16.msrb.mxu0 %v5954_v0  ;;  %3406 = vmatpush.bf16.msrb.mxu2 %v5971_v12  ;;  %v5994_v0 = vld [vmem:[%s7998_s2 + $0x180] sm:$0xff] }
 0x171   :  { %v2646_v11 = vadd.f32 %v7527_v25, %v2628_v24  ;;  %v5963_v25 = vld [vmem:[%s7998_s2 + $0x88] sm:$0xff] }
 0x172   :  { %3393 = vmatpush.bf16.msrb.mxu1 %v5963_v25  ;;  %3416 = vmatpush.bf16.msrb.mxu3 %v5982_v57 }
 0x173   :  { %v2650_v13 = vpop.f32.mrf.mxu3 }
 0x174   :  { %v2661_v33 = vpop.f32.mrf.mxu0  ;;  %v5993_v13 = vld [vmem:[%s7998_s2 + $0x178] sm:$0xff] }
 0x175   :  { %v2662_v62 = vadd.f32 %v2661_v33, %v2644_v59  ;;  %3426 = vmatpush.bf16.msra.mxu0 %v5993_v13  ;;  %v6006_v59 = vld [vmem:[%s7998_s2 + $0x1e0] sm:$0xff] }
 0x176   :  { %v2614_v52 = vpop.f32.mrf.mxu1  ;;  %v7553_v16 = vpop.f32.mrf.mxu2  ;;  %3394 = vmatpush.bf16.msrb.mxu1 %v5962_v44  ;;  %3417 = vmatpush.bf16.msrb.mxu3 %v5981_v3  ;;  %v6002_v13 = vld [vmem:[%s7998_s2 + $0x1c0] sm:$0xff] }
 0x177   :  { %v2631_v60 = vadd.f32 %v7553_v16, %v2613_v19  ;;  %v6001_v52 = vld [vmem:[%s7998_s2 + $0x1b8] sm:$0xff]  ;;  %v5970_v16 = vld [vmem:[%s7998_s2 + $0xc0] sm:$0xff] }
 0x178   :  { %3407 = vmatpush.bf16.msrb.mxu2 %v5970_v16 }
 0x179   :  { %v2649_v37 = vadd.f32 %v7531_v15, %v2631_v60  ;;  %3427 = vmatpush.bf16.msra.mxu0 %v5992_v46 }
 0x17a   :  { %3439 = vmatpush.bf16.msra.mxu1 %v6001_v52 }
 0x17c   :  { %v2663_v21 = vpop.f32.mrf.mxu0  ;;  %3452 = vmatpush.bf16.msra.mxu2 %v6009_v51 }
 0x17d   :  { %v2664_v1 = vadd.f32 %v2663_v21, %v2646_v11  ;;  %3428 = vmatpush.bf16.msra.mxu0 %v5991_v26  ;;  %v5988_v11 = vld [vmem:[%s7998_s2 + $0x150] sm:$0xff] }
 0x17e   :  { %v2679_v53 = vpop.f32.mrf.mxu1  ;;  %v2632_v43 = vpop.f32.mrf.mxu2  ;;  %3440 = vmatpush.bf16.msra.mxu1 %v6000_v54 }
 0x17f   :  { %v2680_v9 = vadd.f32 %v2679_v53, %v2662_v62  ;;  %v6005_v62 = vld [vmem:[%s7998_s2 + $0x1d8] sm:$0xff] }
 0x180   :  { %3453 = vmatpush.bf16.msra.mxu2 %v6008_v38 }
 0x181   :  { %3429 = vmatpush.bf16.msra.mxu0 %v5990_v23 }
 0x182   :  { %3441 = vmatpush.bf16.msra.mxu1 %v5999_v58 }
 0x184   :  { %v2666_v30 = vpop.f32.mrf.mxu0  ;;  %3454 = vmatpush.bf16.msra.mxu2 %v6007_v6 }
 0x185   :  { %v2667_v15 = vadd.f32 %v2666_v30, %v2649_v37  ;;  %3430 = vmatpush.bf16.msra.mxu0 %v5989_v42 }
 0x186   :  { %v2681_v40 = vpop.f32.mrf.mxu1  ;;  %v2697_v45 = vpop.f32.mrf.mxu2  ;;  %3442 = vmatpush.bf16.msra.mxu1 %v5998_v48  ;;  %v6017_v48 = vld [vmem:[%s7998_s2 + $0x238] sm:$0xff] }
 0x187   :  { %v2698_v10 = vadd.f32 %v2697_v45, %v2680_v9  ;;  %v2682_v14 = vadd.f32 %v2681_v40, %v2664_v1  ;;  %v5980_v40 = vld [vmem:[%s7998_s2 + $0x110] sm:$0xff]  ;;  %v5987_v1 = vld [vmem:[%s7998_s2 + $0x148] sm:$0xff] }
 0x188   :  { %3455 = vmatpush.bf16.msra.mxu2 %v6006_v59  ;;  %3418 = vmatpush.bf16.msrb.mxu3 %v5980_v40 }
 0x189   :  { %v2707_v31 = vsel %vm2706_vm4, %v2698_v10, -inf  ;;  %3431 = vmatpush.bf16.msra.mxu0 %v5988_v11  ;;  %v6013_v11 = vld [vmem:[%s7998_s2 + $0x218] sm:$0xff] }
 0x18a   :  { %3443 = vmatpush.bf16.msra.mxu1 %v5997_v27  ;;  %v6015_v27 = vld [vmem:[%s7998_s2 + $0x228] sm:$0xff] }
 0x18c   :  { %v2668_v2 = vpop.f32.mrf.mxu0  ;;  %3456 = vmatpush.bf16.msra.mxu2 %v6005_v62  ;;  %3419 = vmatpush.bf16.msrb.mxu3 %v5979_v61  ;;  %v6012_v61 = vld [vmem:[%s7998_s2 + $0x210] sm:$0xff] }
 0x18d   :  { %3432 = vmatpush.bf16.msra.mxu0 %v5987_v1  ;;  %v5978_v2 = vld [vmem:[%s7998_s2 + $0x100] sm:$0xff] }
 0x18e   :  { %v2684_v17 = vpop.f32.mrf.mxu1  ;;  %v2699_v8 = vpop.f32.mrf.mxu2  ;;  %3444 = vmatpush.bf16.msra.mxu1 %v5996_v49  ;;  %v6011_v49 = vld [vmem:[%s7998_s2 + $0x208] sm:$0xff]  ;;  %v6010_v1 = vld [vmem:[%s7998_s2 + $0x200] sm:$0xff] }
 0x18f   :  { %v2700_v33 = vadd.f32 %v2699_v8, %v2682_v14  ;;  %v2685_v21 = vadd.f32 %v2684_v17, %v2667_v15  ;;  %v5986_v14 = vld [vmem:[%s7998_s2 + $0x140] sm:$0xff]  ;;  %v6003_v17 = vld [vmem:[%s7998_s2 + $0x1c8] sm:$0xff] }
 0x190   :  { %3457 = vmatpush.bf16.msra.mxu2 %v6004_v50  ;;  %3420 = vmatpush.bf16.msrb.mxu3 %v5978_v2  ;;  %v6041_v2 = vld [vmem:[%s7999_s3 + $0xb8] sm:$0xff] }
 0x191   :  { %v2709_v7 = vsel %vm2708_vm5, %v2700_v33, -inf  ;;  %v2718_v28 = vsel %vm2717_vm6, %v2700_v33, -inf  ;;  %3433 = vmatpush.bf16.msra.mxu0 %v5986_v14  ;;  %v6049_v14 = vld [vmem:[%s7999_s3 + $0xf8] sm:$0xff] }
 0x192   :  { %v2710_v35 = vmax.f32 %v2707_v31, %v2709_v7  ;;  %3445 = vmatpush.bf16.msra.mxu1 %v5995_v20  ;;  %v6024_v20 = vld [vmem:[%s7999_s3 + $0x30] sm:$0xff] }
 0x194   :  { %v2711_v47 = vrot.slane %v2710_v35, 4  ;;  %3458 = vmatpush.bf16.msra.mxu2 %v6003_v17  ;;  %v6023_v17 = vld [vmem:[%s7999_s3 + $0x28] sm:$0xff] }
 0x196   :  { %v2686_v41 = vpop.f32.mrf.mxu1  ;;  %v2712_v34 = vmax.f32 %v2710_v35, %v2711_v47  ;;  %v2702_v53 = vpop.f32.mrf.mxu2  ;;  %3446 = vmatpush.bf16.msra.mxu1 %v5994_v0  ;;  %v6040_v0 = vld [vmem:[%s7999_s3 + $0xb0] sm:$0xff] }
 0x197   :  { %v2703_v43 = vadd.f32 %v2702_v53, %v2685_v21 }
 0x198   :  { %v2713_v32 = vrot.slane %v2712_v34, 2  ;;  %3459 = vmatpush.bf16.msra.mxu2 %v6002_v13  ;;  %v6022_v13 = vld [vmem:[%s7999_s3 + $0x20] sm:$0xff] }
 0x199   :  { %v2720_v4 = vsel %vm2719_vm7, %v2703_v43, -inf }
 0x19a   :  { %v2721_v63 = vmax.f32 %v2718_v28, %v2720_v4  ;;  %v2714_v24 = vmax.f32 %v2712_v34, %v2713_v32 }
 0x19c   :  { %v2722_v36 = vrot.slane %v2721_v63, 4  ;;  %v2715_v18 = vrot.slane %v2714_v24, 1 }
 0x19e   :  { %v2723_v30 = vmax.f32 %v2721_v63, %v2722_v36  ;;  %v2704_v56 = vpop.f32.mrf.mxu2  ;;  %v2716_v5 = vmax.f32 %v2714_v24, %v2715_v18 }
 0x19f   :  { %v6016_v56 = vld [vmem:[%s7998_s2 + $0x230] sm:$0xff] }
 0x1a0   :  { %v2724_v55 = vrot.slane %v2723_v30, 2 }
 0x1a2   :  { %v2725_v45 = vmax.f32 %v2723_v30, %v2724_v55 }
 0x1a4   :  { %v2726_v19 = vrot.slane %v2725_v45, 1 }
 0x1a6   :  { %v2727_v60 = vmax.f32 %v2725_v45, %v2726_v19  ;;  %v6014_v45 = vld [vmem:[%s7998_s2 + $0x220] sm:$0xff] }
 0x1a8   :  { %v2729_v9 = vsel %vm2728_vm8, %v2716_v5, %v2727_v60  ;;  %v6025_v60 = vld [vmem:[%s7999_s3 + $0x38] sm:$0xff] }
 0x1a9   :  { %v2730_v25 = vsel %vm2706_vm4, %v2729_v9, 0.0  ;;  %v6033_v9 = vld [vmem:[%s7999_s3 + $0x78] sm:$0xff] }
 0x1aa   :  { %v5148_v39 = vmul.f32 -1.442695, %v2730_v25  ;;  %v5149_v10 = vclamps-f32 %v2730_v25, 6.571429 }
 0x1ac   :  { %6163 = vpow2.f32 %v5148_v39  ;;  %v5150_v12 = vadd.f32 2.0, %v5149_v10  ;;  %v6032_v10 = vld [vmem:[%s7999_s3 + $0x70] sm:$0xff] }
 0x1ae   :  { %v2754_v8 = vmul.f32 1.75, %v5150_v12  ;;  %v6031_v12 = vld [vmem:[%s7999_s3 + $0x68] sm:$0xff] }
 0x1b0   :  { %v2755_v37 = vmul.f32 %v2754_v8, %v2754_v8  ;;  %v2759_v33 = vadd.f32 %v2754_v8, %v2754_v8  ;;  %v6048_v8 = vld [vmem:[%s7999_s3 + $0xf0] sm:$0xff] }
 0x1b2   :  { %v6164_v44 = vpop.eup %6163  ;;  %v2760_v29 = vmul.f32 1.442695, %v2759_v33  ;;  %v2756_v52 = vsub.f32 0.0, %v2755_v37  ;;  %v6039_v37 = vld [vmem:[%s7999_s3 + $0xa8] sm:$0xff] }
 0x1b3   :  { %v2734_v31 = vadd.f32 1.0, %v6164_v44  ;;  %v6030_v44 = vld [vmem:[%s7999_s3 + $0x60] sm:$0xff] }
 0x1b4   :  { %6165 = vpow2.f32 %v2760_v29  ;;  %v2757_v7 = vmul.f32 1.442695, %v2756_v52  ;;  %v6047_v29 = vld [vmem:[%s7999_s3 + $0xe8] sm:$0xff] }
 0x1b5   :  { %6167 = vrcp.f32 %v2734_v31  ;;  %v2746_v38 = vand.u32 2147483648, %v2734_v31  ;;  %v2744_v57 = vand.u32 2147483647, %v2734_v31  ;;  %vm2740_vm10 = vweird.f32 %v2734_v31 }
 0x1b6   :  { %6169 = vpow2.f32 %v2757_v7  ;;  %v6021_v7 = vld [vmem:[%s7999_s3 + $0x18] sm:$0xff] }
 0x1b7   :  { %v2747_v6 = vor.u32 1.1754944e-38, %v2746_v38  ;;  %vm2745_vm12 = vcmp.eq.f32.partialorder %v2744_v57, 8.507059e+37  ;;  %v6019_v38 = vld [vmem:[%s7999_s3 + $0x8] sm:$0xff]  ;;  %v6044_v57 = vld [vmem:[%s7999_s3 + $0xd0] sm:$0xff] }
 0x1ba   :  { %v6166_v15 = vpop.eup %6165 }
 0x1bb   :  { %v6168_v16 = vpop.eup %6167  ;;  %v2762_v35 = vmul.f32 0.36787945, %v6166_v15  ;;  %v2764_v54 = vmul.f32 0.049787067, %v6166_v15  ;;  %v2766_v34 = vmul.f32 0.006737947, %v6166_v15 }
 0x1bc   :  { %v6170_v46 = vpop.eup %6169  ;;  %v2736_v51 = vmul.f32 %v6168_v16, %v2734_v31  ;;  %vm2741_vm9 = vweird.f32 %v6168_v16  ;;  %v2768_v28 = vmul.f32 0.000911882, %v6166_v15  ;;  %v2770_v36 = vmul.f32 0.0001234098, %v6166_v15 }
 0x1bd   :  { %v2777_v47 = vpack.c.bf16 %v6170_v46, %v6170_v46  ;;  %v2763_v22 = vmul.f32 %v6170_v46, %v2762_v35  ;;  %vm2742_vm11 = vmor %vm2740_vm10, %vm2741_vm9  ;;  %v2772_v42 = vmul.f32 1.67017e-05, %v6166_v15  ;;  %v2774_v19 = vmul.f32 2.2603294e-06, %v6166_v15  ;;  %v6038_v15 = vld [vmem:[%s7999_s3 + $0xa0] sm:$0xff]  ;;  %v6020_v46 = vld [vmem:[%s7999_s3 + $0x10] sm:$0xff] }
 0x1be   :  { %v2737_v21 = vsub.f32 1.0, %v2736_v51  ;;  %v6046_v35 = vld [vmem:[%s7999_s3 + $0xe0] sm:$0xff]  ;;  %v6037_v51 = vld [vmem:[%s7999_s3 + $0x98] sm:$0xff] }
 0x1bf   :  { %3382 = vmatmul.bf16.vlgmr.msrb.gmra.mxu0 %v2777_v47  ;;  %v2778_v41 = vpack.c.bf16 %v2763_v22, %v2763_v22  ;;  %v2765_v26 = vmul.f32 %v2764_v54, %v2763_v22 }
 0x1c0   :  { %v2738_v53 = vmul.f32 %v6168_v16, %v2737_v21  ;;  %4110 = vmatpush.bf16.msrb.mxu0 %v6025_v60  ;;  %v6079_v60 = vld [vmem:[%s7999_s3 + $0x1e8] sm:$0xff] }
 0x1c1   :  { %3395 = vmatmul.bf16.vlgmr.msrb.gmra.mxu1 %v2778_v41  ;;  %v2779_v58 = vpack.c.bf16 %v2765_v26, %v2765_v26  ;;  %v2767_v43 = vmul.f32 %v2766_v34, %v2765_v26  ;;  %v6028_v41 = vld [vmem:[%s7999_s3 + $0x50] sm:$0xff]  ;;  %v6045_v26 = vld [vmem:[%s7999_s3 + $0xd8] sm:$0xff] }
 0x1c2   :  { %v2739_v23 = vadd.f32 %v6168_v16, %v2738_v53  ;;  %4123 = vmatpush.bf16.msrb.mxu1 %v6033_v9  ;;  %v6036_v34 = vld [vmem:[%s7999_s3 + $0x90] sm:$0xff]  ;;  %v6027_v53 = vld [vmem:[%s7999_s3 + $0x48] sm:$0xff] }
 0x1c3   :  { %3408 = vmatmul.bf16.vlgmr.msrb.gmra.mxu2 %v2779_v58  ;;  %v2769_v63 = vmul.f32 %v2768_v28, %v2767_v43  ;;  %v2780_v62 = vpack.c.bf16 %v2767_v43, %v2767_v43  ;;  %v6018_v43 = vld [vmem:[%s7999_s3] sm:$0xff]  ;;  %v6057_v28 = vld [vmem:[%s7999_s3 + $0x138] sm:$0xff] }
 0x1c4   :  { %v2743_v4 = vsel %vm2742_vm11, %v6168_v16, %v2739_v23  ;;  %4136 = vmatpush.bf16.msrb.mxu2 %v6041_v2  ;;  %4111 = vmatpush.bf16.msrb.mxu0 %v6024_v20  ;;  %v6029_v16 = vld [vmem:[%s7999_s3 + $0x58] sm:$0xff]  ;;  %v6035_v23 = vld [vmem:[%s7999_s3 + $0x88] sm:$0xff] }
 0x1c5   :  { %v2748_v32 = vsel %vm2745_vm12, %v2747_v6, %v2743_v4  ;;  %v2771_v30 = vmul.f32 %v2770_v36, %v2769_v63  ;;  %v2781_v59 = vpack.c.bf16 %v2769_v63, %v2769_v63  ;;  %v6065_v36 = vld [vmem:[%s7999_s3 + $0x178] sm:$0xff] }
 0x1c6   :  { %v2750_v3 = vmul.f32 %v2748_v32, %v2730_v25  ;;  %4124 = vmatpush.bf16.msrb.mxu1 %v6032_v10  ;;  %v6053_v20 = vld [vmem:[%s7999_s3 + $0x118] sm:$0xff]  ;;  %v6078_v10 = vld [vmem:[%s7999_s3 + $0x1e0] sm:$0xff] }
 0x1c7   :  { %v2773_v55 = vmul.f32 %v2772_v42, %v2771_v30  ;;  %v2782_v40 = vpack.c.bf16 %v2771_v30, %v2771_v30  ;;  %v6056_v30 = vld [vmem:[%s7999_s3 + $0x130] sm:$0xff] }
 0x1c8   :  { %v2776_v24 = vpack.c.bf16 %v2750_v3, %v2750_v3  ;;  %4112 = vmatpush.bf16.msrb.mxu0 %v6023_v17  ;;  %4137 = vmatpush.bf16.msrb.mxu2 %v6040_v0  ;;  %v6026_v3 = vld [vmem:[%s7999_s3 + $0x40] sm:$0xff]  ;;  %v6052_v17 = vld [vmem:[%s7999_s3 + $0x110] sm:$0xff]  ;;  %v6069_v0 = vld [vmem:[%s7999_s3 + $0x198] sm:$0xff] }
 0x1c9   :  { %v2783_v18 = vpack.c.bf16 %v2773_v55, %v2773_v55  ;;  %v2775_v50 = vmul.f32 %v2774_v19, %v2773_v55  ;;  %v6064_v55 = vld [vmem:[%s7999_s3 + $0x170] sm:$0xff] }
 0x1ca   :  { %3369 = vmatmul.bf16.vlgmr.msra.gmra.mxu3 %v2776_v24  ;;  %4125 = vmatpush.bf16.msrb.mxu1 %v6031_v12  ;;  %v6034_v24 = vld [vmem:[%s7999_s3 + $0x80] sm:$0xff]  ;;  %v6060_v12 = vld [vmem:[%s7999_s3 + $0x150] sm:$0xff] }
 0x1cb   :  { %3465 = vmatpush.bf16.msra.mxu3 %v6017_v48  ;;  %v2784_v5 = vpack.c.bf16 %v2775_v50, %v2775_v50  ;;  %v6043_v48 = vld [vmem:[%s7999_s3 + $0xc8] sm:$0xff] }
 0x1cc   :  { %4113 = vmatpush.bf16.msrb.mxu0 %v6022_v13  ;;  %4138 = vmatpush.bf16.msrb.mxu2 %v6039_v37  ;;  %v6071_v50 = vld [vmem:[%s7999_s3 + $0x1a8] sm:$0xff] }
 0x1ce   :  { %4126 = vmatpush.bf16.msrb.mxu1 %v6030_v44  ;;  %v6068_v44 = vld [vmem:[%s7999_s3 + $0x190] sm:$0xff] }
 0x1cf   :  { %3434 = vmatmul.bf16.vlgmr.msra.gmra.mxu0 %v2781_v59  ;;  %3466 = vmatpush.bf16.msra.mxu3 %v6016_v56  ;;  %v6073_v56 = vld [vmem:[%s7999_s3 + $0x1b8] sm:$0xff]  ;;  %v6042_v59 = vld [vmem:[%s7999_s3 + $0xc0] sm:$0xff] }
 0x1d0   :  { %4114 = vmatpush.bf16.msrb.mxu0 %v6021_v7  ;;  %4139 = vmatpush.bf16.msrb.mxu2 %v6038_v15 }
 0x1d1   :  { %3447 = vmatmul.bf16.vlgmr.msra.gmra.mxu1 %v2782_v40  ;;  %v6081_v40 = vld [vmem:[%s7999_s3 + $0x1f8] sm:$0xff] }
 0x1d2   :  { %4127 = vmatpush.bf16.msrb.mxu1 %v6029_v16 }
 0x1d3   :  { %3460 = vmatmul.bf16.vlgmr.msra.gmra.mxu2 %v2783_v18  ;;  %3467 = vmatpush.bf16.msra.mxu3 %v6015_v27  ;;  %v6055_v18 = vld [vmem:[%s7999_s3 + $0x128] sm:$0xff] }
 0x1d4   :  { %4115 = vmatpush.bf16.msrb.mxu0 %v6020_v46  ;;  %4140 = vmatpush.bf16.msrb.mxu2 %v6037_v51  ;;  %v6067_v46 = vld [vmem:[%s7999_s3 + $0x188] sm:$0xff]  ;;  %v6058_v51 = vld [vmem:[%s7999_s3 + $0x140] sm:$0xff] }
 0x1d6   :  { %4128 = vmatpush.bf16.msrb.mxu1 %v6028_v41 }
 0x1d7   :  { %3468 = vmatpush.bf16.msra.mxu3 %v6014_v45  ;;  %v6072_v45 = vld [vmem:[%s7999_s3 + $0x1b0] sm:$0xff] }
 0x1d8   :  { %4116 = vmatpush.bf16.msrb.mxu0 %v6019_v38  ;;  %4141 = vmatpush.bf16.msrb.mxu2 %v6036_v34 }
 0x1da   :  { %3421 = vmatmul.bf16.vlgmr.msrb.gmra.mxu3 %v2780_v62  ;;  %4129 = vmatpush.bf16.msrb.mxu1 %v6027_v53 }
 0x1db   :  { %3469 = vmatpush.bf16.msra.mxu3 %v6013_v11 }
 0x1dc   :  { %4117 = vmatpush.bf16.msrb.mxu0 %v6018_v43  ;;  %4142 = vmatpush.bf16.msrb.mxu2 %v6035_v23 }
 0x1de   :  { %4130 = vmatpush.bf16.msrb.mxu1 %v6026_v3 }
 0x1df   :  { %3470 = vmatpush.bf16.msra.mxu3 %v6012_v61  ;;  %v6063_v61 = vld [vmem:[%s7999_s3 + $0x168] sm:$0xff] }
 0x1e0   :  { %4162 = vmatpush.bf16.msra.mxu0 %v6057_v28  ;;  %4143 = vmatpush.bf16.msrb.mxu2 %v6034_v24 }
 0x1e2   :  { %4175 = vmatpush.bf16.msra.mxu1 %v6065_v36 }
 0x1e3   :  { %3471 = vmatpush.bf16.msra.mxu3 %v6011_v49  ;;  %v6080_v49 = vld [vmem:[%s7999_s3 + $0x1f0] sm:$0xff] }
 0x1e4   :  { %4163 = vmatpush.bf16.msra.mxu0 %v6056_v30  ;;  %4188 = vmatpush.bf16.msra.mxu2 %v6073_v56 }
 0x1e6   :  { %4176 = vmatpush.bf16.msra.mxu1 %v6064_v55 }
 0x1e7   :  { %3472 = vmatpush.bf16.msra.mxu3 %v6010_v1  ;;  %v6054_v1 = vld [vmem:[%s7999_s3 + $0x120] sm:$0xff] }
 0x1e8   :  { %4164 = vmatpush.bf16.msra.mxu0 %v6055_v18  ;;  %4189 = vmatpush.bf16.msra.mxu2 %v6072_v45 }
 0x1ea   :  { %3473 = vmatmul.bf16.vlgmr.msra.gmra.mxu3 %v2784_v5  ;;  %4177 = vmatpush.bf16.msra.mxu1 %v6063_v61  ;;  %v6062_v5 = vld [vmem:[%s7999_s3 + $0x160] sm:$0xff] }
 0x1eb   :  { %4149 = vmatpush.bf16.msrb.mxu3 %v6049_v14 }
 0x1ec   :  { %4165 = vmatpush.bf16.msra.mxu0 %v6054_v1  ;;  %4190 = vmatpush.bf16.msra.mxu2 %v6071_v50  ;;  %v6089_v50 = vld [vmem:[%s7999_s3 + $0x238] sm:$0xff] }
 0x1ee   :  { %4178 = vmatpush.bf16.msra.mxu1 %v6062_v5 }
 0x1ef   :  { %4150 = vmatpush.bf16.msrb.mxu3 %v6048_v8  ;;  %v6077_v8 = vld [vmem:[%s7999_s3 + $0x1d8] sm:$0xff] }
 0x1f0   :  { %4166 = vmatpush.bf16.msra.mxu0 %v6053_v20 }
 0x1f3   :  { %4151 = vmatpush.bf16.msrb.mxu3 %v6047_v29 }
 0x1f4   :  { %4167 = vmatpush.bf16.msra.mxu0 %v6052_v17 }
 0x1f7   :  { %4152 = vmatpush.bf16.msrb.mxu3 %v6046_v35  ;;  %v6050_v35 = vld [vmem:[%s7999_s3 + $0x100] sm:$0xff] }
 0x1fb   :  { %4153 = vmatpush.bf16.msrb.mxu3 %v6045_v26  ;;  %v6074_v26 = vld [vmem:[%s7999_s3 + $0x1c0] sm:$0xff] }
 0x1ff   :  { %4154 = vmatpush.bf16.msrb.mxu3 %v6044_v57 }
 0x203   :  { %4155 = vmatpush.bf16.msrb.mxu3 %v6043_v48 }
 0x207   :  { %4156 = vmatpush.bf16.msrb.mxu3 %v6042_v59 }
 0x20b   :  { %4201 = vmatpush.bf16.msra.mxu3 %v6081_v40 }
 0x20f   :  { %4202 = vmatpush.bf16.msra.mxu3 %v6080_v49 }
 0x213   :  { %4203 = vmatpush.bf16.msra.mxu3 %v6079_v60 }
 0x217   :  { %4204 = vmatpush.bf16.msra.mxu3 %v6078_v10 }
 0x21b   :  { %4205 = vmatpush.bf16.msra.mxu3 %v6077_v8 }
 0x23c   :  { %v3383_v25 = vpop.f32.mrf.mxu0 }
 0x23e   :  { %v7774_v39 = vpop.f32.mrf.mxu1 }
 0x244   :  { %v3385_v33 = vpop.f32.mrf.mxu0 }
 0x245   :  { %v6051_v33 = vld [vmem:[%s7999_s3 + $0x108] sm:$0xff] }
 0x246   :  { %v3398_v52 = vpop.f32.mrf.mxu1  ;;  %v7806_v31 = vpop.f32.mrf.mxu2  ;;  %4168 = vmatpush.bf16.msra.mxu0 %v6051_v33 }
 0x247   :  { %v6059_v52 = vld [vmem:[%s7999_s3 + $0x148] sm:$0xff] }
 0x24a   :  { %4169 = vmatpush.bf16.msra.mxu0 %v6050_v35 }
 0x24c   :  { %v7826_v47 = vpop.f32.mrf.mxu0 }
 0x24d   :  { %v3370_v22 = vpop.f32.mrf.mxu3 }
 0x24e   :  { %v3411_v54 = vpop.f32.mrf.mxu2  ;;  %v7828_v21 = vpop.f32.mrf.mxu1  ;;  %v3384_v4 = vadd.f32 %v3383_v25, %v3370_v22  ;;  %v6070_v25 = vld [vmem:[%s7999_s3 + $0x1a0] sm:$0xff] }
 0x24f   :  { %4191 = vmatpush.bf16.msra.mxu2 %v6070_v25  ;;  %v6066_v54 = vld [vmem:[%s7999_s3 + $0x180] sm:$0xff] }
 0x250   :  { %v3397_v42 = vadd.f32 %v7774_v39, %v3384_v4  ;;  %v6061_v39 = vld [vmem:[%s7999_s3 + $0x158] sm:$0xff] }
 0x251   :  { %4179 = vmatpush.bf16.msra.mxu1 %v6061_v39 }
 0x252   :  { %v3410_v11 = vadd.f32 %v7806_v31, %v3397_v42  ;;  %v6076_v31 = vld [vmem:[%s7999_s3 + $0x1d0] sm:$0xff] }
 0x253   :  { %4192 = vmatpush.bf16.msra.mxu2 %v6069_v0  ;;  %4206 = vmatpush.bf16.msra.mxu3 %v6076_v31  ;;  %v6086_v0 = vld [vmem:[%s7999_s3 + $0x220] sm:$0xff] }
 0x254   :  { %v3437_v58 = vpop.f32.mrf.mxu0 }
 0x255   :  { %v3372_v6 = vpop.f32.mrf.mxu3  ;;  %4180 = vmatpush.bf16.msra.mxu1 %v6060_v12  ;;  %v6085_v12 = vld [vmem:[%s7999_s3 + $0x218] sm:$0xff] }
 0x256   :  { %v3450_v32 = vpop.f32.mrf.mxu1  ;;  %v3461_v63 = vpop.f32.mrf.mxu2 }
 0x257   :  { %4193 = vmatpush.bf16.msra.mxu2 %v6068_v44  ;;  %v6082_v44 = vld [vmem:[%s7999_s3 + $0x200] sm:$0xff] }
 0x259   :  { %4181 = vmatpush.bf16.msra.mxu1 %v6059_v52 }
 0x25b   :  { %4194 = vmatpush.bf16.msra.mxu2 %v6067_v46 }
 0x25d   :  { %v3422_v27 = vpop.f32.mrf.mxu3  ;;  %4182 = vmatpush.bf16.msra.mxu1 %v6058_v51 }
 0x25e   :  { %v3463_v62 = vpop.f32.mrf.mxu2  ;;  %v3423_v19 = vadd.f32 %v3422_v27, %v3410_v11 }
 0x25f   :  { %4195 = vmatpush.bf16.msra.mxu2 %v6066_v54 }
 0x260   :  { %v3436_v9 = vadd.f32 %v7826_v47, %v3423_v19  ;;  %v6075_v47 = vld [vmem:[%s7999_s3 + $0x1c8] sm:$0xff] }
 0x261   :  { %4207 = vmatpush.bf16.msra.mxu3 %v6075_v47 }
 0x262   :  { %v3449_v14 = vadd.f32 %v7828_v21, %v3436_v9 }
 0x264   :  { %v3462_v13 = vadd.f32 %v3461_v63, %v3449_v14  ;;  %v6087_v14 = vld [vmem:[%s7999_s3 + $0x228] sm:$0xff] }
 0x265   :  { %v3424_v2 = vpop.f32.mrf.mxu3  ;;  %4208 = vmatpush.bf16.msra.mxu3 %v6074_v26 }
 0x266   :  { %v6088_v2 = vld [vmem:[%s7999_s3 + $0x230] sm:$0xff] }
 0x26d   :  { %v3474_v37 = vpop.f32.mrf.mxu3 }
 0x26e   :  { %v3475_v29 = vadd.f32 %v3474_v37, %v3462_v13  ;;  %v6084_v13 = vld [vmem:[%s7999_s3 + $0x210] sm:$0xff]  ;;  %v6083_v37 = vld [vmem:[%s7999_s3 + $0x208] sm:$0xff]  ;;  %s6209_s3 = smov [#allocation2]  }
 0x26f   :  { %s4246_s6 = sshll.u32 %s6209_s3, 4  ;;  %s4247_s6 = int_to_ptr.vmem [resolvable:$true] %s4246_s6 }
 0x270   :  { %v3479_v7 = vsel %vm3478_vm13, %v3475_v29, 0.0 }
 0x271   :  { %v5439_v15 = vmul.f32 -1.442695, %v3479_v7  ;;  %v5440_v16 = vclamps-f32 %v3479_v7, 6.571429 }
 0x273   :  { %6171 = vpow2.f32 %v5439_v15  ;;  %v5441_v22 = vadd.f32 2.0, %v5440_v16 }
 0x275   :  { %v3503_v21 = vmul.f32 1.75, %v5441_v22  ;;  %v3476_v41 = vpop.f32.mrf.mxu3 }
 0x277   :  { %v3504_v38 = vmul.f32 %v3503_v21, %v3503_v21  ;;  %v3508_v34 = vadd.f32 %v3503_v21, %v3503_v21 }
 0x279   :  { %v6172_v53 = vpop.eup %6171  ;;  %v3505_v57 = vsub.f32 0.0, %v3504_v38  ;;  %v3509_v58 = vmul.f32 1.442695, %v3508_v34 }
 0x27a   :  { %v3483_v43 = vadd.f32 1.0, %v6172_v53 }
 0x27b   :  { %v3506_v23 = vmul.f32 1.442695, %v3505_v57  ;;  %6173 = vpow2.f32 %v3509_v58 }
 0x27c   :  { %6175 = vrcp.f32 %v3483_v43  ;;  %v3495_v30 = vand.u32 2147483648, %v3483_v43  ;;  %v3493_v40 = vand.u32 2147483647, %v3483_v43  ;;  %vm3489_vm15 = vweird.f32 %v3483_v43 }
 0x27d   :  { %6177 = vpow2.f32 %v3506_v23 }
 0x27e   :  { %v3496_v11 = vor.u32 1.1754944e-38, %v3495_v30  ;;  %vm3494_vm1 = vcmp.eq.f32.partialorder %v3493_v40, 8.507059e+37 }
 0x281   :  { %v6174_v6 = vpop.eup %6173 }
 0x282   :  { %v6176_v28 = vpop.eup %6175  ;;  %v3511_v4 = vmul.f32 0.36787945, %v6174_v6  ;;  %v3513_v36 = vmul.f32 0.049787067, %v6174_v6  ;;  %v3515_v59 = vmul.f32 0.006737947, %v6174_v6 }
 0x283   :  { %v6178_v32 = vpop.eup %6177  ;;  %v3485_v63 = vmul.f32 %v6176_v28, %v3483_v43  ;;  %vm3490_vm14 = vweird.f32 %v6176_v28  ;;  %v3517_v62 = vmul.f32 0.000911882, %v6174_v6  ;;  %v3519_v5 = vmul.f32 0.0001234098, %v6174_v6 }
 0x284   :  { %v3526_v3 = vpack.c.bf16 %v6178_v32, %v6178_v32  ;;  %v3512_v48 = vmul.f32 %v6178_v32, %v3511_v4  ;;  %vm3491_vm0 = vmor %vm3489_vm15, %vm3490_vm14  ;;  %v3521_v20 = vmul.f32 1.67017e-05, %v6174_v6  ;;  %v3523_v33 = vmul.f32 2.2603294e-06, %v6174_v6 }
 0x285   :  { %v3486_v24 = vsub.f32 1.0, %v3485_v63 }
 0x286   :  { %4131 = vmatmul.bf16.vlgmr.msrb.gmra.mxu1 %v3526_v3  ;;  %v3527_v56 = vpack.c.bf16 %v3512_v48, %v3512_v48  ;;  %v3514_v42 = vmul.f32 %v3513_v36, %v3512_v48 }
 0x287   :  { %v3487_v55 = vmul.f32 %v6176_v28, %v3486_v24 }
 0x288   :  { %4144 = vmatmul.bf16.vlgmr.msrb.gmra.mxu2 %v3527_v56  ;;  %v3528_v27 = vpack.c.bf16 %v3514_v42, %v3514_v42  ;;  %v3516_v18 = vmul.f32 %v3515_v59, %v3514_v42 }
 0x289   :  { %v3488_v45 = vadd.f32 %v6176_v28, %v3487_v55 }
 0x28a   :  { %4157 = vmatmul.bf16.vlgmr.msrb.gmra.mxu3 %v3528_v27  ;;  %v3518_v19 = vmul.f32 %v3517_v62, %v3516_v18  ;;  %v3529_v8 = vpack.c.bf16 %v3516_v18, %v3516_v18 }
 0x28b   :  { %v3492_v61 = vsel %vm3491_vm0, %v6176_v28, %v3488_v45 }
 0x28c   :  { %v3497_v49 = vsel %vm3494_vm1, %v3496_v11, %v3492_v61  ;;  %v3520_v9 = vmul.f32 %v3519_v5, %v3518_v19  ;;  %v3530_v25 = vpack.c.bf16 %v3518_v19, %v3518_v19 }
 0x28d   :  { %v3499_v1 = vmul.f32 %v3497_v49, %v3479_v7 }
 0x28e   :  { %v3522_v39 = vmul.f32 %v3521_v20, %v3520_v9  ;;  %v3531_v10 = vpack.c.bf16 %v3520_v9, %v3520_v9 }
 0x28f   :  { %v3525_v60 = vpack.c.bf16 %v3499_v1, %v3499_v1 }
 0x290   :  { %v3532_v17 = vpack.c.bf16 %v3522_v39, %v3522_v39  ;;  %v3524_v29 = vmul.f32 %v3523_v33, %v3522_v39 }
 0x291   :  { %4118 = vmatmul.bf16.vlgmr.msrb.gmra.mxu0 %v3525_v60 }
 0x292   :  { %4214 = vmatpush.bf16.msrb.mxu0 %v6089_v50  ;;  %v3533_v52 = vpack.c.bf16 %v3524_v29, %v3524_v29 }
 0x296   :  { %4183 = vmatmul.bf16.vlgmr.msra.gmra.mxu1 %v3530_v25  ;;  %4215 = vmatpush.bf16.msrb.mxu0 %v6088_v2 }
 0x298   :  { %4196 = vmatmul.bf16.vlgmr.msra.gmra.mxu2 %v3531_v10 }
 0x29a   :  { %4209 = vmatmul.bf16.vlgmr.msra.gmra.mxu3 %v3532_v17  ;;  %4216 = vmatpush.bf16.msrb.mxu0 %v6087_v14 }
 0x29e   :  { %4217 = vmatpush.bf16.msrb.mxu0 %v6086_v0 }
 0x2a1   :  { %4170 = vmatmul.bf16.vlgmr.msra.gmra.mxu0 %v3529_v8 }
 0x2a2   :  { %4218 = vmatpush.bf16.msrb.mxu0 %v6085_v12 }
 0x2a6   :  { %4219 = vmatpush.bf16.msrb.mxu0 %v6084_v13 }
 0x2aa   :  { %4220 = vmatpush.bf16.msrb.mxu0 %v6083_v37 }
 0x2ae   :  { %4221 = vmatpush.bf16.msrb.mxu0 %v6082_v44 }
 0x2b1   :  { %4222 = vmatmul.bf16.vlgmr.msrb.gmra.mxu0 %v3533_v52 }
 0x303   :  { %v4132_v31 = vpop.f32.mrf.mxu1 }
 0x30b   :  { %v4134_v7 = vpop.f32.mrf.mxu1  ;;  %v4145_v15 = vpop.f32.mrf.mxu2 }
 0x30d   :  { %v4158_v16 = vpop.f32.mrf.mxu3 }
 0x30e   :  { %v4119_v35 = vpop.f32.mrf.mxu0 }
 0x30f   :  { %v4133_v54 = vadd.f32 %v4132_v31, %v4119_v35 }
 0x311   :  { %v4146_v21 = vadd.f32 %v4145_v15, %v4133_v54 }
 0x313   :  { %v4147_v46 = vpop.f32.mrf.mxu2  ;;  %v4184_v51 = vpop.f32.mrf.mxu1  ;;  %v4159_v53 = vadd.f32 %v4158_v16, %v4146_v21 }
 0x315   :  { %v4160_v47 = vpop.f32.mrf.mxu3 }
 0x316   :  { %v4121_v22 = vpop.f32.mrf.mxu0 }
 0x31b   :  { %v4186_v41 = vpop.f32.mrf.mxu1  ;;  %v4197_v26 = vpop.f32.mrf.mxu2 }
 0x31d   :  { %v4210_v38 = vpop.f32.mrf.mxu3 }
 0x31e   :  { %v4171_v34 = vpop.f32.mrf.mxu0 }
 0x31f   :  { %v4172_v57 = vadd.f32 %v4171_v34, %v4159_v53 }
 0x321   :  { %v4185_v43 = vadd.f32 %v4184_v51, %v4172_v57 }
 0x323   :  { %v4199_v58 = vpop.f32.mrf.mxu2  ;;  %v4198_v28 = vadd.f32 %v4197_v26, %v4185_v43 }
 0x325   :  { %v4212_v23 = vpop.f32.mrf.mxu3  ;;  %v4211_v4 = vadd.f32 %v4210_v38, %v4198_v28 }
 0x326   :  { %v4173_v6 = vpop.f32.mrf.mxu0 }
 0x32e   :  { %v4223_v32 = vpop.f32.mrf.mxu0 }
 0x32f   :  { %v4224_v63 = vadd.f32 %v4223_v32, %v4211_v4 }
 0x331   :  { %v4228_v3 = vsel %vm4227_vm2, %v4224_v63, -inf }
 0x332   :  { %4229 = vmax.xlane.f32.xlu0 %v4228_v3 }
 0x336   :  { %v4225_v48 = vpop.f32.mrf.mxu0 }
 0x3a5   :  { %v4230_v36 = vpop.xlane.xlu0 %4229 }
 0x3a6   :  { %v4231_v24 = vsub.f32 %v4224_v63, %v4230_v36 }
 0x3a8   :  { %v4232_v30 = vmul.f32 1.442695, %v4231_v24 }
 0x3aa   :  { %6179 = vpow2.f32 %v4232_v30 }
 0x3b0   :  { %v6180_v56 = vpop.eup %6179 }
 0x3b1   :  { %v4234_v42 = vsel %vm4227_vm2, %v6180_v56, 0.0 }
 0x3b2   :  { %4235 = vadd.xlane.f32.xlu0 %v4234_v42 }
 0x425   :  { %v4236_v59 = vpop.xlane.xlu0 %4235 }
 0x426   :  { %6181 = vlog2.f32 %v4236_v59 }
 0x42c   :  { %v6182_v55 = vpop.eup %6181 }
 0x42d   :  { %v4238_v40 = vmul.f32 0.6931472, %v6182_v55 }
 0x42f   :  { %v4239_v27 = vsub.f32 %v4231_v24, %v4238_v40 }
 0x431   :  { %4240 = vst.msk [vmem:[#allocation2] sm:$0x3] %vm4227_vm2, %v4239_v27 }
 0x432   :  { %4251 = dma.vmem_to_hbm [thread:$0]  %s4247_s6, 32, %s4249_s9, [#allocation3]  }
 0x433   :  { %6207 = dma.done.wait [#allocation3], 32  }
 0x434   :  { %6208 = vsyncadd [#allocation3], 4294967264 }
 0x435   :  { %4256 = vsyncpa [#allocation3], 1 }

</bundles_post_ra>
